<compile_context>
chip_gen: v7x
topology: tpu7x:2x2x1
jax: 0.10.0
libtpu: 0.0.40
codegen_flags: <defaults>
</compile_context>

<pallas_src>
import numpy as np
import jax
import jax.numpy as jnp
from jax.experimental import pallas as pl
from jax.experimental.pallas import tpu as pltpu


# ---------------------------------------------------------------------------
# Fixed EEGNet geometry implied by the module: input (B, 1, 80, 272), NCHW.
# ---------------------------------------------------------------------------
_EEG_CH = 80        # conv1 "height" (EEG channels)  -> stage-2 map width
_EEG_T = 272        # conv1 kernel width == input width (time samples)
_C1 = 12            # conv1 out channels (-> stage-2 map height)
_C2 = 4             # conv2 / conv3 out channels
_K2H, _K2W = 4, 20  # conv2 kernel
_K3H, _K3W = 8, 10  # conv3 kernel
_W2OUT = 80         # conv2 output width
_W3OUT = 16         # conv3 output width


# ------------------------------ kernel helpers ------------------------------

def _elu(y):
    # ELU(alpha=1), f32.
    return jnp.where(y > 0.0, y, jnp.exp(jnp.minimum(y, 0.0)) - 1.0)


def _bn_rows(y):
    # Per-row (== per-channel) BatchNorm over the lane axis, eps = 0
    # (nn.BatchNorm2d(C, False)), training-mode batch stats, two-pass variance.
    mu = jnp.mean(y, axis=1, keepdims=True)
    yc = y - mu
    var = jnp.mean(yc * yc, axis=1, keepdims=True)
    return yc * jax.lax.rsqrt(var)


def _bn_grouped(y, gmat):
    # BatchNorm where one channel spans a contiguous group of rows; gmat is the
    # block-diagonal group-averaging matrix (f32).  eps = 0, two-pass variance.
    m_lane = jnp.mean(y, axis=1, keepdims=True)
    mu = jnp.dot(gmat, m_lane, preferred_element_type=jnp.float32)
    yc = y - mu
    v_lane = jnp.mean(yc * yc, axis=1, keepdims=True)
    var = jnp.dot(gmat, v_lane, preferred_element_type=jnp.float32)
    return yc * jax.lax.rsqrt(var)


def _mxu(a, b):
    # bf16 MXU operands, f32 accumulate.
    return jnp.dot(a.astype(jnp.bfloat16), b.astype(jnp.bfloat16),
                   preferred_element_type=jnp.float32)


def _slide_max_lanes(z, pool):
    # out[:, l] = max(z[:, l], ..., z[:, l+pool-1]);  width = L - pool + 1.
    L = z.shape[1]
    out = z[:, 0:L - pool + 1]
    for k in range(1, pool):
        out = jnp.maximum(out, z[:, k:L - pool + 1 + k])
    return out


# ------------------------------- fused kernel -------------------------------

def _eegnet_fused_kernel(x_ref, w1_ref, b1_ref,
                         hp2_ref, wp2_ref, c2_ref, b2_ref, g2_ref,
                         sr2_ref, sl2_ref,
                         hp3_ref, wp3_ref, c3_ref, b3_ref, g3_ref,
                         sr3_ref, sl3_ref,
                         wf_ref, bf_ref, o_ref):
    B = o_ref.shape[0]

    # ---- stage 1: conv1 (1x272) as one lane-dense GEMM ---------------------
    # (12, 272) . (B*80, 272)^T -> (12, B*80); lanes = (batch, EEG channel).
    y1 = jax.lax.dot_general(w1_ref[...], x_ref[...], (((1,), (1,)), ((), ())),
                             preferred_element_type=jnp.float32)
    y1 = _bn_rows(_elu(y1 + b1_ref[...]))
    # TODO(synk): F.dropout(0.25) (stochastic, training-mode) treated as identity.

    # ---- stage 2: permute(0,3,1,2) + ReplicationPad2d((9,10,1,2)) ----------
    # Expressed as two constant selection matmuls; p2 rows = padded height
    # (15 -> 16), lanes = (batch, padded width 99 in a 128-lane slot).
    p2 = _mxu(hp2_ref[...], _mxu(y1, wp2_ref[...])).astype(jnp.bfloat16)

    # conv2 (1 -> 4, (4,20)): width taps and kernel height folded into a single
    # K = 20*16 = 320 contraction; RHS is the width-shifted im2col slab.
    c2 = c2_ref[...]                                        # (48, 320) bf16
    y2_parts = []
    for b in range(B):
        base = b * 128
        r2 = jnp.concatenate(
            [p2[:, base + dj:base + dj + _W2OUT] for dj in range(_K2W)],
            axis=0)                                         # (320, 80) bf16
        y2_parts.append(jnp.dot(c2, r2, preferred_element_type=jnp.float32))
    y2 = jnp.concatenate(y2_parts, axis=1)                  # (48, B*80)
    y2 = _bn_grouped(_elu(y2 + b2_ref[...]), g2_ref[...])
    # TODO(synk): F.dropout(0.25) treated as identity.

    # MaxPool2d((2,5),(2,5)): pairwise sliding maxima + two 0/1 selection
    # matmuls (rows: (oc, oh) pairs; lanes: groups of 5 inside each batch half).
    zr = jnp.maximum(y2[0:47, :], y2[1:48, :])              # (47, B*80)
    m2 = _slide_max_lanes(zr, 5)                            # (47, B*80-4)
    pooled2 = _mxu(_mxu(sr2_ref[...], m2), sl2_ref[...])    # (24, B*16)

    # ---- stage 3: ReplicationPad2d((5,4,4,3)) as two selection matmuls -----
    # p3 rows = (in-channel, padded height 13 -> 16), lanes = (batch, padded
    # width 25 in a 32-lane slot).
    p3 = _mxu(hp3_ref[...], _mxu(pooled2, wp3_ref[...])).astype(jnp.bfloat16)

    # conv3 (4 -> 4, (8,10)): taps, input channels and height folded into a
    # single K = 10*4*16 = 640 contraction per batch.
    c3 = c3_ref[...]                                        # (24, 640) bf16
    y3_parts = []
    for b in range(B):
        base = b * 32
        r3 = jnp.concatenate(
            [p3[:, base + dj:base + dj + _W3OUT] for dj in range(_K3W)],
            axis=0)                                         # (640, 16) bf16
        y3_parts.append(jnp.dot(c3, r3, preferred_element_type=jnp.float32))
    y3 = jnp.concatenate(y3_parts, axis=1)                  # (24, B*16)
    y3 = _bn_grouped(_elu(y3 + b3_ref[...]), g3_ref[...])
    # TODO(synk): F.dropout(0.25) treated as identity.

    # MaxPool2d(2, 2)
    zr3 = jnp.maximum(y3[0:23, :], y3[1:24, :])             # (23, B*16)
    m3 = _slide_max_lanes(zr3, 2)                           # (23, B*16-1)
    pooled3 = _mxu(_mxu(sr3_ref[...], m3), sl3_ref[...])    # (12, B*8)

    # ---- classifier: Linear(96, 1) + sigmoid (no flatten needed) -----------
    prod = pooled3 * wf_ref[...]                            # (12, B*8)
    col = jnp.sum(prod, axis=0, keepdims=True)              # (1, B*8)
    logits = jnp.concatenate(
        [jnp.sum(col[:, b * 8:(b + 1) * 8], axis=1, keepdims=True)
         for b in range(B)], axis=0)                        # (B, 1)
    logits = logits + bf_ref[...]
    o_ref[...] = 1.0 / (1.0 + jnp.exp(-logits))


# ----------------------- host-side weight preprocessing ---------------------

def _conv2_band(W2):
    """(4,1,4,20) -> (48, 320) with C2[oc*12+oh, dj*16+h] = W2[oc,0,h-oh,dj]
    for 0 <= h-oh < 4, else 0 (h = padded height index, 15 rows + 1 dummy)."""
    w2 = W2.reshape(_C2, _K2H, _K2W)
    oh = jnp.arange(_C1)[:, None]                   # (12, 1)
    h = jnp.arange(16)[None, :]                     # (1, 16)
    di = h - oh
    valid = (di >= 0) & (di < _K2H)
    g = w2[:, jnp.clip(di, 0, _K2H - 1), :]         # (4, 12, 16, 20)
    g = jnp.where(valid[None, :, :, None], g, 0.0)
    return g.transpose(0, 1, 3, 2).reshape(_C2 * _C1, _K2W * 16)


def _conv3_band(W3):
    """(4,4,8,10) -> (24, 640) with C3[oc*6+oh, dj*64 + ic*16 + h] =
    W3[oc,ic,h-oh,dj] for 0 <= h-oh < 8, else 0."""
    oh = jnp.arange(6)[:, None]
    h = jnp.arange(16)[None, :]
    di = h - oh
    valid = (di >= 0) & (di < _K3H)
    g = W3[:, :, jnp.clip(di, 0, _K3H - 1), :]      # (4, 4, 6, 16, 10)
    g = jnp.where(valid[None, None, :, :, None], g, 0.0)
    return g.transpose(0, 2, 4, 1, 3).reshape(_C2 * 6, _K3W * _C2 * 16)


def _pad2_mats(B):
    # Hpad2: padded-height selection (16 x 12); row 15 is a zero dummy row.
    hp = np.zeros((16, _C1), np.float32)
    for h in range(15):
        hp[h, min(max(h - 1, 0), _C1 - 1)] = 1.0
    # Wpad2: per-batch width replication pad into a 128-lane slot (B*80 x B*128).
    wp = np.zeros((B * _EEG_CH, B * 128), np.float32)
    for b in range(B):
        for w in range(99):
            wp[b * _EEG_CH + min(max(w - 9, 0), _EEG_CH - 1), b * 128 + w] = 1.0
    return hp, wp


def _pad3_mats(B):
    hp = np.zeros((_C2 * 16, _C2 * 6), np.float32)
    for ic in range(_C2):
        for h in range(13):
            hp[ic * 16 + h, ic * 6 + min(max(h - 4, 0), 5)] = 1.0
    wp = np.zeros((B * 16, B * 32), np.float32)
    for b in range(B):
        for w in range(25):
            wp[b * 16 + min(max(w - 5, 0), 15), b * 32 + w] = 1.0
    return hp, wp


def _row_pool_sel(groups, out_rows):
    in_rows = 2 * out_rows
    s = np.zeros((groups * out_rows, groups * in_rows - 1), np.float32)
    for g in range(groups):
        for i in range(out_rows):
            s[g * out_rows + i, g * in_rows + 2 * i] = 1.0
    return s


def _lane_pool_sel(B, in_per_b, pool):
    out_per_b = in_per_b // pool
    s = np.zeros((B * in_per_b - (pool - 1), B * out_per_b), np.float32)
    for b in range(B):
        for j in range(out_per_b):
            s[b * in_per_b + pool * j, b * out_per_b + j] = 1.0
    return s


def _group_mean_mat(groups, rows_per_group):
    return np.kron(np.eye(groups, dtype=np.float32),
                   np.full((rows_per_group, rows_per_group),
                           1.0 / rows_per_group, np.float32))


def eegnet_forward(x, params):
    """x: (B, 1, 80, 272) NCHW float32  ->  (B, 1) sigmoid outputs."""
    W1, b1, W2, b2, W3, b3, Wf, bf = params
    B = x.shape[0]
    bf16 = jnp.bfloat16

    # Input: a free reshape + bf16 cast; everything else is weight-only
    # preprocessing (constant-folded under jit).
    x2d = x.reshape(B * _EEG_CH, _EEG_T).astype(bf16)
    w1m = W1.reshape(_C1, _EEG_T).astype(bf16)
    b1r = b1.reshape(_C1, 1)

    hp2_np, wp2_np = _pad2_mats(B)
    hp3_np, wp3_np = _pad3_mats(B)

    c2 = _conv2_band(W2).astype(bf16)                        # (48, 320)
    b2r = jnp.repeat(b2, _C1).reshape(_C2 * _C1, 1)
    g2 = jnp.asarray(_group_mean_mat(_C2, _C1))              # (48, 48)
    sr2 = jnp.asarray(_row_pool_sel(_C2, 6), bf16)           # (24, 47)
    sl2 = jnp.asarray(_lane_pool_sel(B, _EEG_CH, 5), bf16)   # (B*80-4, B*16)

    c3 = _conv3_band(W3).astype(bf16)                        # (24, 640)
    b3r = jnp.repeat(b3, 6).reshape(_C2 * 6, 1)
    g3 = jnp.asarray(_group_mean_mat(_C2, 6))                # (24, 24)
    sr3 = jnp.asarray(_row_pool_sel(_C2, 3), bf16)           # (12, 23)
    sl3 = jnp.asarray(_lane_pool_sel(B, 16, 2), bf16)        # (B*16-1, B*8)

    wf12 = Wf.reshape(_C2, 3, 8).reshape(_C2 * 3, 8)
    wft = jnp.concatenate([wf12] * B, axis=1)                # (12, B*8)
    bfc = bf.reshape(1, 1)

    vmem = pl.BlockSpec(memory_space=pltpu.MemorySpace.VMEM)
    return pl.pallas_call(
        _eegnet_fused_kernel,
        out_shape=jax.ShapeDtypeStruct((B, 1), jnp.float32),
        in_specs=[vmem] * 19,
        out_specs=vmem,
    )(x2d, w1m, b1r,
      jnp.asarray(hp2_np, bf16), jnp.asarray(wp2_np, bf16), c2, b2r, g2,
      sr2, sl2,
      jnp.asarray(hp3_np, bf16), jnp.asarray(wp3_np, bf16), c3, b3r, g3,
      sr3, sl3,
      wft, bfc)


# ----------------------------- reference & test ------------------------------

def _reference_forward(x, params):
    # Pure JAX/XLA reference mirroring the PyTorch forward (dropout = identity).
    W1, b1, W2, b2, W3, b3, Wf, bf = params
    dn = ("NCHW", "OIHW", "NCHW")
    hp = jax.lax.Precision.HIGHEST

    def conv(y, w, b):
        y = jax.lax.conv_general_dilated(y, w, (1, 1), "VALID",
                                         dimension_numbers=dn, precision=hp)
        return y + b.reshape(1, -1, 1, 1)

    def bn(y):
        mu = jnp.mean(y, axis=(0, 2, 3), keepdims=True)
        var = jnp.var(y, axis=(0, 2, 3), keepdims=True)
        return (y - mu) * jax.lax.rsqrt(var)              # eps = 0

    def pool(y, kh, kw):
        return jax.lax.reduce_window(y, -jnp.inf, jax.lax.max,
                                     (1, 1, kh, kw), (1, 1, kh, kw), "VALID")

    y = bn(jax.nn.elu(conv(x, W1, b1)))
    y = jnp.transpose(y, (0, 3, 1, 2))
    y = jnp.pad(y, ((0, 0), (0, 0), (1, 2), (9, 10)), mode="edge")
    y = pool(bn(jax.nn.elu(conv(y, W2, b2))), 2, 5)
    y = jnp.pad(y, ((0, 0), (0, 0), (4, 3), (5, 4)), mode="edge")
    y = pool(bn(jax.nn.elu(conv(y, W3, b3))), 2, 2)
    y = y.reshape(y.shape[0], -1)
    logits = jnp.dot(y, Wf.T, precision=hp) + bf
    return jax.nn.sigmoid(logits)


def init_params(key):
    ks = jax.random.split(key, 8)
    W1 = jax.random.normal(ks[0], (12, 1, 1, 272), jnp.float32) * 0.06
    b1 = jax.random.normal(ks[1], (12,), jnp.float32) * 0.06
    W2 = jax.random.normal(ks[2], (4, 1, 4, 20), jnp.float32) * 0.11
    b2 = jax.random.normal(ks[3], (4,), jnp.float32) * 0.11
    W3 = jax.random.normal(ks[4], (4, 4, 8, 10), jnp.float32) * 0.05
    b3 = jax.random.normal(ks[5], (4,), jnp.float32) * 0.05
    Wf = jax.random.normal(ks[6], (1, 96), jnp.float32) * 0.10
    bf = jax.random.normal(ks[7], (1,), jnp.float32) * 0.10
    return (W1, b1, W2, b2, W3, b3, Wf, bf)


if __name__ == "__main__":
    key = jax.random.PRNGKey(0)
    pkey, xkey = jax.random.split(key)
    params = init_params(pkey)
    # EEGNet geometry implied by the module: 80 EEG channels x 272 samples.
    x = jax.random.normal(xkey, (2, 1, _EEG_CH, _EEG_T), jnp.float32)

    out = jax.block_until_ready(jax.jit(eegnet_forward)(x, params))
    assert out.shape == (2, 1) and out.dtype == jnp.float32
    assert bool(jnp.all(jnp.isfinite(out)))

    ref = jax.block_until_ready(jax.jit(_reference_forward)(x, params))
    err = float(jnp.max(jnp.abs(out - ref)))
    # bf16 MXU operands (f32 accumulate) vs. a HIGHEST-precision f32 reference.
    assert err < 3e-2, f"max |kernel - reference| = {err}"
    print("KERNEL_OK")
</pallas_src>

<mosaic_0001>
module attributes {stable_mosaic.version = 11 : i64} {
  func.func @_eegnet_fused_kernel(%arg0: memref<160x272xbf16, #tpu.memory_space<vmem>>, %arg1: memref<12x272xbf16, #tpu.memory_space<vmem>>, %arg2: memref<12x1xf32, #tpu.memory_space<vmem>>, %arg3: memref<16x12xbf16, #tpu.memory_space<vmem>>, %arg4: memref<160x256xbf16, #tpu.memory_space<vmem>>, %arg5: memref<48x320xbf16, #tpu.memory_space<vmem>>, %arg6: memref<48x1xf32, #tpu.memory_space<vmem>>, %arg7: memref<48x48xf32, #tpu.memory_space<vmem>>, %arg8: memref<24x47xbf16, #tpu.memory_space<vmem>>, %arg9: memref<156x32xbf16, #tpu.memory_space<vmem>>, %arg10: memref<64x24xbf16, #tpu.memory_space<vmem>>, %arg11: memref<32x64xbf16, #tpu.memory_space<vmem>>, %arg12: memref<24x640xbf16, #tpu.memory_space<vmem>>, %arg13: memref<24x1xf32, #tpu.memory_space<vmem>>, %arg14: memref<24x24xf32, #tpu.memory_space<vmem>>, %arg15: memref<12x23xbf16, #tpu.memory_space<vmem>>, %arg16: memref<31x16xbf16, #tpu.memory_space<vmem>>, %arg17: memref<12x16xf32, #tpu.memory_space<vmem>>, %arg18: memref<1x1xf32, #tpu.memory_space<vmem>>, %arg19: memref<2x1xf32, #tpu.memory_space<vmem>>) attributes {dimension_semantics = [], scalar_prefetch = 0 : i64, scratch_operands = 0 : i64, tpu.core_type = #tpu.core_type<tc>} {
    %c0 = arith.constant 0 : index
    %c0_0 = arith.constant 0 : index
    %0 = vector.load %arg1[%c0, %c0_0] : memref<12x272xbf16, #tpu.memory_space<vmem>>, vector<12x272xbf16>
    %c0_1 = arith.constant 0 : index
    %c0_2 = arith.constant 0 : index
    %1 = vector.load %arg0[%c0_1, %c0_2] : memref<160x272xbf16, #tpu.memory_space<vmem>>, vector<160x272xbf16>
    %cst = arith.constant dense<0.000000e+00> : vector<12x160xf32>
    %2 = tpu.matmul %0, %1, %cst {dimension_numbers = #tpu.dot_dimension_numbers<[1], [1], [0], [0], [0, 0, 1, 0], [], []>} : vector<12x272xbf16>, vector<160x272xbf16>, vector<12x160xf32> -> vector<12x160xf32>
    %c0_3 = arith.constant 0 : index
    %c0_4 = arith.constant 0 : index
    %3 = vector.load %arg2[%c0_3, %c0_4] : memref<12x1xf32, #tpu.memory_space<vmem>>, vector<12x1xf32>
    %4 = vector.broadcast %3 : vector<12x1xf32> to vector<12x160xf32>
    %5 = arith.addf %2, %4 : vector<12x160xf32>
    %cst_5 = arith.constant 0.000000e+00 : f32
    %6 = vector.broadcast %cst_5 : f32 to vector<12x160xf32>
    %7 = arith.cmpf ogt, %5, %6 : vector<12x160xf32>
    %cst_6 = arith.constant 0.000000e+00 : f32
    %8 = vector.broadcast %cst_6 : f32 to vector<12x160xf32>
    %9 = arith.minimumf %5, %8 : vector<12x160xf32>
    %10 = math.exp %9 : vector<12x160xf32>
    %cst_7 = arith.constant 1.000000e+00 : f32
    %11 = vector.broadcast %cst_7 : f32 to vector<12x160xf32>
    %12 = arith.subf %10, %11 : vector<12x160xf32>
    %13 = arith.select %7, %5, %12 : vector<12x160xi1>, vector<12x160xf32>
    %cst_8 = arith.constant dense<0.000000e+00> : vector<12xf32>
    %14 = vector.multi_reduction <add>, %13, %cst_8 [1] : vector<12x160xf32> to vector<12xf32>
    %15 = vector.shape_cast %14 : vector<12xf32> to vector<12x1xf32>
    %cst_9 = arith.constant 1.600000e+02 : f32
    %16 = vector.broadcast %cst_9 : f32 to vector<12x1xf32>
    %17 = arith.divf %15, %16 : vector<12x1xf32>
    %18 = vector.broadcast %17 : vector<12x1xf32> to vector<12x160xf32>
    %19 = arith.subf %13, %18 : vector<12x160xf32>
    %20 = arith.mulf %19, %19 : vector<12x160xf32>
    %cst_10 = arith.constant dense<0.000000e+00> : vector<12xf32>
    %21 = vector.multi_reduction <add>, %20, %cst_10 [1] : vector<12x160xf32> to vector<12xf32>
    %22 = vector.shape_cast %21 : vector<12xf32> to vector<12x1xf32>
    %cst_11 = arith.constant 1.600000e+02 : f32
    %23 = vector.broadcast %cst_11 : f32 to vector<12x1xf32>
    %24 = arith.divf %22, %23 : vector<12x1xf32>
    %25 = math.rsqrt %24 : vector<12x1xf32>
    %26 = vector.broadcast %25 : vector<12x1xf32> to vector<12x160xf32>
    %27 = arith.mulf %19, %26 : vector<12x160xf32>
    %c0_12 = arith.constant 0 : index
    %c0_13 = arith.constant 0 : index
    %28 = vector.load %arg3[%c0_12, %c0_13] : memref<16x12xbf16, #tpu.memory_space<vmem>>, vector<16x12xbf16>
    %c0_14 = arith.constant 0 : index
    %c0_15 = arith.constant 0 : index
    %29 = vector.load %arg4[%c0_14, %c0_15] : memref<160x256xbf16, #tpu.memory_space<vmem>>, vector<160x256xbf16>
    %30 = arith.truncf %27 : vector<12x160xf32> to vector<12x160xbf16>
    %cst_16 = arith.constant dense<0.000000e+00> : vector<12x256xf32>
    %31 = tpu.matmul %30, %29, %cst_16 {dimension_numbers = #tpu.dot_dimension_numbers<[1], [0], [0], [1], [0, 0, 1, 1], [], []>} : vector<12x160xbf16>, vector<160x256xbf16>, vector<12x256xf32> -> vector<12x256xf32>
    %32 = arith.truncf %31 : vector<12x256xf32> to vector<12x256xbf16>
    %cst_17 = arith.constant dense<0.000000e+00> : vector<16x256xf32>
    %33 = tpu.matmul %28, %32, %cst_17 {dimension_numbers = #tpu.dot_dimension_numbers<[1], [0], [0], [1], [0, 0, 1, 1], [], []>} : vector<16x12xbf16>, vector<12x256xbf16>, vector<16x256xf32> -> vector<16x256xf32>
    %34 = arith.truncf %33 : vector<16x256xf32> to vector<16x256xbf16>
    %c0_18 = arith.constant 0 : index
    %c0_19 = arith.constant 0 : index
    %35 = vector.load %arg5[%c0_18, %c0_19] : memref<48x320xbf16, #tpu.memory_space<vmem>>, vector<48x320xbf16>
    %36 = vector.extract_strided_slice %34 {offsets = [0, 0], sizes = [16, 80], strides = [1, 1]} : vector<16x256xbf16> to vector<16x80xbf16>
    %37 = vector.extract_strided_slice %34 {offsets = [0, 1], sizes = [16, 80], strides = [1, 1]} : vector<16x256xbf16> to vector<16x80xbf16>
    %38 = vector.extract_strided_slice %34 {offsets = [0, 2], sizes = [16, 80], strides = [1, 1]} : vector<16x256xbf16> to vector<16x80xbf16>
    %39 = vector.extract_strided_slice %34 {offsets = [0, 3], sizes = [16, 80], strides = [1, 1]} : vector<16x256xbf16> to vector<16x80xbf16>
    %40 = vector.extract_strided_slice %34 {offsets = [0, 4], sizes = [16, 80], strides = [1, 1]} : vector<16x256xbf16> to vector<16x80xbf16>
    %41 = vector.extract_strided_slice %34 {offsets = [0, 5], sizes = [16, 80], strides = [1, 1]} : vector<16x256xbf16> to vector<16x80xbf16>
    %42 = vector.extract_strided_slice %34 {offsets = [0, 6], sizes = [16, 80], strides = [1, 1]} : vector<16x256xbf16> to vector<16x80xbf16>
    %43 = vector.extract_strided_slice %34 {offsets = [0, 7], sizes = [16, 80], strides = [1, 1]} : vector<16x256xbf16> to vector<16x80xbf16>
    %44 = vector.extract_strided_slice %34 {offsets = [0, 8], sizes = [16, 80], strides = [1, 1]} : vector<16x256xbf16> to vector<16x80xbf16>
    %45 = vector.extract_strided_slice %34 {offsets = [0, 9], sizes = [16, 80], strides = [1, 1]} : vector<16x256xbf16> to vector<16x80xbf16>
    %46 = vector.extract_strided_slice %34 {offsets = [0, 10], sizes = [16, 80], strides = [1, 1]} : vector<16x256xbf16> to vector<16x80xbf16>
    %47 = vector.extract_strided_slice %34 {offsets = [0, 11], sizes = [16, 80], strides = [1, 1]} : vector<16x256xbf16> to vector<16x80xbf16>
    %48 = vector.extract_strided_slice %34 {offsets = [0, 12], sizes = [16, 80], strides = [1, 1]} : vector<16x256xbf16> to vector<16x80xbf16>
    %49 = vector.extract_strided_slice %34 {offsets = [0, 13], sizes = [16, 80], strides = [1, 1]} : vector<16x256xbf16> to vector<16x80xbf16>
    %50 = vector.extract_strided_slice %34 {offsets = [0, 14], sizes = [16, 80], strides = [1, 1]} : vector<16x256xbf16> to vector<16x80xbf16>
    %51 = vector.extract_strided_slice %34 {offsets = [0, 15], sizes = [16, 80], strides = [1, 1]} : vector<16x256xbf16> to vector<16x80xbf16>
    %52 = vector.extract_strided_slice %34 {offsets = [0, 16], sizes = [16, 80], strides = [1, 1]} : vector<16x256xbf16> to vector<16x80xbf16>
    %53 = vector.extract_strided_slice %34 {offsets = [0, 17], sizes = [16, 80], strides = [1, 1]} : vector<16x256xbf16> to vector<16x80xbf16>
    %54 = vector.extract_strided_slice %34 {offsets = [0, 18], sizes = [16, 80], strides = [1, 1]} : vector<16x256xbf16> to vector<16x80xbf16>
    %55 = vector.extract_strided_slice %34 {offsets = [0, 19], sizes = [16, 80], strides = [1, 1]} : vector<16x256xbf16> to vector<16x80xbf16>
    %56 = tpu.concatenate %36, %37, %38, %39, %40, %41, %42, %43, %44, %45, %46, %47, %48, %49, %50, %51 in 0 : vector<16x80xbf16>, vector<16x80xbf16>, vector<16x80xbf16>, vector<16x80xbf16>, vector<16x80xbf16>, vector<16x80xbf16>, vector<16x80xbf16>, vector<16x80xbf16>, vector<16x80xbf16>, vector<16x80xbf16>, vector<16x80xbf16>, vector<16x80xbf16>, vector<16x80xbf16>, vector<16x80xbf16>, vector<16x80xbf16>, vector<16x80xbf16> -> vector<256x80xbf16>
    %57 = tpu.concatenate %52, %53, %54, %55 in 0 : vector<16x80xbf16>, vector<16x80xbf16>, vector<16x80xbf16>, vector<16x80xbf16> -> vector<64x80xbf16>
    %58 = tpu.concatenate %56, %57 in 0 : vector<256x80xbf16>, vector<64x80xbf16> -> vector<320x80xbf16>
    %cst_20 = arith.constant dense<0.000000e+00> : vector<48x80xf32>
    %59 = tpu.matmul %35, %58, %cst_20 {dimension_numbers = #tpu.dot_dimension_numbers<[1], [0], [0], [1], [0, 0, 1, 1], [], []>} : vector<48x320xbf16>, vector<320x80xbf16>, vector<48x80xf32> -> vector<48x80xf32>
    %60 = vector.extract_strided_slice %34 {offsets = [0, 128], sizes = [16, 80], strides = [1, 1]} : vector<16x256xbf16> to vector<16x80xbf16>
    %61 = vector.extract_strided_slice %34 {offsets = [0, 129], sizes = [16, 80], strides = [1, 1]} : vector<16x256xbf16> to vector<16x80xbf16>
    %62 = vector.extract_strided_slice %34 {offsets = [0, 130], sizes = [16, 80], strides = [1, 1]} : vector<16x256xbf16> to vector<16x80xbf16>
    %63 = vector.extract_strided_slice %34 {offsets = [0, 131], sizes = [16, 80], strides = [1, 1]} : vector<16x256xbf16> to vector<16x80xbf16>
    %64 = vector.extract_strided_slice %34 {offsets = [0, 132], sizes = [16, 80], strides = [1, 1]} : vector<16x256xbf16> to vector<16x80xbf16>
    %65 = vector.extract_strided_slice %34 {offsets = [0, 133], sizes = [16, 80], strides = [1, 1]} : vector<16x256xbf16> to vector<16x80xbf16>
    %66 = vector.extract_strided_slice %34 {offsets = [0, 134], sizes = [16, 80], strides = [1, 1]} : vector<16x256xbf16> to vector<16x80xbf16>
    %67 = vector.extract_strided_slice %34 {offsets = [0, 135], sizes = [16, 80], strides = [1, 1]} : vector<16x256xbf16> to vector<16x80xbf16>
    %68 = vector.extract_strided_slice %34 {offsets = [0, 136], sizes = [16, 80], strides = [1, 1]} : vector<16x256xbf16> to vector<16x80xbf16>
    %69 = vector.extract_strided_slice %34 {offsets = [0, 137], sizes = [16, 80], strides = [1, 1]} : vector<16x256xbf16> to vector<16x80xbf16>
    %70 = vector.extract_strided_slice %34 {offsets = [0, 138], sizes = [16, 80], strides = [1, 1]} : vector<16x256xbf16> to vector<16x80xbf16>
    %71 = vector.extract_strided_slice %34 {offsets = [0, 139], sizes = [16, 80], strides = [1, 1]} : vector<16x256xbf16> to vector<16x80xbf16>
    %72 = vector.extract_strided_slice %34 {offsets = [0, 140], sizes = [16, 80], strides = [1, 1]} : vector<16x256xbf16> to vector<16x80xbf16>
    %73 = vector.extract_strided_slice %34 {offsets = [0, 141], sizes = [16, 80], strides = [1, 1]} : vector<16x256xbf16> to vector<16x80xbf16>
    %74 = vector.extract_strided_slice %34 {offsets = [0, 142], sizes = [16, 80], strides = [1, 1]} : vector<16x256xbf16> to vector<16x80xbf16>
    %75 = vector.extract_strided_slice %34 {offsets = [0, 143], sizes = [16, 80], strides = [1, 1]} : vector<16x256xbf16> to vector<16x80xbf16>
    %76 = vector.extract_strided_slice %34 {offsets = [0, 144], sizes = [16, 80], strides = [1, 1]} : vector<16x256xbf16> to vector<16x80xbf16>
    %77 = vector.extract_strided_slice %34 {offsets = [0, 145], sizes = [16, 80], strides = [1, 1]} : vector<16x256xbf16> to vector<16x80xbf16>
    %78 = vector.extract_strided_slice %34 {offsets = [0, 146], sizes = [16, 80], strides = [1, 1]} : vector<16x256xbf16> to vector<16x80xbf16>
    %79 = vector.extract_strided_slice %34 {offsets = [0, 147], sizes = [16, 80], strides = [1, 1]} : vector<16x256xbf16> to vector<16x80xbf16>
    %80 = tpu.concatenate %60, %61, %62, %63, %64, %65, %66, %67, %68, %69, %70, %71, %72, %73, %74, %75 in 0 : vector<16x80xbf16>, vector<16x80xbf16>, vector<16x80xbf16>, vector<16x80xbf16>, vector<16x80xbf16>, vector<16x80xbf16>, vector<16x80xbf16>, vector<16x80xbf16>, vector<16x80xbf16>, vector<16x80xbf16>, vector<16x80xbf16>, vector<16x80xbf16>, vector<16x80xbf16>, vector<16x80xbf16>, vector<16x80xbf16>, vector<16x80xbf16> -> vector<256x80xbf16>
    %81 = tpu.concatenate %76, %77, %78, %79 in 0 : vector<16x80xbf16>, vector<16x80xbf16>, vector<16x80xbf16>, vector<16x80xbf16> -> vector<64x80xbf16>
    %82 = tpu.concatenate %80, %81 in 0 : vector<256x80xbf16>, vector<64x80xbf16> -> vector<320x80xbf16>
    %cst_21 = arith.constant dense<0.000000e+00> : vector<48x80xf32>
    %83 = tpu.matmul %35, %82, %cst_21 {dimension_numbers = #tpu.dot_dimension_numbers<[1], [0], [0], [1], [0, 0, 1, 1], [], []>} : vector<48x320xbf16>, vector<320x80xbf16>, vector<48x80xf32> -> vector<48x80xf32>
    %84 = tpu.concatenate %59, %83 in 1 : vector<48x80xf32>, vector<48x80xf32> -> vector<48x160xf32>
    %c0_22 = arith.constant 0 : index
    %c0_23 = arith.constant 0 : index
    %85 = vector.load %arg6[%c0_22, %c0_23] : memref<48x1xf32, #tpu.memory_space<vmem>>, vector<48x1xf32>
    %86 = vector.broadcast %85 : vector<48x1xf32> to vector<48x160xf32>
    %87 = arith.addf %84, %86 : vector<48x160xf32>
    %cst_24 = arith.constant 0.000000e+00 : f32
    %88 = vector.broadcast %cst_24 : f32 to vector<48x160xf32>
    %89 = arith.cmpf ogt, %87, %88 : vector<48x160xf32>
    %cst_25 = arith.constant 0.000000e+00 : f32
    %90 = vector.broadcast %cst_25 : f32 to vector<48x160xf32>
    %91 = arith.minimumf %87, %90 : vector<48x160xf32>
    %92 = math.exp %91 : vector<48x160xf32>
    %cst_26 = arith.constant 1.000000e+00 : f32
    %93 = vector.broadcast %cst_26 : f32 to vector<48x160xf32>
    %94 = arith.subf %92, %93 : vector<48x160xf32>
    %95 = arith.select %89, %87, %94 : vector<48x160xi1>, vector<48x160xf32>
    %c0_27 = arith.constant 0 : index
    %c0_28 = arith.constant 0 : index
    %96 = vector.load %arg7[%c0_27, %c0_28] : memref<48x48xf32, #tpu.memory_space<vmem>>, vector<48x48xf32>
    %cst_29 = arith.constant dense<0.000000e+00> : vector<48xf32>
    %97 = vector.multi_reduction <add>, %95, %cst_29 [1] : vector<48x160xf32> to vector<48xf32>
    %98 = vector.shape_cast %97 : vector<48xf32> to vector<48x1xf32>
    %cst_30 = arith.constant 1.600000e+02 : f32
    %99 = vector.broadcast %cst_30 : f32 to vector<48x1xf32>
    %100 = arith.divf %98, %99 : vector<48x1xf32>
    %cst_31 = arith.constant dense<0.000000e+00> : vector<48x1xf32>
    %101 = tpu.matmul %96, %100, %cst_31 {dimension_numbers = #tpu.dot_dimension_numbers<[1], [0], [0], [1], [0, 0, 1, 1], [], []>} : vector<48x48xf32>, vector<48x1xf32>, vector<48x1xf32> -> vector<48x1xf32>
    %102 = vector.broadcast %101 : vector<48x1xf32> to vector<48x160xf32>
    %103 = arith.subf %95, %102 : vector<48x160xf32>
    %104 = arith.mulf %103, %103 : vector<48x160xf32>
    %cst_32 = arith.constant dense<0.000000e+00> : vector<48xf32>
    %105 = vector.multi_reduction <add>, %104, %cst_32 [1] : vector<48x160xf32> to vector<48xf32>
    %106 = vector.shape_cast %105 : vector<48xf32> to vector<48x1xf32>
    %cst_33 = arith.constant 1.600000e+02 : f32
    %107 = vector.broadcast %cst_33 : f32 to vector<48x1xf32>
    %108 = arith.divf %106, %107 : vector<48x1xf32>
    %cst_34 = arith.constant dense<0.000000e+00> : vector<48x1xf32>
    %109 = tpu.matmul %96, %108, %cst_34 {dimension_numbers = #tpu.dot_dimension_numbers<[1], [0], [0], [1], [0, 0, 1, 1], [], []>} : vector<48x48xf32>, vector<48x1xf32>, vector<48x1xf32> -> vector<48x1xf32>
    %110 = math.rsqrt %109 : vector<48x1xf32>
    %111 = vector.broadcast %110 : vector<48x1xf32> to vector<48x160xf32>
    %112 = arith.mulf %103, %111 : vector<48x160xf32>
    %113 = vector.extract_strided_slice %112 {offsets = [0, 0], sizes = [47, 160], strides = [1, 1]} : vector<48x160xf32> to vector<47x160xf32>
    %114 = vector.extract_strided_slice %112 {offsets = [1, 0], sizes = [47, 160], strides = [1, 1]} : vector<48x160xf32> to vector<47x160xf32>
    %115 = arith.maximumf %113, %114 : vector<47x160xf32>
    %116 = vector.extract_strided_slice %115 {offsets = [0, 0], sizes = [47, 156], strides = [1, 1]} : vector<47x160xf32> to vector<47x156xf32>
    %117 = vector.extract_strided_slice %115 {offsets = [0, 1], sizes = [47, 156], strides = [1, 1]} : vector<47x160xf32> to vector<47x156xf32>
    %118 = arith.maximumf %116, %117 : vector<47x156xf32>
    %119 = vector.extract_strided_slice %115 {offsets = [0, 2], sizes = [47, 156], strides = [1, 1]} : vector<47x160xf32> to vector<47x156xf32>
    %120 = arith.maximumf %118, %119 : vector<47x156xf32>
    %121 = vector.extract_strided_slice %115 {offsets = [0, 3], sizes = [47, 156], strides = [1, 1]} : vector<47x160xf32> to vector<47x156xf32>
    %122 = arith.maximumf %120, %121 : vector<47x156xf32>
    %123 = vector.extract_strided_slice %115 {offsets = [0, 4], sizes = [47, 156], strides = [1, 1]} : vector<47x160xf32> to vector<47x156xf32>
    %124 = arith.maximumf %122, %123 : vector<47x156xf32>
    %c0_35 = arith.constant 0 : index
    %c0_36 = arith.constant 0 : index
    %125 = vector.load %arg8[%c0_35, %c0_36] : memref<24x47xbf16, #tpu.memory_space<vmem>>, vector<24x47xbf16>
    %126 = arith.truncf %124 : vector<47x156xf32> to vector<47x156xbf16>
    %cst_37 = arith.constant dense<0.000000e+00> : vector<24x156xf32>
    %127 = tpu.matmul %125, %126, %cst_37 {dimension_numbers = #tpu.dot_dimension_numbers<[1], [0], [0], [1], [0, 0, 1, 1], [], []>} : vector<24x47xbf16>, vector<47x156xbf16>, vector<24x156xf32> -> vector<24x156xf32>
    %c0_38 = arith.constant 0 : index
    %c0_39 = arith.constant 0 : index
    %128 = vector.load %arg9[%c0_38, %c0_39] : memref<156x32xbf16, #tpu.memory_space<vmem>>, vector<156x32xbf16>
    %129 = arith.truncf %127 : vector<24x156xf32> to vector<24x156xbf16>
    %cst_40 = arith.constant dense<0.000000e+00> : vector<24x32xf32>
    %130 = tpu.matmul %129, %128, %cst_40 {dimension_numbers = #tpu.dot_dimension_numbers<[1], [0], [0], [1], [0, 0, 1, 1], [], []>} : vector<24x156xbf16>, vector<156x32xbf16>, vector<24x32xf32> -> vector<24x32xf32>
    %c0_41 = arith.constant 0 : index
    %c0_42 = arith.constant 0 : index
    %131 = vector.load %arg10[%c0_41, %c0_42] : memref<64x24xbf16, #tpu.memory_space<vmem>>, vector<64x24xbf16>
    %c0_43 = arith.constant 0 : index
    %c0_44 = arith.constant 0 : index
    %132 = vector.load %arg11[%c0_43, %c0_44] : memref<32x64xbf16, #tpu.memory_space<vmem>>, vector<32x64xbf16>
    %133 = arith.truncf %130 : vector<24x32xf32> to vector<24x32xbf16>
    %cst_45 = arith.constant dense<0.000000e+00> : vector<24x64xf32>
    %134 = tpu.matmul %133, %132, %cst_45 {dimension_numbers = #tpu.dot_dimension_numbers<[1], [0], [0], [1], [0, 0, 1, 1], [], []>} : vector<24x32xbf16>, vector<32x64xbf16>, vector<24x64xf32> -> vector<24x64xf32>
    %135 = arith.truncf %134 : vector<24x64xf32> to vector<24x64xbf16>
    %cst_46 = arith.constant dense<0.000000e+00> : vector<64x64xf32>
    %136 = tpu.matmul %131, %135, %cst_46 {dimension_numbers = #tpu.dot_dimension_numbers<[1], [0], [0], [1], [0, 0, 1, 1], [], []>} : vector<64x24xbf16>, vector<24x64xbf16>, vector<64x64xf32> -> vector<64x64xf32>
    %137 = arith.truncf %136 : vector<64x64xf32> to vector<64x64xbf16>
    %c0_47 = arith.constant 0 : index
    %c0_48 = arith.constant 0 : index
    %138 = vector.load %arg12[%c0_47, %c0_48] : memref<24x640xbf16, #tpu.memory_space<vmem>>, vector<24x640xbf16>
    %139 = vector.extract_strided_slice %137 {offsets = [0, 0], sizes = [64, 16], strides = [1, 1]} : vector<64x64xbf16> to vector<64x16xbf16>
    %140 = vector.extract_strided_slice %137 {offsets = [0, 1], sizes = [64, 16], strides = [1, 1]} : vector<64x64xbf16> to vector<64x16xbf16>
    %141 = vector.extract_strided_slice %137 {offsets = [0, 2], sizes = [64, 16], strides = [1, 1]} : vector<64x64xbf16> to vector<64x16xbf16>
    %142 = vector.extract_strided_slice %137 {offsets = [0, 3], sizes = [64, 16], strides = [1, 1]} : vector<64x64xbf16> to vector<64x16xbf16>
    %143 = vector.extract_strided_slice %137 {offsets = [0, 4], sizes = [64, 16], strides = [1, 1]} : vector<64x64xbf16> to vector<64x16xbf16>
    %144 = vector.extract_strided_slice %137 {offsets = [0, 5], sizes = [64, 16], strides = [1, 1]} : vector<64x64xbf16> to vector<64x16xbf16>
    %145 = vector.extract_strided_slice %137 {offsets = [0, 6], sizes = [64, 16], strides = [1, 1]} : vector<64x64xbf16> to vector<64x16xbf16>
    %146 = vector.extract_strided_slice %137 {offsets = [0, 7], sizes = [64, 16], strides = [1, 1]} : vector<64x64xbf16> to vector<64x16xbf16>
    %147 = vector.extract_strided_slice %137 {offsets = [0, 8], sizes = [64, 16], strides = [1, 1]} : vector<64x64xbf16> to vector<64x16xbf16>
    %148 = vector.extract_strided_slice %137 {offsets = [0, 9], sizes = [64, 16], strides = [1, 1]} : vector<64x64xbf16> to vector<64x16xbf16>
    %149 = tpu.concatenate %139, %140, %141, %142, %143, %144, %145, %146, %147, %148 in 0 : vector<64x16xbf16>, vector<64x16xbf16>, vector<64x16xbf16>, vector<64x16xbf16>, vector<64x16xbf16>, vector<64x16xbf16>, vector<64x16xbf16>, vector<64x16xbf16>, vector<64x16xbf16>, vector<64x16xbf16> -> vector<640x16xbf16>
    %cst_49 = arith.constant dense<0.000000e+00> : vector<24x16xf32>
    %150 = tpu.matmul %138, %149, %cst_49 {dimension_numbers = #tpu.dot_dimension_numbers<[1], [0], [0], [1], [0, 0, 1, 1], [], []>} : vector<24x640xbf16>, vector<640x16xbf16>, vector<24x16xf32> -> vector<24x16xf32>
    %151 = vector.extract_strided_slice %137 {offsets = [0, 32], sizes = [64, 16], strides = [1, 1]} : vector<64x64xbf16> to vector<64x16xbf16>
    %152 = vector.extract_strided_slice %137 {offsets = [0, 33], sizes = [64, 16], strides = [1, 1]} : vector<64x64xbf16> to vector<64x16xbf16>
    %153 = vector.extract_strided_slice %137 {offsets = [0, 34], sizes = [64, 16], strides = [1, 1]} : vector<64x64xbf16> to vector<64x16xbf16>
    %154 = vector.extract_strided_slice %137 {offsets = [0, 35], sizes = [64, 16], strides = [1, 1]} : vector<64x64xbf16> to vector<64x16xbf16>
    %155 = vector.extract_strided_slice %137 {offsets = [0, 36], sizes = [64, 16], strides = [1, 1]} : vector<64x64xbf16> to vector<64x16xbf16>
    %156 = vector.extract_strided_slice %137 {offsets = [0, 37], sizes = [64, 16], strides = [1, 1]} : vector<64x64xbf16> to vector<64x16xbf16>
    %157 = vector.extract_strided_slice %137 {offsets = [0, 38], sizes = [64, 16], strides = [1, 1]} : vector<64x64xbf16> to vector<64x16xbf16>
    %158 = vector.extract_strided_slice %137 {offsets = [0, 39], sizes = [64, 16], strides = [1, 1]} : vector<64x64xbf16> to vector<64x16xbf16>
    %159 = vector.extract_strided_slice %137 {offsets = [0, 40], sizes = [64, 16], strides = [1, 1]} : vector<64x64xbf16> to vector<64x16xbf16>
    %160 = vector.extract_strided_slice %137 {offsets = [0, 41], sizes = [64, 16], strides = [1, 1]} : vector<64x64xbf16> to vector<64x16xbf16>
    %161 = tpu.concatenate %151, %152, %153, %154, %155, %156, %157, %158, %159, %160 in 0 : vector<64x16xbf16>, vector<64x16xbf16>, vector<64x16xbf16>, vector<64x16xbf16>, vector<64x16xbf16>, vector<64x16xbf16>, vector<64x16xbf16>, vector<64x16xbf16>, vector<64x16xbf16>, vector<64x16xbf16> -> vector<640x16xbf16>
    %cst_50 = arith.constant dense<0.000000e+00> : vector<24x16xf32>
    %162 = tpu.matmul %138, %161, %cst_50 {dimension_numbers = #tpu.dot_dimension_numbers<[1], [0], [0], [1], [0, 0, 1, 1], [], []>} : vector<24x640xbf16>, vector<640x16xbf16>, vector<24x16xf32> -> vector<24x16xf32>
    %163 = tpu.concatenate %150, %162 in 1 : vector<24x16xf32>, vector<24x16xf32> -> vector<24x32xf32>
    %c0_51 = arith.constant 0 : index
    %c0_52 = arith.constant 0 : index
    %164 = vector.load %arg13[%c0_51, %c0_52] : memref<24x1xf32, #tpu.memory_space<vmem>>, vector<24x1xf32>
    %165 = vector.broadcast %164 : vector<24x1xf32> to vector<24x32xf32>
    %166 = arith.addf %163, %165 : vector<24x32xf32>
    %cst_53 = arith.constant 0.000000e+00 : f32
    %167 = vector.broadcast %cst_53 : f32 to vector<24x32xf32>
    %168 = arith.cmpf ogt, %166, %167 : vector<24x32xf32>
    %cst_54 = arith.constant 0.000000e+00 : f32
    %169 = vector.broadcast %cst_54 : f32 to vector<24x32xf32>
    %170 = arith.minimumf %166, %169 : vector<24x32xf32>
    %171 = math.exp %170 : vector<24x32xf32>
    %cst_55 = arith.constant 1.000000e+00 : f32
    %172 = vector.broadcast %cst_55 : f32 to vector<24x32xf32>
    %173 = arith.subf %171, %172 : vector<24x32xf32>
    %174 = arith.select %168, %166, %173 : vector<24x32xi1>, vector<24x32xf32>
    %c0_56 = arith.constant 0 : index
    %c0_57 = arith.constant 0 : index
    %175 = vector.load %arg14[%c0_56, %c0_57] : memref<24x24xf32, #tpu.memory_space<vmem>>, vector<24x24xf32>
    %cst_58 = arith.constant dense<0.000000e+00> : vector<24xf32>
    %176 = vector.multi_reduction <add>, %174, %cst_58 [1] : vector<24x32xf32> to vector<24xf32>
    %177 = vector.shape_cast %176 : vector<24xf32> to vector<24x1xf32>
    %cst_59 = arith.constant 3.200000e+01 : f32
    %178 = vector.broadcast %cst_59 : f32 to vector<24x1xf32>
    %179 = arith.divf %177, %178 : vector<24x1xf32>
    %cst_60 = arith.constant dense<0.000000e+00> : vector<24x1xf32>
    %180 = tpu.matmul %175, %179, %cst_60 {dimension_numbers = #tpu.dot_dimension_numbers<[1], [0], [0], [1], [0, 0, 1, 1], [], []>} : vector<24x24xf32>, vector<24x1xf32>, vector<24x1xf32> -> vector<24x1xf32>
    %181 = vector.broadcast %180 : vector<24x1xf32> to vector<24x32xf32>
    %182 = arith.subf %174, %181 : vector<24x32xf32>
    %183 = arith.mulf %182, %182 : vector<24x32xf32>
    %cst_61 = arith.constant dense<0.000000e+00> : vector<24xf32>
    %184 = vector.multi_reduction <add>, %183, %cst_61 [1] : vector<24x32xf32> to vector<24xf32>
    %185 = vector.shape_cast %184 : vector<24xf32> to vector<24x1xf32>
    %cst_62 = arith.constant 3.200000e+01 : f32
    %186 = vector.broadcast %cst_62 : f32 to vector<24x1xf32>
    %187 = arith.divf %185, %186 : vector<24x1xf32>
    %cst_63 = arith.constant dense<0.000000e+00> : vector<24x1xf32>
    %188 = tpu.matmul %175, %187, %cst_63 {dimension_numbers = #tpu.dot_dimension_numbers<[1], [0], [0], [1], [0, 0, 1, 1], [], []>} : vector<24x24xf32>, vector<24x1xf32>, vector<24x1xf32> -> vector<24x1xf32>
    %189 = math.rsqrt %188 : vector<24x1xf32>
    %190 = vector.broadcast %189 : vector<24x1xf32> to vector<24x32xf32>
    %191 = arith.mulf %182, %190 : vector<24x32xf32>
    %192 = vector.extract_strided_slice %191 {offsets = [0, 0], sizes = [23, 32], strides = [1, 1]} : vector<24x32xf32> to vector<23x32xf32>
    %193 = vector.extract_strided_slice %191 {offsets = [1, 0], sizes = [23, 32], strides = [1, 1]} : vector<24x32xf32> to vector<23x32xf32>
    %194 = arith.maximumf %192, %193 : vector<23x32xf32>
    %195 = vector.extract_strided_slice %194 {offsets = [0, 0], sizes = [23, 31], strides = [1, 1]} : vector<23x32xf32> to vector<23x31xf32>
    %196 = vector.extract_strided_slice %194 {offsets = [0, 1], sizes = [23, 31], strides = [1, 1]} : vector<23x32xf32> to vector<23x31xf32>
    %197 = arith.maximumf %195, %196 : vector<23x31xf32>
    %c0_64 = arith.constant 0 : index
    %c0_65 = arith.constant 0 : index
    %198 = vector.load %arg15[%c0_64, %c0_65] : memref<12x23xbf16, #tpu.memory_space<vmem>>, vector<12x23xbf16>
    %199 = arith.truncf %197 : vector<23x31xf32> to vector<23x31xbf16>
    %cst_66 = arith.constant dense<0.000000e+00> : vector<12x31xf32>
    %200 = tpu.matmul %198, %199, %cst_66 {dimension_numbers = #tpu.dot_dimension_numbers<[1], [0], [0], [1], [0, 0, 1, 1], [], []>} : vector<12x23xbf16>, vector<23x31xbf16>, vector<12x31xf32> -> vector<12x31xf32>
    %c0_67 = arith.constant 0 : index
    %c0_68 = arith.constant 0 : index
    %201 = vector.load %arg16[%c0_67, %c0_68] : memref<31x16xbf16, #tpu.memory_space<vmem>>, vector<31x16xbf16>
    %202 = arith.truncf %200 : vector<12x31xf32> to vector<12x31xbf16>
    %cst_69 = arith.constant dense<0.000000e+00> : vector<12x16xf32>
    %203 = tpu.matmul %202, %201, %cst_69 {dimension_numbers = #tpu.dot_dimension_numbers<[1], [0], [0], [1], [0, 0, 1, 1], [], []>} : vector<12x31xbf16>, vector<31x16xbf16>, vector<12x16xf32> -> vector<12x16xf32>
    %c0_70 = arith.constant 0 : index
    %c0_71 = arith.constant 0 : index
    %204 = vector.load %arg17[%c0_70, %c0_71] : memref<12x16xf32, #tpu.memory_space<vmem>>, vector<12x16xf32>
    %205 = arith.mulf %203, %204 : vector<12x16xf32>
    %cst_72 = arith.constant dense<0.000000e+00> : vector<16xf32>
    %206 = vector.multi_reduction <add>, %205, %cst_72 [0] : vector<12x16xf32> to vector<16xf32>
    %207 = vector.shape_cast %206 : vector<16xf32> to vector<1x16xf32>
    %208 = vector.extract_strided_slice %207 {offsets = [0, 0], sizes = [1, 8], strides = [1, 1]} : vector<1x16xf32> to vector<1x8xf32>
    %cst_73 = arith.constant dense<0.000000e+00> : vector<1xf32>
    %209 = vector.multi_reduction <add>, %208, %cst_73 [1] : vector<1x8xf32> to vector<1xf32>
    %210 = vector.shape_cast %209 : vector<1xf32> to vector<1x1xf32>
    %211 = vector.extract_strided_slice %207 {offsets = [0, 8], sizes = [1, 8], strides = [1, 1]} : vector<1x16xf32> to vector<1x8xf32>
    %cst_74 = arith.constant dense<0.000000e+00> : vector<1xf32>
    %212 = vector.multi_reduction <add>, %211, %cst_74 [1] : vector<1x8xf32> to vector<1xf32>
    %213 = vector.shape_cast %212 : vector<1xf32> to vector<1x1xf32>
    %214 = tpu.concatenate %210, %213 in 0 : vector<1x1xf32>, vector<1x1xf32> -> vector<2x1xf32>
    %c0_75 = arith.constant 0 : index
    %c0_76 = arith.constant 0 : index
    %215 = vector.load %arg18[%c0_75, %c0_76] : memref<1x1xf32, #tpu.memory_space<vmem>>, vector<1x1xf32>
    %216 = vector.broadcast %215 : vector<1x1xf32> to vector<2x1xf32>
    %217 = arith.addf %214, %216 : vector<2x1xf32>
    %cst_77 = arith.constant 0.000000e+00 : f32
    %218 = vector.broadcast %cst_77 : f32 to vector<2x1xf32>
    %219 = arith.subf %218, %217 : vector<2x1xf32>
    %220 = math.exp %219 : vector<2x1xf32>
    %cst_78 = arith.constant 1.000000e+00 : f32
    %221 = vector.broadcast %cst_78 : f32 to vector<2x1xf32>
    %222 = arith.addf %221, %220 : vector<2x1xf32>
    %cst_79 = arith.constant 1.000000e+00 : f32
    %223 = vector.broadcast %cst_79 : f32 to vector<2x1xf32>
    %224 = arith.divf %223, %222 : vector<2x1xf32>
    %c0_80 = arith.constant 0 : index
    %c0_81 = arith.constant 0 : index
    %225 = vector.load %arg19[%c0_80, %c0_81] : memref<2x1xf32, #tpu.memory_space<vmem>>, vector<2x1xf32>
    tpu.vector_store %arg19[%c0_80, %c0_81], %224 {strides = array<i32>} : memref<2x1xf32, #tpu.memory_space<vmem>>, vector<2x1xf32>,
    return
  }
}

</mosaic_0001>

<bundles_post_ra>
// kernel: eegnet_forward.1
= control target key start
LH: loop header
LB: loop body
LE: loop exit
PB: predicated region body
PF: predicated region fallthrough
CT: control target
= control target key end

     0   :  { %v4393_v1 = vmov 0   ;;  %vm286_vm0 = vcmask 130048   ;;  %vm430_vm1 = vcmask 261120   ;;  %vm435_vm3 = vcmask 1043456   ;;  %s4398_s24 = smov 122   ;;  %s5669_s25 = smov 125   ;;  %s5645_s0 = inlined_call_operand.vmem [shape: bf16[160,272], index: 0, kind: input, shape index: {}]   ;;  %s5646_s1 = inlined_call_operand.vmem [shape: bf16[12,272], index: 1, kind: input, shape index: {}]   ;;  %s5647_s2 = inlined_call_operand.vmem [shape: f32[12,1], index: 2, kind: input, shape index: {}]   ;;  %s5648_s4 = inlined_call_operand.vmem [shape: bf16[160,256], index: 4, kind: input, shape index: {}]   ;;  %s5649_s3 = inlined_call_operand.vmem [shape: bf16[16,12], index: 3, kind: input, shape index: {}]   ;;  %s5650_s5 = inlined_call_operand.vmem [shape: bf16[48,320], index: 5, kind: input, shape index: {}]   ;;  %s5651_s6 = inlined_call_operand.vmem [shape: f32[48,1], index: 6, kind: input, shape index: {}]   ;;  %s5652_s7 = inlined_call_operand.vmem [shape: f32[48,48], index: 7, kind: input, shape index: {}]   ;;  %s5653_s8 = inlined_call_operand.vmem [shape: bf16[24,47], index: 8, kind: input, shape index: {}]   ;;  %s5654_s9 = inlined_call_operand.vmem [shape: bf16[156,32], index: 9, kind: input, shape index: {}]   ;;  %s5655_s11 = inlined_call_operand.vmem [shape: bf16[32,64], index: 11, kind: input, shape index: {}]   ;;  %s5656_s10 = inlined_call_operand.vmem [shape: bf16[64,24], index: 10, kind: input, shape index: {}]   ;;  %s5657_s12 = inlined_call_operand.vmem [shape: bf16[24,640], index: 12, kind: input, shape index: {}]   ;;  %s5658_s13 = inlined_call_operand.vmem [shape: f32[24,1], index: 13, kind: input, shape index: {}]   ;;  %s5659_s14 = inlined_call_operand.vmem [shape: f32[24,24], index: 14, kind: input, shape index: {}]   ;;  %s5660_s15 = inlined_call_operand.vmem [shape: bf16[12,23], index: 15, kind: input, shape index: {}]   ;;  %s5661_s16 = inlined_call_operand.vmem [shape: bf16[31,16], index: 16, kind: input, shape index: {}]   ;;  %s5662_s17 = inlined_call_operand.vmem [shape: f32[12,16], index: 17, kind: input, shape index: {}]   ;;  %s5663_s18 = inlined_call_operand.<no memory space> [shape: f32[1,1], index: 18, kind: input, shape index: {}]   ;;  %s5664_s19 = inlined_call_operand.vmem [shape: f32[2,1], index: 19, kind: output, shape index: {}]  }
   0x1   :  { %5673 = sst [smem:[#allocation3_spill]] %s5645_s0  ;;  %4082 = vset.pattern.permute.xlu0 %v4393_v1  ;;  %4083 = vset.pattern.permute.xlu1 %v4393_v1  ;;  %vm437_vm4 = vcmask 257024   ;;  %vm651_vm8 = vcmask 1045504   ;;  %vm647_vm9 = vcmask 97280   ;;  %s5671_s26 = smov 120   ;;  %vm4411_vm10 = vmmov 0  }
   0x2   :  { %5674 = sst [smem:[#allocation4_spill]] %s5646_s1  ;;  %s5677_s20 = sld [smem:[#allocation3_spill]]  ;;  %vm818_vm11 = vcmask 523264   ;;  %vm1138_vm12 = vcmask 654336  }
   0x3   :  { %5675 = sst [smem:[#allocation5_spill]] %s5647_s2  ;;  %s5678_s0 = sld [smem:[#allocation4_spill]] }
   0x4   :  { %5676 = sst [smem:[#allocation6_spill]] %s5648_s4  ;;  %s5679_s29 = sld [smem:[#allocation5_spill]] }
   0x5   :  { %s5680_s23 = sld [smem:[#allocation6_spill]]  ;;  %s4394_s2 = smov 119  }
   0x6   :  { %s4400_s4 = smov 121   ;;  %s4402_s27 = smov 118  }
   0x7   :  { %s4403_s28 = smov 117   ;;  %s4405_s30 = smov 124  }
   0x8   :  { %v4209_v0 = vld [vmem:[%s5677_s20 + $0x4] ss:$12 sps:$4 sm:$0xff]   ;;  %v4211_v2 = vld [vmem:[%s5677_s20] ss:$12 sps:$4 sm:$0xff]   ;;  %v4212_v3 = vld [vmem:[%s5677_s20 + $0x1c] ss:$12 sps:$4 sm:$0xff]  }
   0x9   :  { %320 = vmatprep.subr.bf16.mxu0 %v4209_v0  ;;  %v4214_v4 = vld [vmem:[%s5677_s20 + $0x18] ss:$12 sps:$4 sm:$0xff]   ;;  %v4215_v5 = vld [vmem:[%s5677_s20 + $0x34] ss:$12 sps:$4 sm:$0xff]   ;;  %v4217_v6 = vld [vmem:[%s5677_s20 + $0x30] ss:$12 sps:$4 sm:$0xff]  }
   0xa   :  { %321 = vmatpush1.bf16.xpose.msra.mxu0 %v4211_v2  ;;  %v4241_v7 = vld [vmem:[%s5678_s0 + $0x4] ss:$12 sps:$4 sm:$0x3f]   ;;  %v4218_v8 = vld [vmem:[%s5677_s20 + $0x4c] ss:$12 sps:$4 sm:$0xff]   ;;  %s4407_s22 = smov 114  }
   0xb   :  { %322 = vmatprep.subr.bf16.mxu0 %v4212_v3  ;;  %352 = vmatprep.mubr.bf16.mxu0 %v4241_v7  ;;  %v4220_v9 = vld [vmem:[%s5677_s20 + $0x48] ss:$12 sps:$4 sm:$0xff]   ;;  %v4221_v10 = vld [vmem:[%s5677_s20 + $0x64] ss:$12 sps:$4 sm:$0xff]   ;;  %v4223_v11 = vld [vmem:[%s5677_s20 + $0x60] ss:$12 sps:$4 sm:$0xff]  }
   0xc   :  { %v4224_v12 = vld [vmem:[%s5677_s20 + $0x7c] ss:$12 sps:$4 sm:$0xff]   ;;  %v109_v13 = vld [vmem:[%s5679_s29] sm:$0xff]  ;;  %v4230_v18 = vld [vmem:[%s5677_s20 + $0xac] ss:$12 sps:$4 sm:$0xff]  }
   0xd   :  { %113 = vperm.xlu0 %4082, %v109_v13   ;;  %v110_v14 = vld [vmem:[%s5679_s29 + $0x8] sm:$0xf]  ;;  %v4226_v15 = vld [vmem:[%s5677_s20 + $0x78] ss:$12 sps:$4 sm:$0xff]   ;;  %v4227_v16 = vld [vmem:[%s5677_s20 + $0x94] ss:$12 sps:$4 sm:$0xff]  }
   0xe   :  { %v4229_v17 = vld [vmem:[%s5677_s20 + $0x90] ss:$12 sps:$4 sm:$0xff]   ;;  %v4232_v19 = vld [vmem:[%s5677_s20 + $0xa8] ss:$12 sps:$4 sm:$0xff]   ;;  %v4235_v21 = vld [vmem:[%s5677_s20 + $0xc0] ss:$12 sps:$4 sm:$0xff]  }
   0xf   :  { %v4233_v20 = vld [vmem:[%s5677_s20 + $0xc4] ss:$12 sps:$4 sm:$0xff]   ;;  %v4236_v22 = vld [vmem:[%s5677_s20 + $0xdc] ss:$12 sps:$4 sm:$0xff]   ;;  %v4244_v27 = vld [vmem:[%s5677_s20 + $0x20] ss:$12 sps:$4 sm:$0xff]  }
  0x10   :  { %v4238_v23 = vld [vmem:[%s5677_s20 + $0xd8] ss:$12 sps:$4 sm:$0xff]   ;;  %v4243_v24 = vld [vmem:[%s5677_s20 + $0x8] ss:$12 sps:$4 sm:$0xff]   ;;  %v294_v28 = vsel %vm286_vm0, %v4244_v27, 0  ;;  %s4404_s29 = smov 116  }
  0x11   :  { %118 = vperm.xlu0 %4082, %v110_v14   ;;  %v4239_v25 = vld [vmem:[%s5678_s0] ss:$12 sps:$4 sm:$0x3f]   ;;  %v291_v26 = vsel %vm286_vm0, %v4243_v24, 0  ;;  %v4245_v29 = vld [vmem:[%s5677_s20 + $0x38] ss:$12 sps:$4 sm:$0xff]  }
  0x12   :  { %323 = vmatpush1.bf16.xpose.msra.mxu0 %v4214_v4  ;;  %v297_v30 = vsel %vm286_vm0, %v4245_v29, 0  ;;  %v4246_v31 = vld [vmem:[%s5677_s20 + $0x50] ss:$12 sps:$4 sm:$0xff]   ;;  %v4247_v33 = vld [vmem:[%s5677_s20 + $0x68] ss:$12 sps:$4 sm:$0xff]  }
  0x13   :  { %324 = vmatprep.subr.bf16.mxu0 %v4215_v5  ;;  %v300_v32 = vsel %vm286_vm0, %v4246_v31, 0  ;;  %v303_v34 = vsel %vm286_vm0, %v4247_v33, 0  ;;  %v4248_v35 = vld [vmem:[%s5677_s20 + $0x80] ss:$12 sps:$4 sm:$0xff]   ;;  %v4249_v37 = vld [vmem:[%s5677_s20 + $0x98] ss:$12 sps:$4 sm:$0xff]  }
  0x14   :  { %v306_v36 = vsel %vm286_vm0, %v4248_v35, 0  ;;  %v309_v38 = vsel %vm286_vm0, %v4249_v37, 0  ;;  %v4250_v39 = vld [vmem:[%s5677_s20 + $0xb0] ss:$12 sps:$4 sm:$0xff]   ;;  %v4251_v41 = vld [vmem:[%s5677_s20 + $0xc8] ss:$12 sps:$4 sm:$0xff]  }
  0x15   :  { %v312_v40 = vsel %vm286_vm0, %v4250_v39, 0  ;;  %v315_v42 = vsel %vm286_vm0, %v4251_v41, 0  ;;  %v4252_v43 = vld [vmem:[%s5677_s20 + $0xe0] ss:$12 sps:$4 sm:$0xff]   ;;  %v4262_v24 = vld [vmem:[%s5680_s23 + $0x34] ss:$8 sps:$4 sm:$0xff]  }
  0x16   :  { %v318_v44 = vsel %vm286_vm0, %v4252_v43, 0  ;;  %v4242_v45 = vld [vmem:[%s5678_s0 + $0x8] ss:$12 sps:$4 sm:$0x3f]   ;;  %s4395_s20 = smov 127   ;;  %s4396_s0 = smov 123  }
  0x17   :  { %v4267_v27 = vld [vmem:[%s5680_s23 + $0x40] ss:$8 sps:$4 sm:$0xff]  }
  0x1a   :  { %325 = vmatpush1.bf16.xpose.msra.mxu0 %v4217_v6 }
  0x1b   :  { %326 = vmatprep.subr.bf16.mxu0 %v4218_v8 }
  0x22   :  { %327 = vmatpush1.bf16.xpose.msra.mxu0 %v4220_v9 }
  0x23   :  { %328 = vmatprep.subr.bf16.mxu0 %v4221_v10 }
  0x2a   :  { %329 = vmatpush1.bf16.xpose.msra.mxu0 %v4223_v11 }
  0x2b   :  { %330 = vmatprep.subr.bf16.mxu0 %v4224_v12 }
  0x32   :  { %331 = vmatpush1.bf16.xpose.msra.mxu0 %v4226_v15 }
  0x33   :  { %332 = vmatprep.subr.bf16.mxu0 %v4227_v16 }
  0x3a   :  { %333 = vmatpush1.bf16.xpose.msra.mxu0 %v4229_v17 }
  0x3b   :  { %334 = vmatprep.subr.bf16.mxu0 %v4230_v18  ;;  %v4253_v18 = vld [vmem:[%s5680_s23 + $0x4] ss:$8 sps:$4 sm:$0xff]  }
  0x3c   :  { %597 = vmatprep.subr.bf16.mxu1 %v4253_v18  ;;  %v4742_v18 = vld [vmem:[%s5650_s5 + $0x4] ss:$12 sps:$4 sm:$0xff]  }
  0x42   :  { %335 = vmatpush1.bf16.xpose.msra.mxu0 %v4232_v19  ;;  %v4255_v19 = vld [vmem:[%s5680_s23] ss:$8 sps:$4 sm:$0xff]  }
  0x43   :  { %336 = vmatprep.subr.bf16.mxu0 %v4233_v20  ;;  %v4256_v20 = vld [vmem:[%s5680_s23 + $0x14] ss:$8 sps:$4 sm:$0xff]   ;;  %598 = vmatpush1.bf16.msra.mxu1 %v4255_v19 }
  0x44   :  { %599 = vmatprep.subr.bf16.mxu1 %v4256_v20 }
  0x4a   :  { %337 = vmatpush1.bf16.xpose.msra.mxu0 %v4235_v21  ;;  %v4258_v21 = vld [vmem:[%s5680_s23 + $0x10] ss:$8 sps:$4 sm:$0xff]  }
  0x4b   :  { %338 = vmatprep.subr.bf16.mxu0 %v4236_v22  ;;  %v4259_v22 = vld [vmem:[%s5680_s23 + $0x24] ss:$8 sps:$4 sm:$0xff]   ;;  %600 = vmatpush1.bf16.msra.mxu1 %v4258_v21 }
  0x4c   :  { %601 = vmatprep.subr.bf16.mxu1 %v4259_v22 }
  0x52   :  { %339 = vmatpush1.bf16.xpose.msra.mxu0 %v4238_v23  ;;  %v4261_v23 = vld [vmem:[%s5680_s23 + $0x20] ss:$8 sps:$4 sm:$0xff]  }
  0x53   :  { %363 = vmatprep.subr.bf16.mxu0 %v4393_v1  ;;  %602 = vmatpush1.bf16.msra.mxu1 %v4261_v23 }
  0x54   :  { %603 = vmatprep.subr.bf16.mxu1 %v4262_v24 }
  0x59   :  { %353 = vmatmul.mubr.bf16.vlgmr.msra.gmra.mrb[0].mxu0 %v4239_v25  ;;  %v4264_v25 = vld [vmem:[%s5680_s23 + $0x30] ss:$8 sps:$4 sm:$0xff]  }
  0x5a   :  { %364 = vmatpush1.bf16.xpose.msra.mxu0 %v291_v26  ;;  %395 = vmatprep.mubr.bf16.mxu0 %v4393_v1  ;;  %v4265_v26 = vld [vmem:[%s5680_s23 + $0x44] ss:$8 sps:$4 sm:$0xff]  }
  0x5b   :  { %365 = vmatprep.subr.bf16.mxu0 %v4393_v1  ;;  %604 = vmatpush1.bf16.msra.mxu1 %v4264_v25 }
  0x5c   :  { %605 = vmatprep.subr.bf16.mxu1 %v4265_v26 }
  0x5f   :  { %606 = vmatpush1.bf16.msra.mxu1 %v4267_v27 }
  0x62   :  { %366 = vmatpush1.bf16.xpose.msra.mxu0 %v294_v28 }
  0x63   :  { %367 = vmatprep.subr.bf16.mxu0 %v4393_v1 }
  0x6a   :  { %368 = vmatpush1.bf16.xpose.msra.mxu0 %v297_v30 }
  0x6b   :  { %369 = vmatprep.subr.bf16.mxu0 %v4393_v1 }
  0x72   :  { %370 = vmatpush1.bf16.xpose.msra.mxu0 %v300_v32 }
  0x73   :  { %371 = vmatprep.subr.bf16.mxu0 %v4393_v1 }
  0x7a   :  { %372 = vmatpush1.bf16.xpose.msra.mxu0 %v303_v34 }
  0x7b   :  { %373 = vmatprep.subr.bf16.mxu0 %v4393_v1 }
  0x82   :  { %374 = vmatpush1.bf16.xpose.msra.mxu0 %v306_v36 }
  0x83   :  { %375 = vmatprep.subr.bf16.mxu0 %v4393_v1 }
  0x8a   :  { %376 = vmatpush1.bf16.xpose.msra.mxu0 %v309_v38 }
  0x8b   :  { %377 = vmatprep.subr.bf16.mxu0 %v4393_v1 }
  0x8c   :  { %v114_v46 = vpop.permute.xlu0 %113 }
  0x90   :  { %v119_v48 = vpop.permute.xlu0 %118 }
  0x92   :  { %378 = vmatpush1.bf16.xpose.msra.mxu0 %v312_v40 }
  0x93   :  { %379 = vmatprep.subr.bf16.mxu0 %v4393_v1 }
  0x9a   :  { %380 = vmatpush1.bf16.xpose.msra.mxu0 %v315_v42 }
  0x9b   :  { %381 = vmatprep.subr.bf16.mxu0 %v4393_v1 }
  0xa2   :  { %382 = vmatpush1.bf16.xpose.msra.mxu0 %v318_v44 }
  0xa9   :  { %3444 = vmatmul.mubr.msk.bf16.vlgmr.msra.gmra.mrb[0].mxu0 %vm286_vm0, %v4242_v45  ;;  %v4268_v45 = vld [vmem:[%s5680_s23 + $0x54] ss:$8 sps:$4 sm:$0xff]  }
  0xaa   :  { %607 = vmatprep.subr.bf16.mxu1 %v4268_v45  ;;  %v4808_v45 = vld [vmem:[%s5650_s5 + $0x34] ss:$12 sps:$4 sm:$0xff]  }
 0x17c   :  { %v397_v47 = vpop.f32.mrb[0].mxu0 }
 0x17d   :  { %v4049_v49 = vadd.f32 %v397_v47, %v114_v46  ;;  %v399_v50 = vpop.f32.mrb[1].mxu0  ;;  %v4271_v47 = vld [vmem:[%s5680_s23 + $0x64] ss:$8 sps:$4 sm:$0xff]  }
 0x17e   :  { %v4050_v51 = vadd.f32 %v399_v50, %v114_v46  ;;  %v401_v52 = vpop.f32.mrb[2].mxu0  ;;  %v4270_v46 = vld [vmem:[%s5680_s23 + $0x50] ss:$8 sps:$4 sm:$0xff]  }
 0x17f   :  { %v410_v53 = vmin.f32 %v4049_v49, 0.0  ;;  %v4051_v54 = vadd.f32 %v401_v52, %v119_v48  ;;  %v403_v55 = vpop.f32.mrb[3].mxu0  ;;  %vm406_vm6 = vcmp.gt.f32.partialorder %v4049_v49, 0.0  ;;  %608 = vmatpush1.bf16.msra.mxu1 %v4270_v46  ;;  %v4276_v50 = vld [vmem:[%s5680_s23 + $0x70] ss:$8 sps:$4 sm:$0xff]  }
 0x180   :  { %v411_v56 = vmin.f32 %v4050_v51, 0.0  ;;  %v4052_v57 = vadd.f32 %v403_v55, %v119_v48  ;;  %vm407_vm2 = vcmp.gt.f32.partialorder %v4050_v51, 0.0  ;;  %v4273_v48 = vld [vmem:[%s5680_s23 + $0x60] ss:$8 sps:$4 sm:$0xff]   ;;  %609 = vmatprep.subr.bf16.mxu1 %v4271_v47  ;;  %v4815_v46 = vld [vmem:[%s5650_s5 + $0x30] ss:$12 sps:$4 sm:$0xff]  }
 0x181   :  { %v414_v58 = vmul.f32 1.442695, %v410_v53  ;;  %v412_v59 = vmin.f32 %v4051_v54, 0.0  ;;  %vm408_vm5 = vcmp.gt.f32.partialorder %v4051_v54, 0.0  ;;  %v4279_v52 = vld [vmem:[%s5680_s23 + $0x80] ss:$8 sps:$4 sm:$0xff]  }
 0x182   :  { %v416_v60 = vmul.f32 1.442695, %v411_v56  ;;  %v413_v61 = vmin.f32 %v4052_v57, 0.0  ;;  %vm409_vm7 = vcmp.gt.f32.partialorder %v4052_v57, 0.0  ;;  %v4280_v53 = vld [vmem:[%s5680_s23 + $0x94] ss:$8 sps:$4 sm:$0xff]  }
 0x183   :  { %4329 = vpow2.f32 %v414_v58  ;;  %v418_v62 = vmul.f32 1.442695, %v412_v59  ;;  %610 = vmatpush1.bf16.msra.mxu1 %v4273_v48 }
 0x184   :  { %4331 = vpow2.f32 %v416_v60  ;;  %v420_v63 = vmul.f32 1.442695, %v413_v61 }
 0x185   :  { %4333 = vpow2.f32 %v418_v62 }
 0x186   :  { %4335 = vpow2.f32 %v420_v63 }
 0x18d   :  { %v4330_v0 = vpop.eup %4329 }
 0x18e   :  { %v4332_v2 = vpop.eup %4331  ;;  %v3445_v3 = vadd.f32 -1.0, %v4330_v0 }
 0x18f   :  { %v4334_v4 = vpop.eup %4333  ;;  %v3446_v5 = vadd.f32 -1.0, %v4332_v2 }
 0x190   :  { %v4336_v6 = vpop.eup %4335  ;;  %v3447_v7 = vadd.f32 -1.0, %v4334_v4  ;;  %v426_v10 = vsel %vm406_vm6, %v4049_v49, %v3445_v3  ;;  %v4274_v49 = vld [vmem:[%s5680_s23 + $0x74] ss:$8 sps:$4 sm:$0xff]  }
 0x191   :  { %v427_v8 = vsel %vm407_vm2, %v4050_v51, %v3446_v5  ;;  %v3448_v9 = vadd.f32 -1.0, %v4336_v6  ;;  %611 = vmatprep.subr.bf16.mxu1 %v4274_v49  ;;  %v4277_v51 = vld [vmem:[%s5680_s23 + $0x84] ss:$8 sps:$4 sm:$0xff]  }
 0x192   :  { %v431_v11 = vsel %vm430_vm1, %v427_v8, 0.0  ;;  %v428_v12 = vsel %vm408_vm5, %v4051_v54, %v3447_v7  ;;  %612 = vmatpush1.bf16.msra.mxu1 %v4276_v50  ;;  %v4282_v54 = vld [vmem:[%s5680_s23 + $0x90] ss:$8 sps:$4 sm:$0xff]   ;;  %s4406_s23 = smov 115  }
 0x193   :  { %v432_v13 = vadd.f32 %v431_v11, %v426_v10  ;;  %v429_v14 = vsel %vm409_vm7, %v4052_v57, %v3448_v9  ;;  %v436_v15 = vsel %vm435_vm3, %v428_v12, 0.0  ;;  %613 = vmatprep.subr.bf16.mxu1 %v4277_v51  ;;  %v4283_v11 = vld [vmem:[%s5649_s3] sm:$0xff]   ;;  %s4397_s3 = smov 126   ;;  %v4293_v51 = vld [vmem:[%s5650_s5 + $0x8] ss:$12 sps:$4 sm:$0xff]  }
 0x194   :  { %v438_v16 = vsel %vm437_vm4, %v429_v14, 0.0 }
 0x195   :  { %433 = vadd.xlane.f32.xlu1 %v432_v13  ;;  %v439_v17 = vadd.f32 %v438_v16, %v436_v15 }
 0x196   :  { %614 = vmatpush1.bf16.msra.mxu1 %v4279_v52 }
 0x197   :  { %615 = vmatprep.subr.bf16.mxu1 %v4280_v53 }
 0x199   :  { %440 = vadd.xlane.f32.xlu1 %v439_v17 }
 0x19a   :  { %616 = vmatpush1.bf16.msra.mxu1 %v4282_v54 }
 0x222   :  { %v434_v28 = vpop.xlane.xlu1 %433 }
 0x223   :  { %v443_v29 = vmul.f32 0.00625, %v434_v28 }
 0x225   :  { %v445_v30 = vsub.f32 %v426_v10, %v443_v29  ;;  %v446_v31 = vsub.f32 %v427_v8, %v443_v29 }
 0x226   :  { %v441_v32 = vpop.xlane.xlu1 %440 }
 0x227   :  { %v444_v33 = vmul.f32 0.00625, %v441_v32  ;;  %v449_v34 = vmul.f32 %v445_v30, %v445_v30  ;;  %v450_v35 = vmul.f32 %v446_v31, %v446_v31 }
 0x229   :  { %v447_v36 = vsub.f32 %v428_v12, %v444_v33  ;;  %v448_v37 = vsub.f32 %v429_v14, %v444_v33  ;;  %v453_v38 = vsel %vm430_vm1, %v450_v35, 0.0  ;;  %v1147_v33 = vld [vmem:[%s5651_s6 + $0x10] sm:$0xff]  ;;  %v1149_v35 = vld [vmem:[%s5651_s6 + $0x20] sm:$0xff] }
 0x22a   :  { %v454_v39 = vadd.f32 %v453_v38, %v449_v34 }
 0x22b   :  { %v451_v40 = vmul.f32 %v447_v36, %v447_v36  ;;  %v452_v41 = vmul.f32 %v448_v37, %v448_v37 }
 0x22c   :  { %455 = vadd.xlane.f32.xlu0 %v454_v39 }
 0x22d   :  { %v457_v42 = vsel %vm435_vm3, %v451_v40, 0.0  ;;  %v458_v43 = vsel %vm437_vm4, %v452_v41, 0.0  ;;  %v4789_v40 = vld [vmem:[%s5650_s5] ss:$12 sps:$4 sm:$0xff]   ;;  %v4794_v41 = vld [vmem:[%s5650_s5 + $0x1c] ss:$12 sps:$4 sm:$0xff]  }
 0x22e   :  { %v459_v44 = vadd.f32 %v458_v43, %v457_v42  ;;  %v4410_v42 = vmov 0.0  }
 0x230   :  { %460 = vadd.xlane.f32.xlu1 %v459_v44  ;;  %v4803_v44 = vld [vmem:[%s5650_s5 + $0x18] ss:$12 sps:$4 sm:$0xff]  }
 0x2b9   :  { %v456_v55 = vpop.xlane.xlu0 %455 }
 0x2ba   :  { %v462_v56 = vmul.f32 0.00625, %v456_v55  ;;  %v4294_v55 = vld [vmem:[%s5650_s5 + $0x20] ss:$12 sps:$4 sm:$0xff]  }
 0x2bc   :  { %4337 = vrsqrt.f32 %v462_v56 }
 0x2bd   :  { %v461_v57 = vpop.xlane.xlu1 %460 }
 0x2be   :  { %v463_v58 = vmul.f32 0.00625, %v461_v57 }
 0x2c0   :  { %4339 = vrsqrt.f32 %v463_v58  ;;  %v4295_v58 = vld [vmem:[%s5650_s5 + $0x38] ss:$12 sps:$4 sm:$0xff]  }
 0x2c6   :  { %v4338_v59 = vpop.eup %4337 }
 0x2c7   :  { %v467_v61 = vmul.f32 %v4338_v59, %v446_v31  ;;  %v466_v63 = vmul.f32 %v4338_v59, %v445_v30  ;;  %v1145_v31 = vld [vmem:[%s5651_s6] sm:$0xff] }
 0x2ca   :  { %v4340_v60 = vpop.eup %4339 }
 0x2cb   :  { %v469_v62 = vmul.f32 %v4340_v60, %v448_v37  ;;  %v468_v0 = vmul.f32 %v4340_v60, %v447_v36 }
 0x2cd   :  { %v493_v2 = vpack.c.bf16 %v469_v62, %v467_v61  ;;  %v492_v3 = vpack.c.bf16 %v468_v0, %v466_v63 }
 0x2cf   :  { %3469 = vmatprep.mubr.msk.bf16.mxu1 %vm430_vm1, %v493_v2 }
 0x2d0   :  { %630 = vmatmul.mubr.bf16.vlgmr.msra.gmra.mrb[0].mxu1 %v492_v3 }
 0x2d1   :  { %690 = vmatprep.mubr.bf16.mxu1 %v4393_v1 }
 0x3a3   :  { %v631_v4 = vpop.f32.mrb[0].mxu1 }
 0x3a4   :  { %v633_v5 = vpop.f32.mrb[1].mxu1 }
 0x3a5   :  { %v635_v6 = vpop.f32.mrb[2].mxu1 }
 0x3a6   :  { %v640_v7 = vpack.c.bf16 %v635_v6, %v631_v4  ;;  %v637_v8 = vpop.f32.mrb[3].mxu1  ;;  %v1146_v6 = vld [vmem:[%s5651_s6 + $0x8] sm:$0xff] }
 0x3a7   :  { %v641_v9 = vpack.c.bf16 %v637_v8, %v633_v5  ;;  %v1150_v8 = vld [vmem:[%s5651_s6 + $0x28] sm:$0xff] }
 0x3a8   :  { %v653_v10 = vsel %vm651_vm8, %v640_v7, 0  ;;  %v1148_v7 = vld [vmem:[%s5651_s6 + $0x18] sm:$0xff]  ;;  %s4412_s6 = smov 80  }
 0x3a9   :  { %3471 = vmatprep.subr.msk.bf16.mxu1 %vm651_vm8, %v641_v9 }
 0x3aa   :  { %659 = vmatpush1.bf16.msra.mxu1 %v653_v10 }
 0x3ad   :  { %3472 = vmatmul.mubr.msk.bf16.vlgmr.msra.gmra.mrb[4].mxu1 %vm647_vm9, %v4283_v11 }
 0x3ae   :  { %860 = vmatprep.mubr.bf16.mxu1 %v4742_v18 }
 0x480   :  { %v692_v12 = vpop.f32.mrb[4].mxu1 }
 0x481   :  { %v694_v13 = vpop.f32.mrb[5].mxu1 }
 0x482   :  { %v696_v14 = vpop.f32.mrb[6].mxu1 }
 0x483   :  { %v701_v15 = vpack.c.bf16 %v696_v14, %v692_v12  ;;  %v698_v16 = vpop.f32.mrb[7].mxu1 }
 0x484   :  { %v4719_v17 = vpack.c.bf16 %v698_v16, %v694_v13 }
 0x485   :  { %740 = vrot.lane.b32.xlu0 %v701_v15, %s4394_s2  ;;  %716 = vrot.lane.b32.xlu1 %v701_v15, %s4395_s20 }
 0x489   :  { %728 = vrot.lane.b32.xlu0 %v701_v15, %s4396_s0  ;;  %719 = vrot.lane.b32.xlu1 %v701_v15, %s4397_s3 }
 0x48d   :  { %731 = vrot.lane.b32.xlu0 %v701_v15, %s4398_s24  ;;  %722 = vrot.lane.b32.xlu1 %v701_v15, %s5669_s25 }
 0x491   :  { %734 = vrot.lane.b32.xlu0 %v701_v15, %s4400_s4  ;;  %737 = vrot.lane.b32.xlu1 %v701_v15, %s5671_s26 }
 0x495   :  { %743 = vrot.lane.b32.xlu1 %v701_v15, %s4402_s27  ;;  %943 = vrot.lane.b32.xlu0 %v4719_v17, %s4395_s20 }
 0x499   :  { %746 = vrot.lane.b32.xlu1 %v701_v15, %s4403_s28  ;;  %946 = vrot.lane.b32.xlu0 %v4719_v17, %s4397_s3 }
 0x49d   :  { %749 = vrot.lane.b32.xlu1 %v701_v15, %s4404_s29  ;;  %949 = vrot.lane.b32.xlu0 %v4719_v17, %s5669_s25  ;;  %s4408_s25 = smov 113  }
 0x4a1   :  { %725 = vrot.lane.b32.xlu1 %v701_v15, %s4405_s30  ;;  %964 = vrot.lane.b32.xlu0 %v4719_v17, %s5671_s26  ;;  %s4409_s26 = smov 112  }
 0x4a5   :  { %752 = vrot.lane.b32.xlu1 %v701_v15, %s4406_s23  ;;  %970 = vrot.lane.b32.xlu0 %v4719_v17, %s4402_s27 }
 0x4a9   :  { %755 = vrot.lane.b32.xlu1 %v701_v15, %s4407_s22  ;;  %976 = vrot.lane.b32.xlu0 %v4719_v17, %s4404_s29 }
 0x4ad   :  { %758 = vrot.lane.b32.xlu1 %v701_v15, %s4408_s25  ;;  %979 = vrot.lane.b32.xlu0 %v4719_v17, %s4406_s23 }
 0x4b1   :  { %761 = vrot.lane.b32.xlu1 %v701_v15, %s4409_s26  ;;  %982 = vrot.lane.b32.xlu0 %v4719_v17, %s4407_s22 }
 0x4b5   :  { %985 = vrot.lane.b32.xlu0 %v4719_v17, %s4408_s25 }
 0x4b9   :  { %988 = vrot.lane.b32.xlu0 %v4719_v17, %s4409_s26 }
 0x4f7   :  { %v741_v19 = vpop.permute.xlu0 %740  ;;  %v717_v20 = vpop.permute.xlu1 %716 }
 0x4f8   :  { %763 = vrot.lane.b32.xlu1 %v717_v20, %s4409_s26 }
 0x4fb   :  { %v729_v21 = vpop.permute.xlu0 %728  ;;  %v720_v22 = vpop.permute.xlu1 %719 }
 0x4fc   :  { %765 = vrot.lane.b32.xlu1 %v720_v22, %s4409_s26 }
 0x4ff   :  { %v732_v23 = vpop.permute.xlu0 %731  ;;  %v723_v24 = vpop.permute.xlu1 %722 }
 0x500   :  { %767 = vrot.lane.b32.xlu1 %v723_v24, %s4409_s26 }
 0x503   :  { %v735_v25 = vpop.permute.xlu0 %734  ;;  %v738_v26 = vpop.permute.xlu1 %737 }
 0x504   :  { %3565 = vmatprep.subr.bf16.mxu1 %v738_v26  ;;  %967 = vrot.lane.b32.xlu1 %v4719_v17, %s4394_s2 }
 0x505   :  { %3566 = vmatpush3.bf16.msra.mxu1 %v701_v15 }
 0x506   :  { %3567 = vmatprep.subr.bf16.mxu1 %v741_v19 }
 0x507   :  { %v744_v27 = vpop.permute.xlu1 %743  ;;  %v4758_v28 = vpop.permute.xlu0 %943 }
 0x508   :  { %973 = vrot.lane.b32.xlu1 %v4719_v17, %s4403_s28  ;;  %s4414_s28 = smov 96  }
 0x509   :  { %3568 = vmatpush3.bf16.msra.mxu1 %v717_v20 }
 0x50a   :  { %3569 = vmatprep.subr.bf16.mxu1 %v744_v27 }
 0x50b   :  { %v747_v29 = vpop.permute.xlu1 %746  ;;  %v4762_v30 = vpop.permute.xlu0 %946 }
 0x50c   :  { %952 = vrot.lane.b32.xlu1 %v4719_v17, %s4405_s30  ;;  %992 = vrot.lane.b32.xlu0 %v4762_v30, %s4409_s26 }
 0x50d   :  { %3570 = vmatpush3.bf16.msra.mxu1 %v720_v22 }
 0x50e   :  { %3571 = vmatprep.subr.bf16.mxu1 %v747_v29 }
 0x50f   :  { %v750_v32 = vpop.permute.xlu1 %749  ;;  %v950_v38 = vpop.permute.xlu0 %949 }
 0x510   :  { %955 = vrot.lane.b32.xlu1 %v4719_v17, %s4396_s0  ;;  %1153 = vperm.xlu0 %4082, %v1145_v31  }
 0x511   :  { %3572 = vmatpush3.bf16.msra.mxu1 %v723_v24 }
 0x512   :  { %3573 = vmatprep.subr.bf16.mxu1 %v750_v32 }
 0x513   :  { %v726_v34 = vpop.permute.xlu1 %725  ;;  %v965_v49 = vpop.permute.xlu0 %964 }
 0x514   :  { %958 = vrot.lane.b32.xlu1 %v4719_v17, %s4398_s24  ;;  %1163 = vperm.xlu0 %4082, %v1147_v33  }
 0x515   :  { %3574 = vmatpush3.bf16.msra.mxu1 %v726_v34 }
 0x517   :  { %v753_v36 = vpop.permute.xlu1 %752  ;;  %v971_v53 = vpop.permute.xlu0 %970 }
 0x518   :  { %3575 = vmatprep.subr.bf16.mxu1 %v753_v36  ;;  %961 = vrot.lane.b32.xlu1 %v4719_v17, %s4400_s4 }
 0x519   :  { %1173 = vperm.xlu0 %4082, %v1149_v35   ;;  %3576 = vmatpush3.bf16.msra.mxu1 %v729_v21 }
 0x51b   :  { %v756_v37 = vpop.permute.xlu1 %755  ;;  %v977_v56 = vpop.permute.xlu0 %976 }
 0x51c   :  { %3577 = vmatprep.subr.bf16.mxu1 %v756_v37  ;;  %990 = vrot.lane.b32.xlu1 %v4758_v28, %s4409_s26 }
 0x51d   :  { %3578 = vmatpush3.bf16.msra.mxu1 %v732_v23 }
 0x51f   :  { %v759_v39 = vpop.permute.xlu1 %758  ;;  %v980_v59 = vpop.permute.xlu0 %979 }
 0x520   :  { %3579 = vmatprep.subr.bf16.mxu1 %v759_v39  ;;  %994 = vrot.lane.b32.xlu1 %v950_v38, %s4409_s26 }
 0x521   :  { %3580 = vmatpush3.bf16.msra.mxu1 %v735_v25 }
 0x522   :  { %3831 = vmatprep.subr.bf16.mxu1 %v4410_v42 }
 0x523   :  { %v762_v43 = vpop.permute.xlu1 %761  ;;  %v983_v61 = vpop.permute.xlu0 %982 }
 0x524   :  { %861 = vmatmul.mubr.bf16.vlgmr.msra.gmra.mrb[8].mxu1 %v4789_v40  ;;  %1158 = vperm.xlu1 %4083, %v1146_v6  }
 0x525   :  { %3832 = vmatpush3.bf16.msra.mxu1 %v762_v43  ;;  %868 = vmatprep.mubr.bf16.mxu1 %v4794_v41 }
 0x526   :  { %3833 = vmatprep.subr.bf16.mxu1 %v4410_v42 }
 0x527   :  { %v986_v63 = vpop.permute.xlu0 %985 }
 0x528   :  { %1168 = vperm.xlu1 %4083, %v1148_v7  }
 0x52b   :  { %v989_v2 = vpop.permute.xlu0 %988 }
 0x52c   :  { %869 = vmatmul.mubr.bf16.gmra.mrb[12].mxu1 %v4803_v44  ;;  %1178 = vperm.xlu1 %4083, %v1150_v8  }
 0x52d   :  { %876 = vmatprep.mubr.bf16.mxu1 %v4808_v45 }
 0x534   :  { %877 = vmatmul.mubr.bf16.gmra.mrb[16].mxu1 %v4815_v46 }
 0x535   :  { %3839 = vmatprep.mubr.msk.bf16.mxu1 %vm4411_vm10, %v4410_v42 }
 0x56a   :  { %v764_v47 = vpop.permute.xlu1 %763 }
 0x56b   :  { %3834 = vmatpush3.bf16.msra.mxu1 %v764_v47 }
 0x56c   :  { %3835 = vmatprep.subr.bf16.mxu1 %v4410_v42 }
 0x56e   :  { %v766_v48 = vpop.permute.xlu1 %765 }
 0x56f   :  { %3836 = vmatpush3.bf16.msra.mxu1 %v766_v48 }
 0x570   :  { %3837 = vmatprep.subr.bf16.mxu1 %v4410_v42 }
 0x572   :  { %v768_v50 = vpop.permute.xlu1 %767 }
 0x573   :  { %3838 = vmatpush3.bf16.msra.mxu1 %v768_v50 }
 0x574   :  { %3606 = vmatprep.subr.bf16.mxu1 %v965_v49 }
 0x576   :  { %3840 = vmatmul.mubr.msk.bf16.vlgmr.msra.gmra.mrb[20].mxu1 %vm818_vm11, %v4293_v51  ;;  %v968_v52 = vpop.permute.xlu1 %967 }
 0x577   :  { %3607 = vmatpush3.bf16.msra.mxu1 %v4719_v17  ;;  %3843 = vmatprep.mubr.msk.bf16.mxu1 %vm4411_vm10, %v4410_v42 }
 0x578   :  { %3608 = vmatprep.subr.bf16.mxu1 %v968_v52 }
 0x57a   :  { %v974_v54 = vpop.permute.xlu1 %973 }
 0x57b   :  { %3609 = vmatpush3.bf16.msra.mxu1 %v4758_v28 }
 0x57c   :  { %3610 = vmatprep.subr.bf16.mxu1 %v971_v53 }
 0x57e   :  { %3844 = vmatmul.mubr.msk.bf16.gmra.mrb[24].mxu1 %vm818_vm11, %v4294_v55  ;;  %v953_v57 = vpop.permute.xlu1 %952  ;;  %v993_v4 = vpop.permute.xlu0 %992 }
 0x57f   :  { %3611 = vmatpush3.bf16.msra.mxu1 %v4762_v30  ;;  %3847 = vmatprep.mubr.msk.bf16.mxu1 %vm4411_vm10, %v4410_v42 }
 0x580   :  { %3612 = vmatprep.subr.bf16.mxu1 %v974_v54 }
 0x582   :  { %v956_v60 = vpop.permute.xlu1 %955 }
 0x583   :  { %3613 = vmatpush3.bf16.msra.mxu1 %v950_v38 }
 0x584   :  { %3614 = vmatprep.subr.bf16.mxu1 %v977_v56 }
 0x586   :  { %3848 = vmatmul.mubr.msk.bf16.gmra.mrb[28].mxu1 %vm818_vm11, %v4295_v58  ;;  %v959_v62 = vpop.permute.xlu1 %958 }
 0x587   :  { %3615 = vmatpush3.bf16.msra.mxu1 %v953_v57  ;;  %1032 = vmatprep.mubr.bf16.mxu1 %v4742_v18 }
 0x588   :  { %3616 = vmatprep.subr.bf16.mxu1 %v980_v59 }
 0x58a   :  { %v962_v0 = vpop.permute.xlu1 %961 }
 0x58b   :  { %3617 = vmatpush3.bf16.msra.mxu1 %v956_v60 }
 0x58c   :  { %3618 = vmatprep.subr.bf16.mxu1 %v983_v61 }
 0x58e   :  { %v991_v3 = vpop.permute.xlu1 %990 }
 0x58f   :  { %3619 = vmatpush3.bf16.msra.mxu1 %v959_v62 }
 0x590   :  { %3620 = vmatprep.subr.bf16.mxu1 %v986_v63 }
 0x592   :  { %v995_v5 = vpop.permute.xlu1 %994 }
 0x593   :  { %3621 = vmatpush3.bf16.msra.mxu1 %v962_v0 }
 0x594   :  { %3851 = vmatprep.subr.bf16.mxu1 %v4410_v42 }
 0x596   :  { %1033 = vmatmul.mubr.bf16.vlgmr.msra.gmra.mrb[32].mxu1 %v4789_v40 }
 0x597   :  { %3852 = vmatpush3.bf16.msra.mxu1 %v989_v2  ;;  %1040 = vmatprep.mubr.bf16.mxu1 %v4794_v41 }
 0x598   :  { %3853 = vmatprep.subr.bf16.mxu1 %v4410_v42 }
 0x59b   :  { %3854 = vmatpush3.bf16.msra.mxu1 %v991_v3 }
 0x59c   :  { %3855 = vmatprep.subr.bf16.mxu1 %v4410_v42 }
 0x59e   :  { %1041 = vmatmul.mubr.bf16.gmra.mrb[36].mxu1 %v4803_v44 }
 0x59f   :  { %3856 = vmatpush3.bf16.msra.mxu1 %v993_v4  ;;  %1048 = vmatprep.mubr.bf16.mxu1 %v4808_v45 }
 0x5a0   :  { %3857 = vmatprep.subr.bf16.mxu1 %v4410_v42 }
 0x5a3   :  { %3858 = vmatpush3.bf16.msra.mxu1 %v995_v5 }
 0x5a6   :  { %1049 = vmatmul.mubr.bf16.gmra.mrb[40].mxu1 %v4815_v46 }
 0x5a7   :  { %3859 = vmatprep.mubr.msk.bf16.mxu1 %vm4411_vm10, %v4410_v42 }
 0x5ae   :  { %3860 = vmatmul.mubr.msk.bf16.vlgmr.msra.gmra.mrb[44].mxu1 %vm818_vm11, %v4293_v51 }
 0x5af   :  { %3863 = vmatprep.mubr.msk.bf16.mxu1 %vm4411_vm10, %v4410_v42 }
 0x5b6   :  { %3864 = vmatmul.mubr.msk.bf16.gmra.mrb[48].mxu1 %vm818_vm11, %v4294_v55 }
 0x5b7   :  { %3867 = vmatprep.mubr.msk.bf16.mxu1 %vm4411_vm10, %v4410_v42 }
 0x5be   :  { %3868 = vmatmul.mubr.msk.bf16.gmra.mrb[52].mxu1 %vm818_vm11, %v4295_v58 }
 0x5bf   :  { %1998 = vmatprep.mubr.bf16.mxu1 %v4393_v1 }
 0x5f7   :  { %v3581_v9 = vpop.f32.mrb[8].mxu1 }
 0x5f8   :  { %v3582_v10 = vpop.f32.mrb[9].mxu1 }
 0x5f9   :  { %v3583_v11 = vadd.f32 %v3582_v10, %v3581_v9  ;;  %v3584_v12 = vpop.f32.mrb[10].mxu1 }
 0x5fa   :  { %v3585_v13 = vpop.f32.mrb[11].mxu1 }
 0x5fb   :  { %v3586_v14 = vadd.f32 %v3585_v13, %v3584_v12 }
 0x5ff   :  { %v3587_v15 = vpop.f32.mrb[12].mxu1 }
 0x600   :  { %v3588_v16 = vpop.f32.mrb[13].mxu1 }
 0x601   :  { %v3589_v17 = vadd.f32 %v3588_v16, %v3587_v15  ;;  %v3590_v18 = vpop.f32.mrb[14].mxu1 }
 0x602   :  { %v3591_v19 = vpop.f32.mrb[15].mxu1 }
 0x603   :  { %v3592_v20 = vadd.f32 %v3591_v19, %v3590_v18  ;;  %v1154_v19 = vpop.permute.xlu0 %1153 }
 0x607   :  { %v3593_v21 = vpop.f32.mrb[16].mxu1 }
 0x608   :  { %v3594_v22 = vpop.f32.mrb[17].mxu1 }
 0x609   :  { %v3595_v23 = vadd.f32 %v3594_v22, %v3593_v21  ;;  %v3596_v24 = vpop.f32.mrb[18].mxu1  ;;  %v1164_v21 = vpop.permute.xlu0 %1163 }
 0x60a   :  { %v3597_v25 = vpop.f32.mrb[19].mxu1 }
 0x60b   :  { %v3598_v26 = vadd.f32 %v3597_v25, %v3596_v24 }
 0x649   :  { %v919_v27 = vpop.f32.mrb[20].mxu1 }
 0x64a   :  { %v4870_v28 = vadd.f32 %v3583_v11, %v919_v27  ;;  %v3841_v29 = vpop.f32.mrb[21].mxu1 }
 0x64b   :  { %v922_v30 = vpop.f32.mrb[22].mxu1 }
 0x64c   :  { %v4872_v31 = vadd.f32 %v3586_v14, %v922_v30  ;;  %v3842_v32 = vpop.f32.mrb[23].mxu1 }
 0x651   :  { %v927_v33 = vpop.f32.mrb[24].mxu1 }
 0x652   :  { %v4874_v34 = vadd.f32 %v3589_v17, %v927_v33  ;;  %v3845_v35 = vpop.f32.mrb[25].mxu1 }
 0x653   :  { %v930_v36 = vpop.f32.mrb[26].mxu1 }
 0x654   :  { %v4876_v37 = vadd.f32 %v3592_v20, %v930_v36  ;;  %v3846_v38 = vpop.f32.mrb[27].mxu1  ;;  %v1159_v20 = vpop.permute.xlu1 %1158 }
 0x658   :  { %v1169_v22 = vpop.permute.xlu1 %1168 }
 0x659   :  { %v935_v39 = vpop.f32.mrb[28].mxu1 }
 0x65a   :  { %v4878_v40 = vadd.f32 %v3595_v23, %v935_v39  ;;  %v3849_v41 = vpop.f32.mrb[29].mxu1  ;;  %v1174_v23 = vpop.permute.xlu0 %1173 }
 0x65b   :  { %v938_v43 = vpop.f32.mrb[30].mxu1 }
 0x65c   :  { %v4880_v44 = vadd.f32 %v3598_v26, %v938_v43  ;;  %v3850_v45 = vpop.f32.mrb[31].mxu1  ;;  %v1179_v24 = vpop.permute.xlu1 %1178 }
 0x669   :  { %v3622_v46 = vpop.f32.mrb[32].mxu1 }
 0x66a   :  { %v3623_v47 = vpop.f32.mrb[33].mxu1 }
 0x66b   :  { %v3624_v48 = vadd.f32 %v3623_v47, %v3622_v46  ;;  %v3625_v49 = vpop.f32.mrb[34].mxu1 }
 0x66c   :  { %v3626_v50 = vpop.f32.mrb[35].mxu1 }
 0x66d   :  { %v3627_v51 = vadd.f32 %v3626_v50, %v3625_v49 }
 0x671   :  { %v3628_v52 = vpop.f32.mrb[36].mxu1 }
 0x672   :  { %v3629_v53 = vpop.f32.mrb[37].mxu1 }
 0x673   :  { %v3630_v54 = vadd.f32 %v3629_v53, %v3628_v52  ;;  %v3631_v55 = vpop.f32.mrb[38].mxu1 }
 0x674   :  { %v3632_v56 = vpop.f32.mrb[39].mxu1 }
 0x675   :  { %v3633_v57 = vadd.f32 %v3632_v56, %v3631_v55 }
 0x679   :  { %v3634_v58 = vpop.f32.mrb[40].mxu1 }
 0x67a   :  { %v3635_v59 = vpop.f32.mrb[41].mxu1 }
 0x67b   :  { %v3636_v60 = vadd.f32 %v3635_v59, %v3634_v58  ;;  %v3637_v61 = vpop.f32.mrb[42].mxu1 }
 0x67c   :  { %v3638_v62 = vpop.f32.mrb[43].mxu1 }
 0x67d   :  { %v3639_v63 = vadd.f32 %v3638_v62, %v3637_v61 }
 0x681   :  { %v1091_v0 = vpop.f32.mrb[44].mxu1 }
 0x682   :  { %v1092_v2 = vadd.f32 %v3624_v48, %v1091_v0  ;;  %v3861_v3 = vpop.f32.mrb[45].mxu1 }
 0x683   :  { %v1094_v4 = vpop.f32.mrb[46].mxu1 }
 0x684   :  { %v1095_v5 = vadd.f32 %v3627_v51, %v1094_v4  ;;  %1120 = vrot.lane.b32.xlu0 %v1092_v2, %s4412_s6  ;;  %v3862_v6 = vpop.f32.mrb[47].mxu1 }
 0x686   :  { %1122 = vrot.lane.b32.xlu1 %v1095_v5, %s4412_s6 }
 0x689   :  { %v1099_v7 = vpop.f32.mrb[48].mxu1 }
 0x68a   :  { %v1100_v8 = vadd.f32 %v3630_v54, %v1099_v7  ;;  %v3865_v9 = vpop.f32.mrb[49].mxu1 }
 0x68b   :  { %v1102_v10 = vpop.f32.mrb[50].mxu1 }
 0x68c   :  { %v1103_v11 = vadd.f32 %v3633_v57, %v1102_v10  ;;  %1124 = vrot.lane.b32.xlu0 %v1100_v8, %s4412_s6  ;;  %v3866_v12 = vpop.f32.mrb[51].mxu1 }
 0x68e   :  { %1126 = vrot.lane.b32.xlu1 %v1103_v11, %s4412_s6 }
 0x691   :  { %v1107_v13 = vpop.f32.mrb[52].mxu1 }
 0x692   :  { %v1108_v14 = vadd.f32 %v3636_v60, %v1107_v13  ;;  %v3869_v15 = vpop.f32.mrb[53].mxu1 }
 0x693   :  { %v1110_v16 = vpop.f32.mrb[54].mxu1 }
 0x694   :  { %v1111_v17 = vadd.f32 %v3639_v63, %v1110_v16  ;;  %1128 = vrot.lane.b32.xlu0 %v1108_v14, %s4412_s6  ;;  %v3870_v18 = vpop.f32.mrb[55].mxu1 }
 0x696   :  { %1130 = vrot.lane.b32.xlu1 %v1111_v17, %s4412_s6 }
 0x6f6   :  { %v1121_v25 = vpop.permute.xlu0 %1120 }
 0x6f7   :  { %v1139_v26 = vsel %vm1138_vm12, %v4870_v28, %v1121_v25  ;;  %v1182_v27 = vadd.f32 %v1154_v19, %v1121_v25 }
 0x6f8   :  { %v1181_v29 = vadd.f32 %v1154_v19, %v1139_v26  ;;  %v1123_v30 = vpop.permute.xlu1 %1122 }
 0x6f9   :  { %v1206_v32 = vmin.f32 %v1182_v27, 0.0  ;;  %v1140_v33 = vsel %vm1138_vm12, %v4872_v31, %v1123_v30  ;;  %v4886_v35 = vadd.f32 %v1159_v20, %v1123_v30  ;;  %vm1194_vm13 = vcmp.gt.f32.partialorder %v1182_v27, 0.0 }
 0x6fa   :  { %v1205_v36 = vmin.f32 %v1181_v29, 0.0  ;;  %v4888_v38 = vadd.f32 %v1159_v20, %v1140_v33  ;;  %vm1193_vm14 = vcmp.gt.f32.partialorder %v1181_v29, 0.0 }
 0x6fb   :  { %v1219_v39 = vmul.f32 1.442695, %v1206_v32  ;;  %v1208_v41 = vmin.f32 %v4886_v35, 0.0  ;;  %vm1196_vm15 = vcmp.gt.f32.partialorder %v4886_v35, 0.0 }
 0x6fc   :  { %v1217_v43 = vmul.f32 1.442695, %v1205_v36  ;;  %v1207_v45 = vmin.f32 %v4888_v38, 0.0  ;;  %vm1195_vm2 = vcmp.gt.f32.partialorder %v4888_v38, 0.0 }
 0x6fd   :  { %4341 = vpow2.f32 %v1219_v39  ;;  %v1223_v28 = vmul.f32 1.442695, %v1208_v41 }
 0x6fe   :  { %v1221_v46 = vmul.f32 1.442695, %v1207_v45  ;;  %v1125_v47 = vpop.permute.xlu0 %1124  ;;  %4343 = vpow2.f32 %v1217_v43 }
 0x6ff   :  { %4345 = vpow2.f32 %v1223_v28  ;;  %v1141_v31 = vsel %vm1138_vm12, %v4874_v34, %v1125_v47  ;;  %v4894_v48 = vadd.f32 %v1164_v21, %v1125_v47 }
 0x700   :  { %v4896_v49 = vadd.f32 %v1164_v21, %v1141_v31  ;;  %v1127_v50 = vpop.permute.xlu1 %1126  ;;  %4347 = vpow2.f32 %v1221_v46 }
 0x701   :  { %v1210_v51 = vmin.f32 %v4894_v48, 0.0  ;;  %v1142_v52 = vsel %vm1138_vm12, %v4876_v37, %v1127_v50  ;;  %v4901_v53 = vadd.f32 %v1169_v22, %v1127_v50  ;;  %vm1198_vm4 = vcmp.gt.f32.partialorder %v4894_v48, 0.0 }
 0x702   :  { %v1209_v54 = vmin.f32 %v4896_v49, 0.0  ;;  %v4904_v55 = vadd.f32 %v1169_v22, %v1142_v52  ;;  %vm1197_vm5 = vcmp.gt.f32.partialorder %v4896_v49, 0.0 }
 0x703   :  { %v1227_v56 = vmul.f32 1.442695, %v1210_v51  ;;  %v1212_v34 = vmin.f32 %v4901_v53, 0.0  ;;  %vm1200_vm6 = vcmp.gt.f32.partialorder %v4901_v53, 0.0 }
 0x704   :  { %v1225_v57 = vmul.f32 1.442695, %v1209_v54  ;;  %v1211_v58 = vmin.f32 %v4904_v55, 0.0  ;;  %vm1199_vm7 = vcmp.gt.f32.partialorder %v4904_v55, 0.0 }
 0x705   :  { %4349 = vpow2.f32 %v1227_v56  ;;  %v1231_v59 = vmul.f32 1.442695, %v1212_v34 }
 0x706   :  { %v1229_v60 = vmul.f32 1.442695, %v1211_v58  ;;  %v1129_v61 = vpop.permute.xlu0 %1128  ;;  %4351 = vpow2.f32 %v1225_v57 }
 0x707   :  { %v4342_v62 = vpop.eup %4341  ;;  %4353 = vpow2.f32 %v1231_v59  ;;  %v1143_v37 = vsel %vm1138_vm12, %v4878_v40, %v1129_v61  ;;  %v4910_v63 = vadd.f32 %v1174_v23, %v1129_v61 }
 0x708   :  { %v4344_v0 = vpop.eup %4343  ;;  %v4912_v2 = vadd.f32 %v1174_v23, %v1143_v37  ;;  %v1131_v3 = vpop.permute.xlu1 %1130  ;;  %v3489_v4 = vadd.f32 -1.0, %v4342_v62  ;;  %4355 = vpow2.f32 %v1229_v60  ;;  %v1265_v37 = vld [vmem:[%s5652_s7] sm:$0xff] }
 0x709   :  { %v4346_v5 = vpop.eup %4345  ;;  %v1214_v6 = vmin.f32 %v4910_v63, 0.0  ;;  %v1144_v7 = vsel %vm1138_vm12, %v4880_v44, %v1131_v3  ;;  %v4918_v8 = vadd.f32 %v1179_v24, %v1131_v3  ;;  %v3488_v40 = vadd.f32 -1.0, %v4344_v0 }
 0x70a   :  { %v4348_v9 = vpop.eup %4347  ;;  %v1213_v10 = vmin.f32 %v4912_v2, 0.0  ;;  %v4921_v11 = vadd.f32 %v1179_v24, %v1144_v7  ;;  %v4924_v12 = vsel %vm1194_vm13, %v1182_v27, %v3489_v4  ;;  %v3491_v13 = vadd.f32 -1.0, %v4346_v5 }
 0x70b   :  { %v1235_v14 = vmul.f32 1.442695, %v1214_v6  ;;  %v1216_v15 = vmin.f32 %v4918_v8, 0.0  ;;  %v4928_v16 = vsel %vm1193_vm14, %v1181_v29, %v3488_v40  ;;  %v1271_v44 = vsel %vm430_vm1, %v4924_v12, 0.0 }
 0x70c   :  { %v1233_v17 = vmul.f32 1.442695, %v1213_v10  ;;  %v1215_v18 = vmin.f32 %v4921_v11, 0.0  ;;  %v1272_v19 = vadd.f32 %v1271_v44, %v4928_v16  ;;  %v3490_v20 = vadd.f32 -1.0, %v4348_v9  ;;  %v5002_v44 = vld [vmem:[%s5652_s7 + $0x10] sm:$0xff] }
 0x70d   :  { %4357 = vpow2.f32 %v1235_v14  ;;  %v1239_v21 = vmul.f32 1.442695, %v1216_v15  ;;  %v4938_v22 = vsel %vm1196_vm15, %v4886_v35, %v3491_v13  ;;  %vm1202_vm9 = vcmp.gt.f32.partialorder %v4910_v63, 0.0  ;;  %v4997_v15 = vld [vmem:[%s5652_s7 + $0x8] sm:$0xff] }
 0x70e   :  { %v1237_v23 = vmul.f32 1.442695, %v1215_v18  ;;  %1273 = vadd.xlane.f32.xlu0 %v1272_v19  ;;  %v4941_v24 = vsel %vm1195_vm2, %v4888_v38, %v3490_v20  ;;  %v1275_v25 = vsel %vm430_vm1, %v4938_v22, 0.0  ;;  %vm1204_vm11 = vcmp.gt.f32.partialorder %v4918_v8, 0.0  ;;  %v5016_v18 = vld [vmem:[%s5652_s7 + $0x20] sm:$0xff]  ;;  %v5025_v19 = vld [vmem:[%s5652_s7 + $0x28] sm:$0xff] }
 0x70f   :  { %v4350_v26 = vpop.eup %4349  ;;  %4359 = vpow2.f32 %v1239_v21  ;;  %v1276_v27 = vadd.f32 %v1275_v25, %v4941_v24  ;;  %vm1201_vm12 = vcmp.gt.f32.partialorder %v4912_v2, 0.0  ;;  %vm1203_vm13 = vcmp.gt.f32.partialorder %v4921_v11, 0.0 }
 0x710   :  { %v4352_v29 = vpop.eup %4351  ;;  %v3493_v30 = vadd.f32 -1.0, %v4350_v26  ;;  %4361 = vpow2.f32 %v1233_v17  ;;  %vm1301_vm14 = vcmask 392192   ;;  %v5011_v17 = vld [vmem:[%s5652_s7 + $0x18] sm:$0xff]  ;;  %vm1654_vm15 = vcmask 1046528   ;;  %s5681_s7 = smov 125  }
 0x711   :  { %v4354_v32 = vpop.eup %4353  ;;  %1277 = vadd.xlane.f32.xlu1 %v1276_v27  ;;  %v3492_v33 = vadd.f32 -1.0, %v4352_v29  ;;  %4363 = vpow2.f32 %v1237_v23  ;;  %3883 = vmatprep.mubr.msk.f32.mxu0 %vm1301_vm14, %v1265_v37  ;;  %vm1737_vm2 = vcmask 1039360  }
 0x712   :  { %v4356_v35 = vpop.eup %4355  ;;  %v4949_v36 = vsel %vm1198_vm4, %v4894_v48, %v3493_v30  ;;  %v3495_v38 = vadd.f32 -1.0, %v4354_v32  ;;  %vm1792_vm4 = vcmask 1031168  }
 0x713   :  { %v4952_v39 = vsel %vm1197_vm5, %v4896_v49, %v3492_v33  ;;  %v1279_v41 = vsel %vm430_vm1, %v4949_v36, 0.0  ;;  %v3494_v43 = vadd.f32 -1.0, %v4356_v35  ;;  %vm1847_vm5 = vcmask 1022976  }
 0x714   :  { %v1280_v45 = vadd.f32 %v1279_v41, %v4952_v39  ;;  %v4960_v28 = vsel %vm1200_vm6, %v4901_v53, %v3495_v38  ;;  %vm1902_vm6 = vcmask 1014784  }
 0x715   :  { %v4963_v46 = vsel %vm1199_vm7, %v4904_v55, %v3494_v43  ;;  %v1283_v47 = vsel %vm430_vm1, %v4960_v28, 0.0  ;;  %vm1957_vm7 = vcmask 1047552  }
 0x716   :  { %1281 = vadd.xlane.f32.xlu0 %v1280_v45  ;;  %v1284_v48 = vadd.f32 %v1283_v47, %v4963_v46 }
 0x717   :  { %v4358_v31 = vpop.eup %4357 }
 0x718   :  { %v3497_v49 = vadd.f32 -1.0, %v4358_v31 }
 0x719   :  { %v4360_v50 = vpop.eup %4359 }
 0x71a   :  { %v4362_v51 = vpop.eup %4361  ;;  %1285 = vadd.xlane.f32.xlu0 %v1284_v48  ;;  %v4970_v52 = vsel %vm1202_vm9, %v4910_v63, %v3497_v49  ;;  %v3499_v53 = vadd.f32 -1.0, %v4360_v50  ;;  %vm1950_vm9 = vcmask 384000  }
 0x71b   :  { %v4364_v54 = vpop.eup %4363  ;;  %v3496_v55 = vadd.f32 -1.0, %v4362_v51  ;;  %v1287_v56 = vsel %vm430_vm1, %v4970_v52, 0.0 }
 0x71c   :  { %v3498_v34 = vadd.f32 -1.0, %v4364_v54  ;;  %v4977_v57 = vsel %vm1204_vm11, %v4918_v8, %v3499_v53  ;;  %vm2100_vm11 = vcmask 228352  }
 0x71d   :  { %v4980_v58 = vsel %vm1201_vm12, %v4912_v2, %v3496_v55  ;;  %v1291_v59 = vsel %vm430_vm1, %v4977_v57, 0.0 }
 0x71e   :  { %v1288_v60 = vadd.f32 %v1287_v56, %v4980_v58  ;;  %v4987_v61 = vsel %vm1203_vm13, %v4921_v11, %v3498_v34 }
 0x71f   :  { %v1292_v62 = vadd.f32 %v1291_v59, %v4987_v61 }
 0x720   :  { %1289 = vadd.xlane.f32.xlu1 %v1288_v60 }
 0x721   :  { %1293 = vadd.xlane.f32.xlu0 %v1292_v62 }
 0x79b   :  { %v1274_v63 = vpop.xlane.xlu0 %1273 }
 0x79c   :  { %v1295_v2 = vmul.f32 0.00625, %v1274_v63 }
 0x79e   :  { %v1278_v0 = vpop.xlane.xlu1 %1277 }
 0x79f   :  { %v1296_v3 = vmul.f32 0.00625, %v1278_v0 }
 0x7a1   :  { %v4019_v4 = vpack.c.bf16 %v1296_v3, %v1295_v2 }
 0x7a3   :  { %4020 = vmatprep.subr.bf16.mxu0 %v4019_v4  ;;  %v1282_v5 = vpop.xlane.xlu0 %1281 }
 0x7a4   :  { %4022 = vmatpush3.bf16.msra.mxu0 %v4019_v4  ;;  %v1297_v7 = vmul.f32 0.00625, %v1282_v5 }
 0x7a7   :  { %v1286_v6 = vpop.xlane.xlu0 %1285 }
 0x7a8   :  { %v1298_v8 = vmul.f32 0.00625, %v1286_v6 }
 0x7aa   :  { %v4023_v40 = vpack.c.bf16 %v1298_v8, %v1297_v7 }
 0x7ac   :  { %4024 = vmatprep.subr.bf16.mxu0 %v4023_v40 }
 0x7ad   :  { %v1290_v9 = vpop.xlane.xlu1 %1289  ;;  %4026 = vmatpush3.bf16.msra.mxu0 %v4023_v40 }
 0x7ae   :  { %v1294_v10 = vpop.xlane.xlu0 %1293  ;;  %v1299_v11 = vmul.f32 0.00625, %v1290_v9 }
 0x7af   :  { %v1300_v13 = vmul.f32 0.00625, %v1294_v10 }
 0x7b1   :  { %v4027_v14 = vpack.c.bf16 %v1300_v13, %v1299_v11 }
 0x7b3   :  { %4028 = vmatprep.subr.bf16.mxu0 %v4027_v14 }
 0x7b4   :  { %4030 = vmatpush3.bf16.msra.mxu0 %v4027_v14 }
 0x7b7   :  { %3884 = vmatmul.mubr.msk.f32.vlgmr.msra.gmra.mrb[4].mxu0 %vm1301_vm14, %v4997_v15 }
 0x7b8   :  { %3886 = vmatprep.mubr.msk.f32.mxu0 %vm1301_vm14, %v5002_v44 }
 0x7bb   :  { %3887 = vmatmul.mubr.msk.f32.gmra.mrb[6].mxu0 %vm1301_vm14, %v5011_v17 }
 0x7bc   :  { %3889 = vmatprep.mubr.msk.f32.mxu0 %vm1301_vm14, %v5016_v18 }
 0x7bf   :  { %3890 = vmatmul.mubr.msk.f32.gmra.mrb[8].mxu0 %vm1301_vm14, %v5025_v19 }
 0x7c0   :  { %3904 = vmatprep.mubr.msk.f32.mxu0 %vm1301_vm14, %v1265_v37 }
 0x88a   :  { %v3885_v20 = vpop.f32.mrb[4].mxu0 }
 0x88b   :  { %1422 = vperm.xlu0 %4082, %v3885_v20   ;;  %v1386_v21 = vpop.f32.mrb[5].mxu0 }
 0x88c   :  { %1417 = vperm.xlu1 %4083, %v1386_v21  }
 0x88e   :  { %v3888_v23 = vpop.f32.mrb[6].mxu0 }
 0x88f   :  { %v1396_v25 = vpop.f32.mrb[7].mxu0 }
 0x890   :  { %1432 = vperm.xlu1 %4083, %v3888_v23  }
 0x892   :  { %v3891_v26 = vpop.f32.mrb[8].mxu0 }
 0x893   :  { %v1406_v27 = vpop.f32.mrb[9].mxu0 }
 0x894   :  { %1427 = vperm.xlu1 %4083, %v1396_v25   ;;  %1437 = vperm.xlu0 %4082, %v1406_v27  }
 0x898   :  { %1442 = vperm.xlu1 %4083, %v3891_v26  }
 0x90a   :  { %v1423_v29 = vpop.permute.xlu0 %1422 }
 0x90b   :  { %v5031_v30 = vsub.f32 %v4941_v24, %v1423_v29  ;;  %v5034_v32 = vsub.f32 %v4938_v22, %v1423_v29  ;;  %v1418_v33 = vpop.permute.xlu1 %1417 }
 0x90c   :  { %v5037_v35 = vsub.f32 %v4928_v16, %v1418_v33  ;;  %v5040_v38 = vsub.f32 %v4924_v12, %v1418_v33 }
 0x90d   :  { %v1459_v41 = vmul.f32 %v5031_v30, %v5031_v30  ;;  %v1460_v43 = vmul.f32 %v5034_v32, %v5034_v32 }
 0x90e   :  { %v1457_v24 = vmul.f32 %v5037_v35, %v5037_v35  ;;  %v1458_v22 = vmul.f32 %v5040_v38, %v5040_v38 }
 0x90f   :  { %v1433_v45 = vpop.permute.xlu1 %1432  ;;  %v1473_v47 = vsel %vm430_vm1, %v1460_v43, 0.0 }
 0x910   :  { %v5052_v16 = vsub.f32 %v4963_v46, %v1433_v45  ;;  %v5055_v12 = vsub.f32 %v4960_v28, %v1433_v45  ;;  %v1474_v31 = vadd.f32 %v1473_v47, %v1459_v41  ;;  %v1469_v48 = vsel %vm430_vm1, %v1458_v22, 0.0 }
 0x911   :  { %v1470_v49 = vadd.f32 %v1469_v48, %v1457_v24 }
 0x912   :  { %1475 = vadd.xlane.f32.xlu1 %v1474_v31  ;;  %v1463_v50 = vmul.f32 %v5052_v16, %v5052_v16  ;;  %v1464_v51 = vmul.f32 %v5055_v12, %v5055_v12 }
 0x913   :  { %v1428_v53 = vpop.permute.xlu1 %1427  ;;  %1471 = vadd.xlane.f32.xlu0 %v1470_v49  ;;  %v1438_v54 = vpop.permute.xlu0 %1437 }
 0x914   :  { %v5063_v46 = vsub.f32 %v4952_v39, %v1428_v53  ;;  %v5066_v28 = vsub.f32 %v4949_v36, %v1428_v53  ;;  %v5069_v55 = vsub.f32 %v4980_v58, %v1438_v54  ;;  %v5072_v56 = vsub.f32 %v4970_v52, %v1438_v54 }
 0x915   :  { %v1481_v34 = vsel %vm430_vm1, %v1464_v51, 0.0 }
 0x916   :  { %v1482_v59 = vadd.f32 %v1481_v34, %v1463_v50  ;;  %v1461_v60 = vmul.f32 %v5063_v46, %v5063_v46  ;;  %v1462_v62 = vmul.f32 %v5066_v28, %v5066_v28  ;;  %v1465_v39 = vmul.f32 %v5069_v55, %v5069_v55 }
 0x917   :  { %v1443_v36 = vpop.permute.xlu1 %1442  ;;  %v1466_v58 = vmul.f32 %v5072_v56, %v5072_v56 }
 0x918   :  { %v5084_v37 = vsub.f32 %v4987_v61, %v1443_v36  ;;  %v5087_v52 = vsub.f32 %v4977_v57, %v1443_v36  ;;  %1483 = vadd.xlane.f32.xlu0 %v1482_v59  ;;  %v1477_v63 = vsel %vm430_vm1, %v1462_v62, 0.0 }
 0x919   :  { %v1478_v0 = vadd.f32 %v1477_v63, %v1461_v60  ;;  %v1485_v2 = vsel %vm430_vm1, %v1466_v58, 0.0 }
 0x91a   :  { %v1486_v3 = vadd.f32 %v1485_v2, %v1465_v39  ;;  %v1467_v4 = vmul.f32 %v5084_v37, %v5084_v37  ;;  %v1468_v5 = vmul.f32 %v5087_v52, %v5087_v52 }
 0x91c   :  { %1479 = vadd.xlane.f32.xlu0 %v1478_v0  ;;  %1487 = vadd.xlane.f32.xlu1 %v1486_v3  ;;  %v1489_v61 = vsel %vm430_vm1, %v1468_v5, 0.0 }
 0x91d   :  { %v1490_v6 = vadd.f32 %v1489_v61, %v1467_v4 }
 0x920   :  { %1491 = vadd.xlane.f32.xlu0 %v1490_v6 }
 0x99f   :  { %v1476_v57 = vpop.xlane.xlu1 %1475 }
 0x9a0   :  { %v1494_v7 = vmul.f32 0.00625, %v1476_v57  ;;  %v1472_v8 = vpop.xlane.xlu0 %1471 }
 0x9a1   :  { %v1493_v40 = vmul.f32 0.00625, %v1472_v8 }
 0x9a3   :  { %v4031_v9 = vpack.c.bf16 %v1494_v7, %v1493_v40 }
 0x9a5   :  { %v1484_v10 = vpop.xlane.xlu0 %1483  ;;  %4032 = vmatprep.subr.bf16.mxu0 %v4031_v9 }
 0x9a6   :  { %4034 = vmatpush3.bf16.msra.mxu0 %v4031_v9  ;;  %v1496_v13 = vmul.f32 0.00625, %v1484_v10 }
 0x9a9   :  { %v1480_v11 = vpop.xlane.xlu0 %1479  ;;  %v1488_v20 = vpop.xlane.xlu1 %1487 }
 0x9aa   :  { %v1495_v14 = vmul.f32 0.00625, %v1480_v11  ;;  %v1497_v25 = vmul.f32 0.00625, %v1488_v20 }
 0x9ac   :  { %v4035_v21 = vpack.c.bf16 %v1496_v13, %v1495_v14 }
 0x9ad   :  { %v1492_v23 = vpop.xlane.xlu0 %1491 }
 0x9ae   :  { %v1498_v26 = vmul.f32 0.00625, %v1492_v23  ;;  %4036 = vmatprep.subr.bf16.mxu0 %v4035_v21 }
 0x9af   :  { %4038 = vmatpush3.bf16.msra.mxu0 %v4035_v21 }
 0x9b0   :  { %v4039_v27 = vpack.c.bf16 %v1498_v26, %v1497_v25 }
 0x9b2   :  { %4040 = vmatprep.subr.bf16.mxu0 %v4039_v27 }
 0x9b3   :  { %4042 = vmatpush3.bf16.msra.mxu0 %v4039_v27 }
 0x9b4   :  { %2110 = vmatprep.subr.bf16.mxu0 %v4393_v1 }
 0x9b6   :  { %3905 = vmatmul.mubr.msk.f32.vlgmr.msra.gmra.mrb[10].mxu0 %vm1301_vm14, %v4997_v15 }
 0x9b7   :  { %3907 = vmatprep.mubr.msk.f32.mxu0 %vm1301_vm14, %v5002_v44 }
 0x9ba   :  { %3908 = vmatmul.mubr.msk.f32.gmra.mrb[12].mxu0 %vm1301_vm14, %v5011_v17 }
 0x9bb   :  { %3910 = vmatprep.mubr.msk.f32.mxu0 %vm1301_vm14, %v5016_v18 }
 0x9be   :  { %3911 = vmatmul.mubr.msk.f32.gmra.mrb[14].mxu0 %vm1301_vm14, %v5025_v19 }
 0xa89   :  { %v3906_v29 = vpop.f32.mrb[10].mxu0 }
 0xa8a   :  { %4365 = vrsqrt.f32 %v3906_v29  ;;  %v1565_v33 = vpop.f32.mrb[11].mxu0 }
 0xa8b   :  { %4367 = vrsqrt.f32 %v1565_v33 }
 0xa8d   :  { %v3909_v41 = vpop.f32.mrb[12].mxu0 }
 0xa8e   :  { %v1575_v43 = vpop.f32.mrb[13].mxu0 }
 0xa8f   :  { %4369 = vrsqrt.f32 %v1575_v43 }
 0xa90   :  { %4371 = vrsqrt.f32 %v3909_v41 }
 0xa91   :  { %v3912_v15 = vpop.f32.mrb[14].mxu0 }
 0xa92   :  { %v1585_v24 = vpop.f32.mrb[15].mxu0 }
 0xa93   :  { %4373 = vrsqrt.f32 %v1585_v24 }
 0xa94   :  { %v4366_v44 = vpop.eup %4365  ;;  %4375 = vrsqrt.f32 %v3912_v15 }
 0xa95   :  { %v4368_v22 = vpop.eup %4367  ;;  %1607 = vperm.xlu0 %4082, %v4366_v44  }
 0xa96   :  { %1602 = vperm.xlu1 %4083, %v4368_v22  }
 0xa99   :  { %v4370_v17 = vpop.eup %4369 }
 0xa9a   :  { %1612 = vperm.xlu1 %4083, %v4370_v17   ;;  %v4372_v18 = vpop.eup %4371  ;;  %v4298_v17 = vld [vmem:[%s5654_s9] sm:$0xff]  }
 0xa9b   :  { %2111 = vmatpush1.bf16.msra.mxu0 %v4298_v17 }
 0xa9c   :  { %2112 = vmatprep.subr.bf16.mxu0 %v4393_v1 }
 0xa9d   :  { %v4374_v19 = vpop.eup %4373 }
 0xa9e   :  { %1617 = vperm.xlu1 %4083, %v4372_v18   ;;  %1622 = vperm.xlu0 %4082, %v4374_v19   ;;  %v4376_v45 = vpop.eup %4375  ;;  %v4299_v18 = vld [vmem:[%s5654_s9 + $0x8] sm:$0xff]   ;;  %v4300_v19 = vld [vmem:[%s5654_s9 + $0x10] sm:$0xff]  }
 0xa9f   :  { %2113 = vmatpush1.bf16.msra.mxu0 %v4299_v18 }
 0xaa0   :  { %2114 = vmatprep.subr.bf16.mxu0 %v4393_v1 }
 0xaa2   :  { %1627 = vperm.xlu1 %4083, %v4376_v45   ;;  %v4301_v45 = vld [vmem:[%s5654_s9 + $0x18] sm:$0xff]  }
 0xaa3   :  { %2115 = vmatpush1.bf16.msra.mxu0 %v4300_v19 }
 0xaa4   :  { %2116 = vmatprep.subr.bf16.mxu0 %v4393_v1 }
 0xaa7   :  { %2117 = vmatpush1.bf16.msra.mxu0 %v4301_v45 }
 0xaa8   :  { %2118 = vmatprep.subr.bf16.mxu0 %v4393_v1 }
 0xb14   :  { %v1608_v47 = vpop.permute.xlu0 %1607 }
 0xb15   :  { %v1632_v31 = vmul.f32 %v1608_v47, %v5031_v30  ;;  %v1633_v48 = vmul.f32 %v1608_v47, %v5034_v32  ;;  %v1603_v49 = vpop.permute.xlu1 %1602  ;;  %v4302_v47 = vld [vmem:[%s5654_s9 + $0x20] sm:$0xff]  }
 0xb16   :  { %v1630_v50 = vmul.f32 %v1603_v49, %v5037_v35  ;;  %v1631_v51 = vmul.f32 %v1603_v49, %v5040_v38  ;;  %2119 = vmatpush1.bf16.msra.mxu0 %v4302_v47  ;;  %v4305_v49 = vld [vmem:[%s5654_s9 + $0x38] sm:$0xff]  }
 0xb17   :  { %v1656_v53 = vrot.slane %v1632_v31, 1  ;;  %v1659_v54 = vrot.slane %v1633_v48, 1  ;;  %2120 = vmatprep.subr.bf16.mxu0 %v4393_v1 }
 0xb18   :  { %v1655_v34 = vrot.slane %v1630_v50, 1  ;;  %v1658_v59 = vrot.slane %v1631_v51, 1 }
 0xb19   :  { %v1613_v60 = vpop.permute.xlu1 %1612 }
 0xb1a   :  { %v1657_v62 = vsel %vm1654_vm15, %v1655_v34, %v1656_v53  ;;  %v1660_v39 = vsel %vm1654_vm15, %v1658_v59, %v1659_v54  ;;  %v1634_v36 = vmul.f32 %v1613_v60, %v5063_v46  ;;  %v1635_v30 = vmul.f32 %v1613_v60, %v5066_v28 }
 0xb1b   :  { %v5115_v32 = vmax.f32 %v1630_v50, %v1657_v62  ;;  %v5117_v58 = vmax.f32 %v1631_v51, %v1660_v39 }
 0xb1c   :  { %v1661_v35 = vrot.slane %v1634_v36, 1  ;;  %v1663_v38 = vrot.slane %v1635_v30, 1 }
 0xb1d   :  { %v1618_v63 = vpop.permute.xlu1 %1617  ;;  %v4084_v0 = vpack.i.bf16 %v5117_v58, %v5115_v32  ;;  %v1623_v14 = vpop.permute.xlu0 %1622 }
 0xb1e   :  { %v1662_v2 = vsel %vm1654_vm15, %v1656_v53, %v1661_v35  ;;  %v1664_v3 = vsel %vm1654_vm15, %v1659_v54, %v1663_v38  ;;  %v1636_v46 = vmul.f32 %v1618_v63, %v5052_v16  ;;  %v1637_v28 = vmul.f32 %v1618_v63, %v5055_v12 }
 0xb1f   :  { %v5123_v4 = vmax.f32 %v1632_v31, %v1662_v2  ;;  %v5125_v5 = vmax.f32 %v1633_v48, %v1664_v3  ;;  %4085 = vrot.lane.b32.xlu0 %v4084_v0, %s4395_s20  ;;  %v1638_v20 = vmul.f32 %v1623_v14, %v5069_v55  ;;  %v1639_v21 = vmul.f32 %v1623_v14, %v5072_v56  ;;  %v4303_v31 = vld [vmem:[%s5654_s9 + $0x28] sm:$0xff]   ;;  %v4304_v48 = vld [vmem:[%s5654_s9 + $0x30] sm:$0xff]  }
 0xb20   :  { %v1665_v57 = vrot.slane %v1636_v46, 1  ;;  %v1667_v7 = vrot.slane %v1637_v28, 1  ;;  %2121 = vmatpush1.bf16.msra.mxu0 %v4303_v31 }
 0xb21   :  { %v4104_v61 = vpack.i.bf16 %v5125_v5, %v5123_v4  ;;  %v1628_v6 = vpop.permute.xlu1 %1627  ;;  %v1669_v26 = vrot.slane %v1638_v20, 1  ;;  %v1671_v27 = vrot.slane %v1639_v21, 1  ;;  %2122 = vmatprep.subr.bf16.mxu0 %v4393_v1 }
 0xb22   :  { %v1640_v8 = vmul.f32 %v1628_v6, %v5084_v37  ;;  %v1641_v40 = vmul.f32 %v1628_v6, %v5087_v52  ;;  %v1666_v16 = vsel %vm1654_vm15, %v1661_v35, %v1665_v57  ;;  %v1668_v12 = vsel %vm1654_vm15, %v1663_v38, %v1667_v7 }
 0xb23   :  { %4105 = vrot.lane.b32.xlu1 %v4104_v61, %s4395_s20  ;;  %4090 = vrot.lane.b32.xlu0 %v4084_v0, %s4397_s3  ;;  %v5140_v11 = vmax.f32 %v1634_v36, %v1666_v16  ;;  %v5142_v13 = vmax.f32 %v1635_v30, %v1668_v12  ;;  %v1670_v55 = vsel %vm1654_vm15, %v1665_v57, %v1669_v26 }
 0xb24   :  { %v1673_v9 = vrot.slane %v1640_v8, 1  ;;  %v1675_v10 = vrot.slane %v1641_v40, 1  ;;  %v1672_v56 = vsel %vm1654_vm15, %v1667_v7, %v1671_v27  ;;  %v5166_v41 = vmax.f32 %v1636_v46, %v1670_v55  ;;  %2123 = vmatpush1.bf16.msra.mxu0 %v4304_v48 }
 0xb25   :  { %v4114_v23 = vpack.i.bf16 %v5142_v13, %v5140_v11  ;;  %v5168_v43 = vmax.f32 %v1637_v28, %v1672_v56  ;;  %2124 = vmatprep.subr.bf16.mxu0 %v4393_v1 }
 0xb26   :  { %v5146_v37 = vmax.f32 %v1640_v8, %v1673_v9  ;;  %v5148_v52 = vmax.f32 %v1641_v40, %v1675_v10  ;;  %v1674_v29 = vsel %vm1654_vm15, %v1669_v26, %v1673_v9  ;;  %v1676_v33 = vsel %vm1654_vm15, %v1671_v27, %v1675_v10 }
 0xb27   :  { %4110 = vrot.lane.b32.xlu1 %v4104_v61, %s4397_s3  ;;  %4095 = vrot.lane.b32.xlu0 %v4084_v0, %s5681_s7  ;;  %v5170_v15 = vmax.f32 %v1638_v20, %v1674_v29  ;;  %v5172_v24 = vmax.f32 %v1639_v21, %v1676_v33  ;;  %v4159_v44 = vpack.i.bf16 %v5168_v43, %v5166_v41 }
 0xb28   :  { %v4144_v25 = vpack.i.bf16 %v5148_v52, %v5146_v37  ;;  %2125 = vmatpush1.bf16.msra.mxu0 %v4305_v49 }
 0xb29   :  { %v4164_v22 = vpack.i.bf16 %v5172_v24, %v5170_v15  ;;  %2126 = vmatprep.subr.bf16.mxu0 %v4393_v1 }
 0xb2b   :  { %4120 = vrot.lane.b32.xlu1 %v4104_v61, %s5681_s7  ;;  %4100 = vrot.lane.b32.xlu0 %v4084_v0, %s4405_s30 }
 0xb2f   :  { %4130 = vrot.lane.b32.xlu1 %v4104_v61, %s4405_s30  ;;  %4115 = vrot.lane.b32.xlu0 %v4114_v23, %s4395_s20 }
 0xb33   :  { %4145 = vrot.lane.b32.xlu1 %v4144_v25, %s4395_s20  ;;  %4125 = vrot.lane.b32.xlu0 %v4114_v23, %s4397_s3 }
 0xb37   :  { %4150 = vrot.lane.b32.xlu1 %v4144_v25, %s4397_s3  ;;  %4135 = vrot.lane.b32.xlu0 %v4114_v23, %s5681_s7 }
 0xb3b   :  { %4155 = vrot.lane.b32.xlu1 %v4144_v25, %s5681_s7  ;;  %4140 = vrot.lane.b32.xlu0 %v4114_v23, %s4405_s30 }
 0xb3f   :  { %4160 = vrot.lane.b32.xlu1 %v4159_v44, %s4395_s20  ;;  %4165 = vrot.lane.b32.xlu0 %v4164_v22, %s4395_s20 }
 0xb43   :  { %4170 = vrot.lane.b32.xlu1 %v4159_v44, %s4397_s3  ;;  %4175 = vrot.lane.b32.xlu0 %v4164_v22, %s4397_s3 }
 0xb47   :  { %4180 = vrot.lane.b32.xlu1 %v4159_v44, %s5681_s7  ;;  %4185 = vrot.lane.b32.xlu0 %v4164_v22, %s5681_s7 }
 0xb4b   :  { %4190 = vrot.lane.b32.xlu1 %v4159_v44, %s4405_s30  ;;  %4195 = vrot.lane.b32.xlu0 %v4164_v22, %s4405_s30 }
 0xb4f   :  { %4200 = vrot.lane.b32.xlu1 %v4144_v25, %s4405_s30 }
 0xb91   :  { %v4086_v50 = vpop.permute.xlu0 %4085 }
 0xb92   :  { %v4088_v51 = vunpack.i.h.bf16 %v4086_v50  ;;  %v4087_v53 = vunpack.i.l.bf16 %v4086_v50 }
 0xb94   :  { %v1738_v62 = vsel %vm1737_vm2, %v4087_v53, %v4088_v51  ;;  %v1757_v46 = vmax.f32 %v5117_v58, %v4088_v51 }
 0xb95   :  { %v4106_v54 = vpop.permute.xlu1 %4105  ;;  %v4091_v34 = vpop.permute.xlu0 %4090  ;;  %v1756_v28 = vmax.f32 %v5115_v32, %v1738_v62 }
 0xb96   :  { %v4108_v59 = vunpack.i.h.bf16 %v4106_v54  ;;  %v4107_v60 = vunpack.i.l.bf16 %v4106_v54  ;;  %v4093_v36 = vunpack.i.h.bf16 %v4091_v34  ;;  %v4092_v30 = vunpack.i.l.bf16 %v4091_v34 }
 0xb98   :  { %v1739_v0 = vsel %vm1737_vm2, %v4107_v60, %v4108_v59  ;;  %v1759_v61 = vmax.f32 %v5125_v5, %v4108_v59  ;;  %v1793_v57 = vsel %vm1792_vm4, %v4092_v30, %v4093_v36  ;;  %v1812_v9 = vmax.f32 %v1757_v46, %v4093_v36 }
 0xb99   :  { %v4111_v39 = vpop.permute.xlu1 %4110  ;;  %v4096_v63 = vpop.permute.xlu0 %4095  ;;  %v1758_v12 = vmax.f32 %v5123_v4, %v1739_v0  ;;  %v1811_v5 = vmax.f32 %v1756_v28, %v1793_v57 }
 0xb9a   :  { %v4113_v35 = vunpack.i.h.bf16 %v4111_v39  ;;  %v4112_v38 = vunpack.i.l.bf16 %v4111_v39  ;;  %v4098_v2 = vunpack.i.h.bf16 %v4096_v63  ;;  %v4097_v3 = vunpack.i.l.bf16 %v4096_v63 }
 0xb9c   :  { %v1794_v7 = vsel %vm1792_vm4, %v4112_v38, %v4113_v35  ;;  %v1814_v20 = vmax.f32 %v1759_v61, %v4113_v35  ;;  %v1848_v58 = vsel %vm1847_vm5, %v4097_v3, %v4098_v2  ;;  %v1867_v23 = vmax.f32 %v1812_v9, %v4098_v2 }
 0xb9d   :  { %v4121_v6 = vpop.permute.xlu1 %4120  ;;  %v4101_v16 = vpop.permute.xlu0 %4100  ;;  %v1813_v21 = vmax.f32 %v1758_v12, %v1794_v7  ;;  %v1866_v33 = vmax.f32 %v1811_v5, %v1848_v58  ;;  %v4413_v2 = vmov 65535  }
 0xb9e   :  { %v4123_v8 = vunpack.i.h.bf16 %v4121_v6  ;;  %v4122_v40 = vunpack.i.l.bf16 %v4121_v6  ;;  %v4103_v10 = vunpack.i.h.bf16 %v4101_v16  ;;  %v4102_v14 = vunpack.i.l.bf16 %v4101_v16 }
 0xb9f   :  { %v5239_v3 = vsel %vm1654_vm15, 4294967295, %v4413_v2 }
 0xba0   :  { %v1849_v32 = vsel %vm1847_vm5, %v4122_v40, %v4123_v8  ;;  %v1869_v26 = vmax.f32 %v1814_v20, %v4123_v8  ;;  %v1903_v27 = vsel %vm1902_vm6, %v4102_v14, %v4103_v10  ;;  %v1922_v44 = vmax.f32 %v1867_v23, %v4103_v10 }
 0xba1   :  { %v4131_v25 = vpop.permute.xlu1 %4130  ;;  %v4116_v29 = vpop.permute.xlu0 %4115  ;;  %v1868_v4 = vmax.f32 %v1813_v21, %v1849_v32  ;;  %v1921_v18 = vmax.f32 %v1866_v33, %v1903_v27 }
 0xba2   :  { %v4133_v55 = vunpack.i.h.bf16 %v4131_v25  ;;  %v4132_v56 = vunpack.i.l.bf16 %v4131_v25  ;;  %v4118_v51 = vunpack.i.h.bf16 %v4116_v29  ;;  %v4117_v53 = vunpack.i.l.bf16 %v4116_v29 }
 0xba4   :  { %v1904_v22 = vsel %vm1902_vm6, %v4132_v56, %v4133_v55  ;;  %v1924_v17 = vmax.f32 %v1869_v26, %v4133_v55  ;;  %v1740_v36 = vsel %vm1737_vm2, %v4117_v53, %v4118_v51  ;;  %v1761_v46 = vmax.f32 %v5142_v13, %v4118_v51 }
 0xba5   :  { %v1923_v19 = vmax.f32 %v1868_v4, %v1904_v22  ;;  %v4146_v45 = vpop.permute.xlu1 %4145  ;;  %v4126_v47 = vpop.permute.xlu0 %4125  ;;  %v1760_v28 = vmax.f32 %v5140_v11, %v1740_v36 }
 0xba6   :  { %v1937_v31 = vpack.c.bf16 %v1924_v17, %v1922_v44  ;;  %v4148_v34 = vunpack.i.h.bf16 %v4146_v45  ;;  %v4147_v59 = vunpack.i.l.bf16 %v4146_v45  ;;  %v4128_v62 = vunpack.i.h.bf16 %v4126_v47 }
 0xba7   :  { %v1936_v48 = vpack.c.bf16 %v1923_v19, %v1921_v18  ;;  %v4127_v39 = vunpack.i.l.bf16 %v4126_v47 }
 0xba8   :  { %1966 = vmatprep.subr.bf16.mxu1 %v1937_v31  ;;  %v1743_v63 = vsel %vm1737_vm2, %v4147_v59, %v4148_v34  ;;  %v1767_v16 = vmax.f32 %v5148_v52, %v4148_v34  ;;  %v1816_v58 = vmax.f32 %v1761_v46, %v4128_v62 }
 0xba9   :  { %v4151_v49 = vpop.permute.xlu1 %4150  ;;  %1967 = vmatpush1.bf16.msra.mxu1 %v1936_v48  ;;  %v4136_v50 = vpop.permute.xlu0 %4135  ;;  %v1795_v61 = vsel %vm1792_vm4, %v4127_v39, %v4128_v62  ;;  %v1766_v12 = vmax.f32 %v5146_v37, %v1743_v63 }
 0xbaa   :  { %v4153_v30 = vunpack.i.h.bf16 %v4151_v49  ;;  %v4152_v35 = vunpack.i.l.bf16 %v4151_v49  ;;  %v4138_v6 = vunpack.i.h.bf16 %v4136_v50  ;;  %v4137_v7 = vunpack.i.l.bf16 %v4136_v50 }
 0xbab   :  { %v1815_v20 = vmax.f32 %v1760_v28, %v1795_v61 }
 0xbac   :  { %v1798_v57 = vsel %vm1792_vm4, %v4152_v35, %v4153_v30  ;;  %v1822_v21 = vmax.f32 %v1767_v16, %v4153_v30  ;;  %v1850_v26 = vsel %vm1847_vm5, %v4137_v7, %v4138_v6  ;;  %v1871_v27 = vmax.f32 %v1816_v58, %v4138_v6 }
 0xbad   :  { %v4156_v54 = vpop.permute.xlu1 %4155  ;;  %v5233_v60 = vpop.permute.xlu0 %4140  ;;  %v5247_v5 = vmax.f32 %v1766_v12, %v1798_v57  ;;  %v1870_v45 = vmax.f32 %v1815_v20, %v1850_v26 }
 0xbae   :  { %v4158_v23 = vunpack.i.h.bf16 %v4156_v54  ;;  %v4157_v25 = vunpack.i.l.bf16 %v4156_v54  ;;  %v4143_v52 = vunpack.i.h.bf16 %v5233_v60  ;;  %v4142_v55 = vunpack.i.l.bf16 %v5233_v60 }
 0xbb0   :  { %v1853_v47 = vsel %vm1847_vm5, %v4157_v25, %v4158_v23  ;;  %v1877_v31 = vmax.f32 %v1822_v21, %v4158_v23  ;;  %v1905_v53 = vsel %vm1902_vm6, %v4142_v55, %v4143_v52  ;;  %v1926_v46 = vmax.f32 %v1871_v27, %v4143_v52  ;;  %v4296_v52 = vld [vmem:[%s5653_s8] sm:$0xff]   ;;  %v4307_v55 = vld [vmem:[%s5654_s9 + $0x48] sm:$0x3f]  }
 0xbb1   :  { %v4161_v38 = vpop.permute.xlu1 %4160  ;;  %v4166_v0 = vpop.permute.xlu0 %4165  ;;  %v1925_v6 = vmax.f32 %v1870_v45, %v1905_v53  ;;  %v5270_v23 = vsel %vm1957_vm7, %v5239_v3, 0  ;;  %v4297_v3 = vld [vmem:[%s5653_s8 + $0x8] ss:$0 sps:$4 sm:$0xff]  }
 0xbb2   :  { %v4163_v8 = vunpack.i.h.bf16 %v4161_v38  ;;  %v4162_v40 = vunpack.i.l.bf16 %v4161_v38  ;;  %v4168_v9 = vunpack.i.h.bf16 %v4166_v0  ;;  %v4167_v10 = vunpack.i.l.bf16 %v4166_v0 }
 0xbb4   :  { %v1741_v37 = vsel %vm1737_vm2, %v4162_v40, %v4163_v8  ;;  %v1763_v56 = vmax.f32 %v5168_v43, %v4163_v8  ;;  %v1742_v29 = vsel %vm1737_vm2, %v4167_v10, %v4168_v9  ;;  %v1765_v54 = vmax.f32 %v5172_v24, %v4168_v9 }
 0xbb5   :  { %v4171_v14 = vpop.permute.xlu1 %4170  ;;  %v4176_v11 = vpop.permute.xlu0 %4175  ;;  %v1762_v48 = vmax.f32 %v5166_v41, %v1741_v37  ;;  %v1764_v34 = vmax.f32 %v5170_v15, %v1742_v29  ;;  %v1876_v10 = vmax.f32 %v5247_v5, %v1853_v47  ;;  %v4306_v37 = vld [vmem:[%s5654_s9 + $0x40] sm:$0xff]   ;;  %vm3378_vm2 = vcmask 64512  }
 0xbb6   :  { %v4173_v13 = vunpack.i.h.bf16 %v4171_v14  ;;  %v4172_v32 = vunpack.i.l.bf16 %v4171_v14  ;;  %v4178_v33 = vunpack.i.h.bf16 %v4176_v11  ;;  %v4177_v22 = vunpack.i.l.bf16 %v4176_v11  ;;  %2127 = vmatpush1.bf16.msra.mxu0 %v4306_v37 }
 0xbb7   :  { %2128 = vmatprep.subr.bf16.mxu0 %v4393_v1 }
 0xbb8   :  { %v1796_v44 = vsel %vm1792_vm4, %v4172_v32, %v4173_v13  ;;  %v1818_v49 = vmax.f32 %v1763_v56, %v4173_v13  ;;  %v1797_v62 = vsel %vm1792_vm4, %v4177_v22, %v4178_v33  ;;  %v1820_v41 = vmax.f32 %v1765_v54, %v4178_v33 }
 0xbb9   :  { %v4181_v4 = vpop.permute.xlu1 %4180  ;;  %v4186_v19 = vpop.permute.xlu0 %4185  ;;  %v1817_v59 = vmax.f32 %v1762_v48, %v1796_v44  ;;  %v1819_v15 = vmax.f32 %v1764_v34, %v1797_v62  ;;  %v2108_v56 = vsel %vm651_vm8, %v4307_v55, 0  ;;  %v4308_v48 = vld [vmem:[%s5655_s11] sm:$0xff]   ;;  %vm2260_vm8 = vcmask 195584  }
 0xbba   :  { %v4183_v17 = vunpack.i.h.bf16 %v4181_v4  ;;  %v4182_v18 = vunpack.i.l.bf16 %v4181_v4  ;;  %v4188_v50 = vunpack.i.h.bf16 %v4186_v19  ;;  %v4187_v51 = vunpack.i.l.bf16 %v4186_v19  ;;  %2129 = vmatpush1.bf16.msra.mxu0 %v2108_v56 }
 0xbbb   :  { %vm3405_vm4 = vcmask 1024  }
 0xbbc   :  { %v1851_v43 = vsel %vm1847_vm5, %v4182_v18, %v4183_v17  ;;  %v1873_v39 = vmax.f32 %v1818_v49, %v4183_v17  ;;  %v1852_v28 = vsel %vm1847_vm5, %v4187_v51, %v4188_v50  ;;  %v1875_v57 = vmax.f32 %v1820_v41, %v4188_v50  ;;  %v4309_v49 = vld [vmem:[%s5655_s11 + $0x8] sm:$0xff]  }
 0xbbd   :  { %v4191_v60 = vpop.permute.xlu1 %4190  ;;  %v4196_v35 = vpop.permute.xlu0 %4195  ;;  %v1872_v38 = vmax.f32 %v1817_v59, %v1851_v43  ;;  %v1874_v14 = vmax.f32 %v1819_v15, %v1852_v28  ;;  %v4311_v28 = vld [vmem:[%s5656_s10 + $0x8] sm:$0xff]  }
 0xbbe   :  { %v4193_v36 = vunpack.i.h.bf16 %v4191_v60  ;;  %v4192_v30 = vunpack.i.l.bf16 %v4191_v60  ;;  %v4198_v63 = vunpack.i.h.bf16 %v4196_v35  ;;  %v4197_v0 = vunpack.i.l.bf16 %v4196_v35 }
 0xbc0   :  { %v1906_v61 = vsel %vm1902_vm6, %v4192_v30, %v4193_v36  ;;  %v1928_v24 = vmax.f32 %v1873_v39, %v4193_v36  ;;  %v1907_v40 = vsel %vm1902_vm6, %v4197_v0, %v4198_v63  ;;  %v1930_v58 = vmax.f32 %v1875_v57, %v4198_v63  ;;  %v4310_v36 = vld [vmem:[%s5656_s10] sm:$0xff]  }
 0xbc1   :  { %v1927_v7 = vmax.f32 %v1872_v38, %v1906_v61  ;;  %v4201_v8 = vpop.permute.xlu1 %4200  ;;  %v1929_v11 = vmax.f32 %v1874_v14, %v1907_v40  ;;  %v4312_v61 = vld [vmem:[%s5656_s10 + $0x10] sm:$0xff]  }
 0xbc2   :  { %v4203_v16 = vunpack.i.h.bf16 %v4201_v8  ;;  %v4202_v12 = vunpack.i.l.bf16 %v4201_v8  ;;  %v1939_v9 = vpack.c.bf16 %v1928_v24, %v1926_v46  ;;  %v4313_v24 = vld [vmem:[%s5656_s10 + $0x18] sm:$0xff]   ;;  %s5682_s10 = smov 120  }
 0xbc3   :  { %v1938_v20 = vpack.c.bf16 %v1927_v7, %v1925_v6 }
 0xbc4   :  { %v1932_v13 = vmax.f32 %v1877_v31, %v4203_v16  ;;  %v1908_v32 = vsel %vm1902_vm6, %v4202_v12, %v4203_v16  ;;  %1968 = vmatprep.subr.bf16.mxu1 %v1939_v9 }
 0xbc5   :  { %v1931_v21 = vmax.f32 %v1876_v10, %v1908_v32  ;;  %1969 = vmatpush1.bf16.msra.mxu1 %v1938_v20 }
 0xbc6   :  { %v1941_v25 = vpack.c.bf16 %v1932_v13, %v1930_v58  ;;  %v5382_v58 = vld [vmem:[%s5657_s12 + $0x4] ss:$20 sps:$4 sm:$0xff]   ;;  %v5412_v13 = vld [vmem:[%s5657_s12 + $0xc] ss:$20 sps:$4 sm:$0xff]  }
 0xbc7   :  { %v1940_v26 = vpack.c.bf16 %v1931_v21, %v1929_v11 }
 0xbc8   :  { %v1964_v27 = vand.u32 %v5270_v23, %v1941_v25 }
 0xbc9   :  { %v1961_v5 = vand.u32 %v5270_v23, %v1940_v26 }
 0xbca   :  { %1970 = vmatprep.subr.bf16.mxu1 %v1964_v27 }
 0xbcb   :  { %1971 = vmatpush1.bf16.msra.mxu1 %v1961_v5 }
 0xbcc   :  { %3913 = vmatprep.subr.bf16.mxu1 %v4308_v48 }
 0xbce   :  { %3514 = vmatmul.mubr.msk.bf16.vlgmr.msra.gmra.mrb[56].mxu1 %vm1950_vm9, %v4296_v52 }
 0xbcf   :  { %2008 = vmatprep.mubr.bf16.mxu1 %v4393_v1  ;;  %3914 = vmatpush3.bf16.msra.mxu1 %v4308_v48 }
 0xbd0   :  { %3915 = vmatprep.subr.bf16.mxu1 %v4309_v49 }
 0xbd3   :  { %3916 = vmatpush3.bf16.msra.mxu1 %v4309_v49 }
 0xbd6   :  { %3515 = vmatmul.mubr.msk.bf16.gmra.mrb[60].mxu1 %vm1950_vm9, %v4297_v3 }
 0xca1   :  { %v2000_v29 = vpop.f32.mrb[56].mxu1 }
 0xca2   :  { %v2002_v33 = vpop.f32.mrb[57].mxu1 }
 0xca3   :  { %v2004_v4 = vpop.f32.mrb[58].mxu1 }
 0xca4   :  { %v2037_v44 = vpack.c.bf16 %v2004_v4, %v2000_v29  ;;  %v2006_v22 = vpop.f32.mrb[59].mxu1 }
 0xca5   :  { %v2038_v17 = vpack.c.bf16 %v2006_v22, %v2002_v33 }
 0xca7   :  { %3526 = vmatprep.mubr.msk.bf16.mxu0 %vm2100_vm11, %v2038_v17 }
 0xca8   :  { %2143 = vmatmul.mubr.bf16.vlgmr.msra.gmra.mrb[16].mxu0 %v2037_v44 }
 0xca9   :  { %v2010_v18 = vpop.f32.mrb[60].mxu1 }
 0xcaa   :  { %v2012_v19 = vpop.f32.mrb[61].mxu1  ;;  %v2039_v31 = vpack.c.bf16 %v2010_v18, %v2010_v18 }
 0xcab   :  { %v2040_v45 = vpack.c.bf16 %v2012_v19, %v2012_v19  ;;  %v2014_v1 = vpop.f32.mrb[62].mxu1 }
 0xcac   :  { %v2015_v47 = vpop.f32.mrb[63].mxu1 }
 0xcad   :  { %3527 = vmatprep.mubr.msk.bf16.mxu0 %vm2100_vm11, %v2040_v45 }
 0xcb0   :  { %2151 = vmatmul.mubr.bf16.gmra.mrb[20].mxu0 %v2039_v31 }
 0xcb1   :  { %2590 = vmatprep.mubr.bf16.mxu0 %v5412_v13 }
 0xd7b   :  { %v2144_v43 = vpop.f32.mrb[16].mxu0 }
 0xd7c   :  { %v2146_v50 = vpop.f32.mrb[17].mxu0 }
 0xd7d   :  { %v2147_v51 = vpop.f32.mrb[18].mxu0 }
 0xd7e   :  { %v2170_v53 = vpack.c.bf16 %v2147_v51, %v2144_v43  ;;  %v2149_v54 = vpop.f32.mrb[19].mxu0 }
 0xd80   :  { %3917 = vmatprep.mubr.msk.bf16.mxu1 %vm430_vm1, %v2170_v53 }
 0xd83   :  { %v2152_v34 = vpop.f32.mrb[20].mxu0 }
 0xd84   :  { %v2171_v59 = vpack.c.bf16 %v2152_v34, %v2152_v34  ;;  %v2154_v60 = vpop.f32.mrb[21].mxu0  ;;  %v5467_v34 = vld [vmem:[%s5657_s12] ss:$20 sps:$4 sm:$0xff]  }
 0xd85   :  { %v2155_v62 = vpop.f32.mrb[22].mxu0 }
 0xd86   :  { %v2156_v39 = vpop.f32.mrb[23].mxu0  ;;  %3918 = vmatmul.mubr.msk.bf16.vlgmr.msra.gmra.mrb[64].mxu1 %vm430_vm1, %v2171_v59  ;;  %v2351_v59 = vld [vmem:[%s5657_s12 + $0x28] sm:$0xff] }
 0xd87   :  { %3925 = vmatprep.mubr.msk.bf16.mxu1 %vm2260_vm8, %v4310_v36  ;;  %v5473_v39 = vcombine.high %v2351_v59, %v2351_v59 }
 0xe59   :  { %v3919_v30 = vpop.f32.mrb[64].mxu1 }
 0xe5a   :  { %v2224_v35 = vpop.f32.mrb[65].mxu1  ;;  %v2239_v0 = vpack.c.bf16 %v3919_v30, %v3919_v30  ;;  %v5483_v30 = vcombine.low %v2351_v59, %v2351_v59 }
 0xe5b   :  { %v3920_v41 = vpop.f32.mrb[66].mxu1 }
 0xe5c   :  { %v2227_v38 = vpop.f32.mrb[67].mxu1  ;;  %v2274_v46 = vsel %vm435_vm3, %v2239_v0, 0 }
 0xe5d   :  { %v2238_v63 = vpack.c.bf16 %v2227_v38, %v2224_v35  ;;  %v5493_v38 = vld [vmem:[%s5657_s12 + $0x10] ss:$20 sps:$4 sm:$0xff]  }
 0xe5f   :  { %3921 = vmatprep.subr.bf16.mxu1 %v2238_v63 }
 0xe60   :  { %3922 = vmatpush3.bf16.msra.mxu1 %v2238_v63 }
 0xe61   :  { %4057 = vmatprep.subr.msk.bf16.mxu1 %vm435_vm3, %v2239_v0 }
 0xe64   :  { %3924 = vmatpush3.bf16.msra.mxu1 %v2274_v46  ;;  %v2352_v46 = vld [vmem:[%s5657_s12 + $0x30] sm:$0xff] }
 0xe67   :  { %3926 = vmatmul.mubr.msk.bf16.vlgmr.msra.gmra.mrb[68].mxu1 %vm2260_vm8, %v4311_v28  ;;  %v5521_v28 = vld [vmem:[%s5657_s12 + $0x8] ss:$20 sps:$4 sm:$0xff]  }
 0xe68   :  { %3929 = vmatprep.mubr.msk.bf16.mxu1 %vm2260_vm8, %v4312_v61 }
 0xe6f   :  { %3930 = vmatmul.mubr.msk.bf16.gmra.mrb[72].mxu1 %vm2260_vm8, %v4313_v24  ;;  %v5525_v24 = vcombine.high %v2352_v46, %v2352_v46 }
 0xe70   :  { %2542 = vmatprep.mubr.bf16.mxu1 %v5382_v58 }
 0xf3a   :  { %v3927_v6 = vpop.f32.mrb[68].mxu1 }
 0xf3b   :  { %v2310_v15 = vpop.f32.mrb[69].mxu1 }
 0xf3c   :  { %v3928_v57 = vpop.f32.mrb[70].mxu1 }
 0xf3d   :  { %v5315_v7 = vpack.c.bf16 %v3928_v57, %v3927_v6  ;;  %v2313_v8 = vpop.f32.mrb[71].mxu1  ;;  %v2934_v6 = vld [vmem:[%s5658_s13 + $0x8] sm:$0xff]  ;;  %v2933_v57 = vld [vmem:[%s5658_s13] sm:$0xff] }
 0xf3e   :  { %v5317_v40 = vpack.c.bf16 %v2313_v8, %v2310_v15  ;;  %v5543_v15 = vld [vmem:[%s5657_s12 + $0x38] ss:$0 sps:$4 sm:$0xff]   ;;  %s4415_s12 = smov 16  }
 0xf3f   :  { %2384 = vrot.lane.b32.xlu0 %v5315_v7, %s5681_s7  ;;  %2372 = vrot.lane.b32.xlu1 %v5315_v7, %s4397_s3 }
 0xf42   :  { %v3931_v16 = vpop.f32.mrb[72].mxu1 }
 0xf43   :  { %2420 = vrot.lane.b32.xlu0 %v5315_v7, %s4398_s24  ;;  %2360 = vrot.lane.b32.xlu1 %v5315_v7, %s4395_s20  ;;  %v2326_v12 = vpop.f32.mrb[73].mxu1 }
 0xf44   :  { %v3932_v9 = vpop.f32.mrb[74].mxu1 }
 0xf45   :  { %v5327_v10 = vpack.c.bf16 %v3932_v9, %v3931_v16  ;;  %v2329_v14 = vpop.f32.mrb[75].mxu1 }
 0xf46   :  { %v5329_v20 = vpack.c.bf16 %v2329_v14, %v2326_v12 }
 0xf47   :  { %2432 = vrot.lane.b32.xlu0 %v5315_v7, %s4400_s4  ;;  %2396 = vrot.lane.b32.xlu1 %v5315_v7, %s4405_s30 }
 0xf4b   :  { %2444 = vrot.lane.b32.xlu1 %v5315_v7, %s5682_s10  ;;  %2370 = vrot.lane.b32.xlu0 %v5317_v40, %s4397_s3 }
 0xf4f   :  { %2408 = vrot.lane.b32.xlu1 %v5315_v7, %s4396_s0  ;;  %2382 = vrot.lane.b32.xlu0 %v5317_v40, %s5681_s7 }
 0xf53   :  { %2358 = vrot.lane.b32.xlu1 %v5317_v40, %s4395_s20  ;;  %2418 = vrot.lane.b32.xlu0 %v5317_v40, %s4398_s24 }
 0xf57   :  { %2394 = vrot.lane.b32.xlu1 %v5317_v40, %s4405_s30  ;;  %2442 = vrot.lane.b32.xlu0 %v5317_v40, %s5682_s10 }
 0xf5b   :  { %2430 = vrot.lane.b32.xlu1 %v5317_v40, %s4400_s4  ;;  %2406 = vrot.lane.b32.xlu0 %v5317_v40, %s4396_s0 }
 0xf5f   :  { %2388 = vrot.lane.b32.xlu0 %v5327_v10, %s5681_s7  ;;  %2376 = vrot.lane.b32.xlu1 %v5327_v10, %s4397_s3 }
 0xf63   :  { %2424 = vrot.lane.b32.xlu0 %v5327_v10, %s4398_s24  ;;  %2364 = vrot.lane.b32.xlu1 %v5327_v10, %s4395_s20 }
 0xf67   :  { %2400 = vrot.lane.b32.xlu1 %v5327_v10, %s4405_s30  ;;  %2374 = vrot.lane.b32.xlu0 %v5329_v20, %s4397_s3 }
 0xf6b   :  { %2448 = vrot.lane.b32.xlu1 %v5327_v10, %s5682_s10  ;;  %2454 = vrot.lane.b32.xlu0 %v5317_v40, %s4394_s2 }
 0xf6f   :  { %2456 = vrot.lane.b32.xlu1 %v5315_v7, %s4394_s2  ;;  %2436 = vrot.lane.b32.xlu0 %v5327_v10, %s4400_s4 }
 0xf73   :  { %2362 = vrot.lane.b32.xlu1 %v5329_v20, %s4395_s20  ;;  %2386 = vrot.lane.b32.xlu0 %v5329_v20, %s5681_s7 }
 0xf77   :  { %2412 = vrot.lane.b32.xlu1 %v5327_v10, %s4396_s0  ;;  %2654 = vrot.lane.b32.xlu0 %v5317_v40, %s4414_s28 }
 0xf7b   :  { %2460 = vrot.lane.b32.xlu1 %v5327_v10, %s4394_s2  ;;  %2398 = vrot.lane.b32.xlu0 %v5329_v20, %s4405_s30 }
 0xf7f   :  { %2422 = vrot.lane.b32.xlu1 %v5329_v20, %s4398_s24  ;;  %2446 = vrot.lane.b32.xlu0 %v5329_v20, %s5682_s10 }
 0xf83   :  { %2656 = vrot.lane.b32.xlu1 %v5315_v7, %s4414_s28  ;;  %2410 = vrot.lane.b32.xlu0 %v5329_v20, %s4396_s0 }
 0xf87   :  { %2660 = vrot.lane.b32.xlu1 %v5327_v10, %s4414_s28  ;;  %2458 = vrot.lane.b32.xlu0 %v5329_v20, %s4394_s2 }
 0xf8b   :  { %2434 = vrot.lane.b32.xlu1 %v5329_v20, %s4400_s4 }
 0xf8f   :  { %2658 = vrot.lane.b32.xlu1 %v5329_v20, %s4414_s28 }
 0xfb1   :  { %v2385_v32 = vpop.permute.xlu0 %2384  ;;  %v2373_v11 = vpop.permute.xlu1 %2372 }
 0xfb2   :  { %2672 = vrot.lane.b32.xlu0 %v2373_v11, %s4414_s28 }
 0xfb5   :  { %v2421_v21 = vpop.permute.xlu0 %2420  ;;  %v2361_v25 = vpop.permute.xlu1 %2360 }
 0xfb6   :  { %2664 = vrot.lane.b32.xlu1 %v2361_v25, %s4414_s28  ;;  %2680 = vrot.lane.b32.xlu0 %v2385_v32, %s4414_s28 }
 0xfb9   :  { %v5418_v26 = vpop.permute.xlu0 %2432  ;;  %v2397_v27 = vpop.permute.xlu1 %2396 }
 0xfbd   :  { %v5420_v5 = vpop.permute.xlu1 %2444  ;;  %v2371_v52 = vpop.permute.xlu0 %2370 }
 0xfbe   :  { %3681 = vmatprep.subr.bf16.mxu1 %v2371_v52  ;;  %2670 = vrot.lane.b32.xlu1 %v2371_v52, %s4414_s28 }
 0xfbf   :  { %3682 = vmatpush3.bf16.msra.mxu1 %v5317_v40 }
 0xfc0   :  { %3683 = vmatprep.subr.bf16.mxu1 %v2373_v11 }
 0xfc1   :  { %v5424_v3 = vpop.permute.xlu1 %2408  ;;  %v2383_v37 = vpop.permute.xlu0 %2382 }
 0xfc2   :  { %2678 = vrot.lane.b32.xlu0 %v2383_v37, %s4414_s28 }
 0xfc3   :  { %3684 = vmatpush3.bf16.msra.mxu1 %v5315_v7  ;;  %v5549_v7 = vcombine.low %v2352_v46, %v2352_v46 }
 0xfc5   :  { %v2359_v55 = vpop.permute.xlu1 %2358  ;;  %v2419_v56 = vpop.permute.xlu0 %2418 }
 0xfc6   :  { %3709 = vmatprep.subr.bf16.mxu0 %v2419_v56  ;;  %2662 = vrot.lane.b32.xlu1 %v2359_v55, %s4414_s28 }
 0xfc9   :  { %v2395_v29 = vpop.permute.xlu1 %2394  ;;  %v2443_v33 = vpop.permute.xlu0 %2442 }
 0xfca   :  { %3710 = vmatpush3.bf16.msra.mxu0 %v2395_v29  ;;  %2702 = vrot.lane.b32.xlu1 %v2419_v56, %s4414_s28 }
 0xfcb   :  { %3711 = vmatprep.subr.bf16.mxu0 %v2421_v21 }
 0xfcd   :  { %v5430_v4 = vpop.permute.xlu1 %2430  ;;  %v5432_v44 = vpop.permute.xlu0 %2406 }
 0xfce   :  { %3712 = vmatpush3.bf16.msra.mxu0 %v2397_v27  ;;  %2686 = vrot.lane.b32.xlu1 %v2395_v29, %s4414_s28 }
 0xfd1   :  { %v2389_v22 = vpop.permute.xlu0 %2388  ;;  %v2377_v17 = vpop.permute.xlu1 %2376 }
 0xfd2   :  { %2718 = vrot.lane.b32.xlu1 %v2443_v33, %s4414_s28  ;;  %2676 = vrot.lane.b32.xlu0 %v2377_v17, %s4414_s28 }
 0xfd5   :  { %v2425_v18 = vpop.permute.xlu0 %2424  ;;  %v2365_v19 = vpop.permute.xlu1 %2364 }
 0xfd6   :  { %2710 = vrot.lane.b32.xlu1 %v5430_v4, %s4414_s28  ;;  %2684 = vrot.lane.b32.xlu0 %v2389_v22, %s4414_s28 }
 0xfd9   :  { %v2401_v45 = vpop.permute.xlu1 %2400  ;;  %v2375_v1 = vpop.permute.xlu0 %2374 }
 0xfda   :  { %3685 = vmatprep.subr.bf16.mxu1 %v2375_v1  ;;  %2674 = vrot.lane.b32.xlu0 %v2375_v1, %s4414_s28 }
 0xfdb   :  { %3686 = vmatpush3.bf16.msra.mxu1 %v5329_v20 }
 0xfdc   :  { %3687 = vmatprep.subr.bf16.mxu1 %v2377_v17 }
 0xfdd   :  { %v2449_v47 = vpop.permute.xlu1 %2448  ;;  %v5442_v31 = vpop.permute.xlu0 %2454 }
 0xfde   :  { %2668 = vrot.lane.b32.xlu0 %v2365_v19, %s4414_s28 }
 0xfdf   :  { %3688 = vmatpush3.bf16.msra.mxu1 %v5327_v10 }
 0xfe0   :  { %3689 = vmatprep.subr.bf16.mxu1 %v2383_v37 }
 0xfe1   :  { %v5446_v48 = vpop.permute.xlu1 %2456  ;;  %v5448_v49 = vpop.permute.xlu0 %2436 }
 0xfe2   :  { %2704 = vrot.lane.b32.xlu0 %v2421_v21, %s4414_s28 }
 0xfe3   :  { %3690 = vmatpush3.bf16.msra.mxu1 %v2359_v55 }
 0xfe4   :  { %3691 = vmatprep.subr.bf16.mxu1 %v2385_v32 }
 0xfe5   :  { %v2363_v43 = vpop.permute.xlu1 %2362  ;;  %v2387_v50 = vpop.permute.xlu0 %2386 }
 0xfe6   :  { %2666 = vrot.lane.b32.xlu1 %v2363_v43, %s4414_s28  ;;  %2688 = vrot.lane.b32.xlu0 %v2397_v27, %s4414_s28 }
 0xfe7   :  { %3692 = vmatpush3.bf16.msra.mxu1 %v2361_v25 }
 0xfe8   :  { %3693 = vmatprep.subr.bf16.mxu1 %v2387_v50 }
 0xfe9   :  { %v5453_v51 = vpop.permute.xlu1 %2412  ;;  %v5458_v53 = vpop.permute.xlu0 %2654 }
 0xfea   :  { %2694 = vrot.lane.b32.xlu1 %v5432_v44, %s4414_s28  ;;  %2682 = vrot.lane.b32.xlu0 %v2387_v50, %s4414_s28 }
 0xfeb   :  { %3694 = vmatpush3.bf16.msra.mxu1 %v2363_v43 }
 0xfec   :  { %3695 = vmatprep.subr.bf16.mxu1 %v2389_v22 }
 0xfed   :  { %v5460_v54 = vpop.permute.xlu1 %2460  ;;  %v2399_v62 = vpop.permute.xlu0 %2398 }
 0xfee   :  { %2720 = vrot.lane.b32.xlu0 %v5420_v5, %s4414_s28 }
 0xfef   :  { %3696 = vmatpush3.bf16.msra.mxu1 %v2365_v19 }
 0xff0   :  { %3933 = vmatprep.subr.bf16.mxu1 %v2443_v33 }
 0xff1   :  { %v2423_v60 = vpop.permute.xlu1 %2422  ;;  %v2447_v35 = vpop.permute.xlu0 %2446 }
 0xff2   :  { %3713 = vmatprep.subr.bf16.mxu0 %v2423_v60  ;;  %2706 = vrot.lane.b32.xlu1 %v2423_v60, %s4414_s28 }
 0xff3   :  { %2708 = vrot.lane.b32.xlu0 %v2425_v18, %s4414_s28  ;;  %2543 = vmatmul.mubr.bf16.vlgmr.msra.gmra.mrb[76].mxu1 %v5467_v34 }
 0xff4   :  { %3714 = vmatpush3.bf16.msra.mxu0 %v2399_v62  ;;  %3934 = vmatpush3.bf16.msra.mxu1 %v2443_v33 }
 0xff5   :  { %3715 = vmatprep.subr.bf16.mxu0 %v2425_v18  ;;  %3935 = vmatprep.subr.bf16.mxu1 %v5420_v5  ;;  %v5478_v36 = vpop.permute.xlu1 %2656  ;;  %v2411_v0 = vpop.permute.xlu0 %2410 }
 0xff6   :  { %2690 = vrot.lane.b32.xlu1 %v2399_v62, %s4414_s28  ;;  %2550 = vmatprep.mubr.bf16.mxu1 %v5473_v39 }
 0xff7   :  { %2692 = vrot.lane.b32.xlu0 %v2401_v45, %s4414_s28 }
 0xff8   :  { %3716 = vmatpush3.bf16.msra.mxu0 %v2401_v45  ;;  %3936 = vmatpush3.bf16.msra.mxu1 %v5420_v5 }
 0xff9   :  { %3717 = vmatprep.subr.bf16.mxu0 %v5430_v4  ;;  %3937 = vmatprep.subr.bf16.mxu1 %v2447_v35  ;;  %v5487_v41 = vpop.permute.xlu1 %2660  ;;  %v2459_v61 = vpop.permute.xlu0 %2458 }
 0xffa   :  { %2722 = vrot.lane.b32.xlu1 %v2447_v35, %s4414_s28 }
 0xffb   :  { %2724 = vrot.lane.b32.xlu0 %v2449_v47, %s4414_s28  ;;  %2551 = vmatmul.mubr.bf16.gmra.mrb[80].mxu1 %v5483_v30 }
 0xffc   :  { %3718 = vmatpush3.bf16.msra.mxu0 %v5432_v44  ;;  %3938 = vmatpush3.bf16.msra.mxu1 %v2447_v35 }
 0xffd   :  { %3719 = vmatprep.subr.bf16.mxu0 %v5418_v26  ;;  %3939 = vmatprep.subr.bf16.mxu1 %v2449_v47  ;;  %v2435_v63 = vpop.permute.xlu1 %2434 }
 0xffe   :  { %2726 = vrot.lane.b32.xlu1 %v5442_v31, %s4414_s28  ;;  %3949 = vmatprep.mubr.bf16.mxu1 %v5493_v38 }
 0xfff   :  { %2712 = vrot.lane.b32.xlu0 %v5418_v26, %s4414_s28 }
0x1000   :  { %3720 = vmatpush3.bf16.msra.mxu0 %v5424_v3  ;;  %3940 = vmatpush3.bf16.msra.mxu1 %v2449_v47 }
0x1001   :  { %3721 = vmatprep.subr.bf16.mxu0 %v2435_v63  ;;  %3941 = vmatprep.subr.bf16.mxu1 %v5442_v31  ;;  %v2659_v8 = vpop.permute.xlu1 %2658 }
0x1002   :  { %2714 = vrot.lane.b32.xlu1 %v2435_v63, %s4414_s28 }
0x1003   :  { %2696 = vrot.lane.b32.xlu0 %v5424_v3, %s4414_s28 }
0x1004   :  { %3722 = vmatpush3.bf16.msra.mxu0 %v2411_v0  ;;  %3942 = vmatpush3.bf16.msra.mxu1 %v5442_v31 }
0x1005   :  { %3723 = vmatprep.subr.bf16.mxu0 %v5448_v49  ;;  %3943 = vmatprep.subr.bf16.mxu1 %v5446_v48 }
0x1006   :  { %2698 = vrot.lane.b32.xlu1 %v2411_v0, %s4414_s28 }
0x1007   :  { %2728 = vrot.lane.b32.xlu0 %v5446_v48, %s4414_s28 }
0x1008   :  { %3724 = vmatpush3.bf16.msra.mxu0 %v5453_v51  ;;  %3944 = vmatpush3.bf16.msra.mxu1 %v5446_v48 }
0x1009   :  { %3945 = vmatprep.subr.bf16.mxu1 %v2459_v61 }
0x100a   :  { %2730 = vrot.lane.b32.xlu1 %v2459_v61, %s4414_s28 }
0x100b   :  { %2716 = vrot.lane.b32.xlu0 %v5448_v49, %s4414_s28  ;;  %2591 = vmatmul.mubr.bf16.vlgmr.msra.gmra.mrb[24].mxu0 %v5521_v28 }
0x100c   :  { %3946 = vmatpush3.bf16.msra.mxu1 %v2459_v61  ;;  %2598 = vmatprep.mubr.bf16.mxu0 %v5525_v24 }
0x100d   :  { %3947 = vmatprep.subr.bf16.mxu1 %v5460_v54 }
0x100e   :  { %2732 = vrot.lane.b32.xlu1 %v5460_v54, %s4414_s28 }
0x100f   :  { %2700 = vrot.lane.b32.xlu0 %v5453_v51, %s4414_s28 }
0x1010   :  { %3948 = vmatpush3.bf16.msra.mxu1 %v5460_v54 }
0x1012   :  { %2943 = vperm.xlu1 %4083, %v2934_v6  }
0x1013   :  { %2938 = vperm.xlu0 %4082, %v2933_v57   ;;  %3950 = vmatmul.mubr.bf16.vlgmr.msra.gmra.mrb[84].mxu1 %v5543_v15 }
0x1014   :  { %2599 = vmatmul.mubr.bf16.gmra.mrb[28].mxu0 %v5549_v7  ;;  %2854 = vmatprep.mubr.bf16.mxu1 %v5412_v13 }
0x1015   :  { %2806 = vmatprep.mubr.bf16.mxu0 %v5382_v58 }
0x1024   :  { %v2673_v12 = vpop.permute.xlu0 %2672 }
0x1028   :  { %v2665_v40 = vpop.permute.xlu1 %2664  ;;  %v2681_v10 = vpop.permute.xlu0 %2680 }
0x1030   :  { %v2671_v16 = vpop.permute.xlu1 %2670 }
0x1031   :  { %3747 = vmatprep.subr.bf16.mxu0 %v2671_v16 }
0x1032   :  { %3748 = vmatpush3.bf16.msra.mxu0 %v5458_v53 }
0x1033   :  { %3749 = vmatprep.subr.bf16.mxu0 %v2673_v12 }
0x1034   :  { %v2679_v20 = vpop.permute.xlu0 %2678 }
0x1036   :  { %3750 = vmatpush3.bf16.msra.mxu0 %v5478_v36 }
0x1038   :  { %v2663_v9 = vpop.permute.xlu1 %2662 }
0x103c   :  { %v2703_v14 = vpop.permute.xlu1 %2702 }
0x103d   :  { %3775 = vmatprep.subr.bf16.mxu1 %v2703_v14 }
0x1040   :  { %v2687_v32 = vpop.permute.xlu1 %2686 }
0x1041   :  { %3776 = vmatpush3.bf16.msra.mxu1 %v2687_v32 }
0x1044   :  { %v2677_v13 = vpop.permute.xlu0 %2676  ;;  %v2719_v21 = vpop.permute.xlu1 %2718 }
0x1048   :  { %v2685_v11 = vpop.permute.xlu0 %2684  ;;  %v2711_v27 = vpop.permute.xlu1 %2710 }
0x104c   :  { %v2675_v58 = vpop.permute.xlu0 %2674 }
0x104d   :  { %3751 = vmatprep.subr.bf16.mxu0 %v2675_v58 }
0x104e   :  { %3752 = vmatpush3.bf16.msra.mxu0 %v2659_v8 }
0x104f   :  { %3753 = vmatprep.subr.bf16.mxu0 %v2677_v13 }
0x1050   :  { %v2669_v25 = vpop.permute.xlu0 %2668 }
0x1052   :  { %3754 = vmatpush3.bf16.msra.mxu0 %v5487_v41 }
0x1053   :  { %3755 = vmatprep.subr.bf16.mxu0 %v2679_v20 }
0x1054   :  { %v2705_v26 = vpop.permute.xlu0 %2704 }
0x1055   :  { %3777 = vmatprep.subr.bf16.mxu1 %v2705_v26 }
0x1056   :  { %3756 = vmatpush3.bf16.msra.mxu0 %v2663_v9 }
0x1057   :  { %3757 = vmatprep.subr.bf16.mxu0 %v2681_v10 }
0x1058   :  { %v2689_v5 = vpop.permute.xlu0 %2688  ;;  %v2667_v52 = vpop.permute.xlu1 %2666 }
0x1059   :  { %3778 = vmatpush3.bf16.msra.mxu1 %v2689_v5 }
0x105a   :  { %3758 = vmatpush3.bf16.msra.mxu0 %v2665_v40 }
0x105c   :  { %v2683_v3 = vpop.permute.xlu0 %2682  ;;  %v2695_v37 = vpop.permute.xlu1 %2694 }
0x105d   :  { %3759 = vmatprep.subr.bf16.mxu0 %v2683_v3 }
0x105e   :  { %3760 = vmatpush3.bf16.msra.mxu0 %v2667_v52 }
0x105f   :  { %3761 = vmatprep.subr.bf16.mxu0 %v2685_v11 }
0x1060   :  { %v2721_v55 = vpop.permute.xlu0 %2720 }
0x1062   :  { %3762 = vmatpush3.bf16.msra.mxu0 %v2669_v25 }
0x1063   :  { %3953 = vmatprep.subr.bf16.mxu0 %v2719_v21 }
0x1064   :  { %v2707_v56 = vpop.permute.xlu1 %2706 }
0x1065   :  { %v2709_v29 = vpop.permute.xlu0 %2708  ;;  %3779 = vmatprep.subr.bf16.mxu1 %v2707_v56  ;;  %2807 = vmatmul.mubr.bf16.vlgmr.msra.gmra.mrb[32].mxu0 %v5467_v34 }
0x1066   :  { %3954 = vmatpush3.bf16.msra.mxu0 %v2719_v21  ;;  %2814 = vmatprep.mubr.bf16.mxu0 %v5473_v39 }
0x1067   :  { %3955 = vmatprep.subr.bf16.mxu0 %v2721_v55 }
0x1068   :  { %v2691_v33 = vpop.permute.xlu1 %2690 }
0x1069   :  { %v2693_v4 = vpop.permute.xlu0 %2692  ;;  %3780 = vmatpush3.bf16.msra.mxu1 %v2691_v33 }
0x106a   :  { %3781 = vmatprep.subr.bf16.mxu1 %v2709_v29  ;;  %3956 = vmatpush3.bf16.msra.mxu0 %v2721_v55 }
0x106c   :  { %v2723_v44 = vpop.permute.xlu1 %2722 }
0x106d   :  { %v2725_v22 = vpop.permute.xlu0 %2724  ;;  %3782 = vmatpush3.bf16.msra.mxu1 %v2693_v4  ;;  %3957 = vmatprep.subr.bf16.mxu0 %v2723_v44 }
0x106e   :  { %3783 = vmatprep.subr.bf16.mxu1 %v2711_v27  ;;  %3958 = vmatpush3.bf16.msra.mxu0 %v2723_v44 }
0x106f   :  { %3959 = vmatprep.subr.bf16.mxu0 %v2725_v22  ;;  %2815 = vmatmul.mubr.bf16.gmra.mrb[36].mxu0 %v5483_v30 }
0x1070   :  { %v2727_v17 = vpop.permute.xlu1 %2726  ;;  %3969 = vmatprep.mubr.bf16.mxu0 %v5493_v38 }
0x1071   :  { %v2713_v18 = vpop.permute.xlu0 %2712  ;;  %3784 = vmatpush3.bf16.msra.mxu1 %v2695_v37 }
0x1072   :  { %3785 = vmatprep.subr.bf16.mxu1 %v2713_v18  ;;  %3960 = vmatpush3.bf16.msra.mxu0 %v2725_v22 }
0x1073   :  { %3961 = vmatprep.subr.bf16.mxu0 %v2727_v17 }
0x1074   :  { %v2715_v19 = vpop.permute.xlu1 %2714 }
0x1075   :  { %v2697_v45 = vpop.permute.xlu0 %2696 }
0x1076   :  { %3786 = vmatpush3.bf16.msra.mxu1 %v2697_v45  ;;  %3962 = vmatpush3.bf16.msra.mxu0 %v2727_v17 }
0x1077   :  { %3787 = vmatprep.subr.bf16.mxu1 %v2715_v19 }
0x1078   :  { %v2699_v1 = vpop.permute.xlu1 %2698 }
0x1079   :  { %v2729_v47 = vpop.permute.xlu0 %2728 }
0x107a   :  { %3788 = vmatpush3.bf16.msra.mxu1 %v2699_v1  ;;  %3963 = vmatprep.subr.bf16.mxu0 %v2729_v47 }
0x107b   :  { %3964 = vmatpush3.bf16.msra.mxu0 %v2729_v47 }
0x107c   :  { %v2731_v31 = vpop.permute.xlu1 %2730 }
0x107d   :  { %v2717_v48 = vpop.permute.xlu0 %2716  ;;  %3965 = vmatprep.subr.bf16.mxu0 %v2731_v31 }
0x107e   :  { %3789 = vmatprep.subr.bf16.mxu1 %v2717_v48 }
0x107f   :  { %3966 = vmatpush3.bf16.msra.mxu0 %v2731_v31 }
0x1080   :  { %v2733_v49 = vpop.permute.xlu1 %2732 }
0x1081   :  { %v2701_v43 = vpop.permute.xlu0 %2700  ;;  %3967 = vmatprep.subr.bf16.mxu0 %v2733_v49 }
0x1082   :  { %3790 = vmatpush3.bf16.msra.mxu1 %v2701_v43 }
0x1083   :  { %3968 = vmatpush3.bf16.msra.mxu0 %v2733_v49  ;;  %v2935_v49 = vld [vmem:[%s5658_s13 + $0x10] sm:$0xff] }
0x1085   :  { %2855 = vmatmul.mubr.bf16.vlgmr.msra.gmra.mrb[88].mxu1 %v5521_v28 }
0x1086   :  { %3970 = vmatmul.mubr.bf16.vlgmr.msra.gmra.mrb[40].mxu0 %v5543_v15  ;;  %2862 = vmatprep.mubr.bf16.mxu1 %v5525_v24 }
0x1087   :  { %3994 = vmatprep.mubr.msk.f32.mxu0 %vm4411_vm10, %v4410_v42 }
0x108d   :  { %2863 = vmatmul.mubr.bf16.gmra.mrb[92].mxu1 %v5549_v7 }
0x108e   :  { %3979 = vmatprep.mubr.msk.f32.mxu1 %vm4411_vm10, %v4410_v42 }
0x10c6   :  { %v3697_v50 = vpop.f32.mrb[76].mxu1 }
0x10c7   :  { %v3698_v51 = vpop.f32.mrb[77].mxu1 }
0x10c8   :  { %v3699_v53 = vadd.f32 %v3698_v51, %v3697_v50  ;;  %v3700_v54 = vpop.f32.mrb[78].mxu1 }
0x10c9   :  { %v3701_v34 = vpop.f32.mrb[79].mxu1 }
0x10ca   :  { %v3702_v59 = vadd.f32 %v3701_v34, %v3700_v54  ;;  %v2939_v34 = vpop.permute.xlu0 %2938 }
0x10ce   :  { %v3703_v60 = vpop.f32.mrb[80].mxu1 }
0x10cf   :  { %v3704_v62 = vpop.f32.mrb[81].mxu1 }
0x10d0   :  { %v3705_v39 = vadd.f32 %v3704_v62, %v3703_v60  ;;  %v3706_v36 = vpop.f32.mrb[82].mxu1 }
0x10d1   :  { %v3707_v30 = vpop.f32.mrb[83].mxu1 }
0x10de   :  { %v3725_v35 = vpop.f32.mrb[24].mxu0 }
0x10df   :  { %v3726_v41 = vpop.f32.mrb[25].mxu0 }
0x10e0   :  { %v3727_v38 = vadd.f32 %v3726_v41, %v3725_v35  ;;  %v3728_v63 = vpop.f32.mrb[26].mxu0 }
0x10e1   :  { %v3729_v0 = vpop.f32.mrb[27].mxu0 }
0x10e2   :  { %v3730_v46 = vadd.f32 %v3729_v0, %v3728_v63  ;;  %v2593_v28 = vadd.f32 %v3727_v38, %v3699_v53 }
0x10e4   :  { %v2596_v61 = vadd.f32 %v3730_v46, %v3702_v59  ;;  %v2944_v59 = vpop.permute.xlu1 %2943 }
0x10e6   :  { %v3951_v24 = vpop.f32.mrb[84].mxu1 }
0x10e7   :  { %v2640_v6 = vpop.f32.mrb[85].mxu1  ;;  %v3731_v15 = vpop.f32.mrb[28].mxu0 }
0x10e8   :  { %v2641_v57 = vadd.f32 %v2640_v6, %v2593_v28  ;;  %v3952_v7 = vpop.f32.mrb[86].mxu1  ;;  %v3732_v8 = vpop.f32.mrb[29].mxu0 }
0x10e9   :  { %v2643_v40 = vpop.f32.mrb[87].mxu1  ;;  %v3733_v16 = vadd.f32 %v3732_v8, %v3731_v15  ;;  %v3734_v12 = vpop.f32.mrb[30].mxu0 }
0x10ea   :  { %v2644_v9 = vadd.f32 %v2643_v40, %v2596_v61  ;;  %v3735_v10 = vpop.f32.mrb[31].mxu0 }
0x10eb   :  { %v2601_v14 = vadd.f32 %v3733_v16, %v3705_v39 }
0x10ed   :  { %v2649_v20 = vadd.f32 %v3951_v24, %v2601_v14 }
0x1138   :  { %v3763_v32 = vpop.f32.mrb[32].mxu0 }
0x1139   :  { %v3764_v13 = vpop.f32.mrb[33].mxu0 }
0x113a   :  { %v3765_v11 = vadd.f32 %v3764_v13, %v3763_v32  ;;  %v3766_v58 = vpop.f32.mrb[34].mxu0 }
0x113b   :  { %v3767_v21 = vpop.f32.mrb[35].mxu0 }
0x113c   :  { %v3768_v25 = vadd.f32 %v3767_v21, %v3766_v58 }
0x1142   :  { %v3769_v26 = vpop.f32.mrb[36].mxu0 }
0x1143   :  { %v3770_v27 = vpop.f32.mrb[37].mxu0 }
0x1144   :  { %v3771_v5 = vadd.f32 %v3770_v27, %v3769_v26  ;;  %v3772_v52 = vpop.f32.mrb[38].mxu0 }
0x1145   :  { %v3773_v3 = vpop.f32.mrb[39].mxu0 }
0x1146   :  { %v2972_v3 = vld [vmem:[%s5659_s14] sm:$0xff] }
0x1158   :  { %v3791_v37 = vpop.f32.mrb[88].mxu1 }
0x1159   :  { %v3792_v55 = vpop.f32.mrb[89].mxu1  ;;  %v3971_v56 = vpop.f32.mrb[40].mxu0 }
0x115a   :  { %v3793_v29 = vadd.f32 %v3792_v55, %v3791_v37  ;;  %v3794_v33 = vpop.f32.mrb[90].mxu1  ;;  %v2904_v4 = vpop.f32.mrb[41].mxu0  ;;  %v2973_v37 = vld [vmem:[%s5659_s14 + $0x8] sm:$0xff]  ;;  %v2974_v55 = vld [vmem:[%s5659_s14 + $0x10] sm:$0xff] }
0x115b   :  { %v3795_v44 = vpop.f32.mrb[91].mxu1  ;;  %v3972_v22 = vpop.f32.mrb[42].mxu0 }
0x115c   :  { %v2857_v17 = vadd.f32 %v3793_v29, %v3765_v11  ;;  %v3796_v18 = vadd.f32 %v3795_v44, %v3794_v33  ;;  %v2907_v19 = vpop.f32.mrb[43].mxu0  ;;  %v4416_v11 = vmov 0.0|0.0  }
0x115d   :  { %4043 = vmatprep.subr.bf16.mxu1 %v4416_v11  ;;  %4046 = vmatprep.subr.bf16.mxu0 %v4416_v11 }
0x115e   :  { %v2905_v45 = vadd.f32 %v2904_v4, %v2857_v17  ;;  %v2860_v1 = vadd.f32 %v3796_v18, %v3768_v25 }
0x1160   :  { %v2908_v47 = vadd.f32 %v2907_v19, %v2860_v1  ;;  %v3797_v31 = vpop.f32.mrb[92].mxu1  ;;  %2921 = vrot.lane.b32.xlu0 %v2905_v45, %s4415_s12 }
0x1161   :  { %v3798_v48 = vpop.f32.mrb[93].mxu1 }
0x1162   :  { %v3799_v43 = vadd.f32 %v3798_v48, %v3797_v31  ;;  %2923 = vrot.lane.b32.xlu1 %v2908_v47, %s4415_s12  ;;  %v3800_v50 = vpop.f32.mrb[94].mxu1 }
0x1163   :  { %v3801_v51 = vpop.f32.mrb[95].mxu1 }
0x1164   :  { %v2865_v53 = vadd.f32 %v3799_v43, %v3771_v5  ;;  %2948 = vperm.xlu0 %4082, %v2935_v49  }
0x1166   :  { %v2913_v54 = vadd.f32 %v3971_v56, %v2865_v53 }
0x1168   :  { %2925 = vrot.lane.b32.xlu1 %v2913_v54, %s4415_s12 }
0x11d2   :  { %v2922_v60 = vpop.permute.xlu0 %2921 }
0x11d3   :  { %v2930_v62 = vsel %vm286_vm0, %v2641_v57, %v2922_v60 }
0x11d4   :  { %v2951_v39 = vadd.f32 %v2939_v34, %v2930_v62  ;;  %v2924_v36 = vpop.permute.xlu1 %2923 }
0x11d5   :  { %v2931_v30 = vsel %vm286_vm0, %v2644_v9, %v2924_v36 }
0x11d6   :  { %v2957_v35 = vmin.f32 %v2951_v39, 0.0  ;;  %v2952_v41 = vadd.f32 %v2944_v59, %v2931_v30  ;;  %vm2954_vm12 = vcmp.gt.f32.partialorder %v2951_v39, 0.0 }
0x11d8   :  { %v2960_v38 = vmul.f32 1.442695, %v2957_v35  ;;  %v2958_v63 = vmin.f32 %v2952_v41, 0.0  ;;  %vm2955_vm13 = vcmp.gt.f32.partialorder %v2952_v41, 0.0 }
0x11da   :  { %4377 = vpow2.f32 %v2960_v38  ;;  %v2962_v0 = vmul.f32 1.442695, %v2958_v63  ;;  %v2926_v46 = vpop.permute.xlu1 %2925 }
0x11db   :  { %v2932_v28 = vsel %vm286_vm0, %v2649_v20, %v2926_v46 }
0x11dc   :  { %4379 = vpow2.f32 %v2962_v0 }
0x11e3   :  { %v2949_v61 = vpop.permute.xlu0 %2948 }
0x11e4   :  { %v4378_v24 = vpop.eup %4377  ;;  %v2953_v6 = vadd.f32 %v2949_v61, %v2932_v28 }
0x11e5   :  { %v3550_v15 = vadd.f32 -1.0, %v4378_v24 }
0x11e6   :  { %v4380_v7 = vpop.eup %4379  ;;  %v2959_v57 = vmin.f32 %v2953_v6, 0.0  ;;  %vm2956_vm14 = vcmp.gt.f32.partialorder %v2953_v6, 0.0 }
0x11e7   :  { %v2969_v8 = vsel %vm2954_vm12, %v2951_v39, %v3550_v15  ;;  %v3551_v40 = vadd.f32 -1.0, %v4380_v7 }
0x11e8   :  { %v2964_v16 = vmul.f32 1.442695, %v2959_v57  ;;  %v2975_v12 = vsel %vm430_vm1, %v2969_v8, 0.0 }
0x11e9   :  { %2976 = vadd.xlane.f32.xlu0 %v2975_v12  ;;  %v2970_v9 = vsel %vm2955_vm13, %v2952_v41, %v3551_v40 }
0x11ea   :  { %4381 = vpow2.f32 %v2964_v16  ;;  %v2978_v10 = vsel %vm430_vm1, %v2970_v9, 0.0 }
0x11eb   :  { %2979 = vadd.xlane.f32.xlu1 %v2978_v10 }
0x11f4   :  { %v4382_v14 = vpop.eup %4381 }
0x11f5   :  { %v3552_v20 = vadd.f32 -1.0, %v4382_v14 }
0x11f7   :  { %v2971_v32 = vsel %vm2956_vm14, %v2953_v6, %v3552_v20 }
0x11f8   :  { %v2981_v13 = vsel %vm430_vm1, %v2971_v32, 0.0 }
0x11f9   :  { %2982 = vadd.xlane.f32.xlu0 %v2981_v13  ;;  %v4327_v13 = vld [vmem:[%s5661_s16] sm:$0xff]  }
0x1276   :  { %v2977_v58 = vpop.xlane.xlu0 %2976 }
0x1277   :  { %v2985_v25 = vmul.f32 0.03125, %v2977_v58 }
0x1278   :  { %v2980_v21 = vpop.xlane.xlu1 %2979 }
0x1279   :  { %v2986_v26 = vmul.f32 0.03125, %v2980_v21 }
0x127b   :  { %v4044_v27 = vpack.c.bf16 %v2986_v26, %v2985_v25 }
0x127d   :  { %4045 = vmatpush3.bf16.msra.mxu1 %v4044_v27 }
0x127e   :  { %3977 = vmatprep.subr.mxu1 %v4410_v42 }
0x1286   :  { %v2983_v5 = vpop.xlane.xlu0 %2982 }
0x1287   :  { %v2987_v52 = vmul.f32 0.03125, %v2983_v5 }
0x1289   :  { %3978 = vmatpush3.msra.mxu1 %v2987_v52 }
0x128a   :  { %3980 = vmatmul.mubr.msk.f32.vlgmr.msra.gmra.mrb[96].mxu1 %vm2260_vm8, %v2972_v3  ;;  %4003 = vmatprep.subr.bf16.mxu1 %v4410_v42 }
0x128b   :  { %3982 = vmatprep.mubr.msk.f32.mxu1 %vm4411_vm10, %v4410_v42 }
0x128e   :  { %3983 = vmatmul.mubr.msk.f32.gmra.mrb[98].mxu1 %vm2260_vm8, %v2973_v37 }
0x128f   :  { %3985 = vmatprep.mubr.msk.f32.mxu1 %vm4411_vm10, %v4410_v42 }
0x1292   :  { %3986 = vmatmul.mubr.msk.f32.gmra.mrb[100].mxu1 %vm2260_vm8, %v2974_v55 }
0x1293   :  { %4007 = vmatprep.mubr.msk.bf16.mxu1 %vm4411_vm10, %v4410_v42 }
0x135d   :  { %v3063_v56 = vpop.f32.mrb[96].mxu1 }
0x135e   :  { %3079 = vperm.xlu0 %4082, %v3063_v56   ;;  %v3981_v29 = vpop.f32.mrb[97].mxu1 }
0x135f   :  { %v4326_v29 = vld [vmem:[%s5660_s15] sm:$0x3f]  }
0x1361   :  { %v3068_v33 = vpop.f32.mrb[98].mxu1 }
0x1362   :  { %3084 = vperm.xlu1 %4083, %v3068_v33   ;;  %v3984_v4 = vpop.f32.mrb[99].mxu1 }
0x1365   :  { %v3073_v44 = vpop.f32.mrb[100].mxu1 }
0x1366   :  { %3089 = vperm.xlu1 %4083, %v3073_v44   ;;  %v3987_v22 = vpop.f32.mrb[101].mxu1 }
0x13dd   :  { %v3080_v17 = vpop.permute.xlu0 %3079 }
0x13de   :  { %v3092_v18 = vsub.f32 %v2969_v8, %v3080_v17 }
0x13e0   :  { %v3095_v19 = vmul.f32 %v3092_v18, %v3092_v18 }
0x13e1   :  { %v3085_v45 = vpop.permute.xlu1 %3084 }
0x13e2   :  { %v3093_v1 = vsub.f32 %v2970_v9, %v3085_v45  ;;  %v3098_v47 = vsel %vm430_vm1, %v3095_v19, 0.0  ;;  %v3365_v45 = vld [vmem:[%s5662_s17 + $0x8] sm:$0xf] }
0x13e3   :  { %3099 = vadd.xlane.f32.xlu0 %v3098_v47 }
0x13e4   :  { %v3096_v31 = vmul.f32 %v3093_v1, %v3093_v1 }
0x13e5   :  { %v3090_v48 = vpop.permute.xlu1 %3089 }
0x13e6   :  { %v3094_v49 = vsub.f32 %v2971_v32, %v3090_v48  ;;  %v3101_v43 = vsel %vm430_vm1, %v3096_v31, 0.0 }
0x13e7   :  { %3102 = vadd.xlane.f32.xlu1 %v3101_v43 }
0x13e8   :  { %v3097_v50 = vmul.f32 %v3094_v49, %v3094_v49 }
0x13ea   :  { %v3104_v51 = vsel %vm430_vm1, %v3097_v50, 0.0  ;;  %vm3253_vm1 = vcmask 1042432  }
0x13eb   :  { %3105 = vadd.xlane.f32.xlu0 %v3104_v51  ;;  %v3254_v27 = vsel %vm3253_vm1, 4294967295, %v4413_v2  ;;  %v4328_v2 = vld [vmem:[%s5661_s16 + $0x8] sm:$0xff]  }
0x13ec   :  { %v3321_v33 = vand.u32 %v4328_v2, %v5270_v23 }
0x1470   :  { %v3100_v53 = vpop.xlane.xlu0 %3099 }
0x1471   :  { %v3107_v34 = vmul.f32 0.03125, %v3100_v53 }
0x1474   :  { %v3103_v54 = vpop.xlane.xlu1 %3102 }
0x1475   :  { %v3108_v59 = vmul.f32 0.03125, %v3103_v54 }
0x1477   :  { %v4047_v60 = vpack.c.bf16 %v3108_v59, %v3107_v34 }
0x1478   :  { %v3106_v62 = vpop.xlane.xlu0 %3105 }
0x1479   :  { %4048 = vmatpush3.bf16.msra.mxu0 %v4047_v60  ;;  %v3109_v39 = vmul.f32 0.03125, %v3106_v62 }
0x147a   :  { %3992 = vmatprep.subr.mxu0 %v4410_v42 }
0x147d   :  { %3993 = vmatpush3.msra.mxu0 %v3109_v39  ;;  %v24_v39 = vstv %s5663_s18 }
0x147e   :  { %3995 = vmatmul.mubr.msk.f32.vlgmr.msra.gmra.mrb[44].mxu0 %vm2260_vm8, %v2972_v3  ;;  %4011 = vmatprep.subr.bf16.mxu0 %v4410_v42  ;;  %25 = vst [vmem:[#allocation2] sm:$0x1] %v24_v39 }
0x147f   :  { %3997 = vmatprep.mubr.msk.f32.mxu0 %vm4411_vm10, %v4410_v42  ;;  %4012 = vmatpush3.bf16.msra.mxu0 %v4327_v13 }
0x1480   :  { %4013 = vmatprep.subr.bf16.mxu0 %v4410_v42 }
0x1482   :  { %3998 = vmatmul.mubr.msk.f32.gmra.mrb[46].mxu0 %vm2260_vm8, %v2973_v37 }
0x1483   :  { %4000 = vmatprep.mubr.msk.f32.mxu0 %vm4411_vm10, %v4410_v42  ;;  %4014 = vmatpush3.bf16.msra.mxu0 %v3321_v33 }
0x1486   :  { %4001 = vmatmul.mubr.msk.f32.gmra.mrb[48].mxu0 %vm2260_vm8, %v2974_v55  ;;  %v3255_v55 = vsel %vm435_vm3, %v3254_v27, 0  ;;  %vm3316_vm3 = vcmask 252928  }
0x1487   :  { %4015 = vmatprep.mubr.msk.bf16.mxu0 %vm4411_vm10, %v4410_v42  ;;  %vm3249_vm10 = vcmask 187392  }
0x1551   :  { %v3176_v36 = vpop.f32.mrb[44].mxu0 }
0x1552   :  { %4383 = vrsqrt.f32 %v3176_v36  ;;  %v3996_v30 = vpop.f32.mrb[45].mxu0 }
0x1555   :  { %v3181_v35 = vpop.f32.mrb[46].mxu0 }
0x1556   :  { %4385 = vrsqrt.f32 %v3181_v35  ;;  %v3999_v41 = vpop.f32.mrb[47].mxu0  ;;  %v3564_v35 = vld [vmem:[#allocation2] ss:$0 sm:$0xff] }
0x1559   :  { %v3186_v38 = vpop.f32.mrb[48].mxu0 }
0x155a   :  { %4387 = vrsqrt.f32 %v3186_v38  ;;  %v4002_v63 = vpop.f32.mrb[49].mxu0 }
0x155c   :  { %v4384_v0 = vpop.eup %4383 }
0x155d   :  { %3195 = vperm.xlu0 %4082, %v4384_v0  }
0x1560   :  { %v4386_v46 = vpop.eup %4385 }
0x1561   :  { %3200 = vperm.xlu1 %4083, %v4386_v46  }
0x1564   :  { %v4388_v28 = vpop.eup %4387 }
0x1565   :  { %3205 = vperm.xlu1 %4083, %v4388_v28  }
0x15dc   :  { %v3196_v61 = vpop.permute.xlu0 %3195 }
0x15dd   :  { %v3208_v6 = vmul.f32 %v3196_v61, %v3092_v18  ;;  %v3364_v18 = vld [vmem:[%s5662_s17] sm:$0xff] }
0x15df   :  { %v3214_v8 = vrot.slane %v3208_v6, 1 }
0x15e0   :  { %v3201_v24 = vpop.permute.xlu1 %3200 }
0x15e1   :  { %v3209_v15 = vmul.f32 %v3201_v24, %v3093_v1 }
0x15e3   :  { %v3215_v7 = vrot.slane %v3209_v15, 1 }
0x15e4   :  { %v3206_v57 = vpop.permute.xlu1 %3205 }
0x15e5   :  { %v3210_v40 = vmul.f32 %v3206_v57, %v3094_v49  ;;  %v3216_v16 = vsel %vm1654_vm15, %v3214_v8, %v3215_v7 }
0x15e6   :  { %v3222_v14 = vmax.f32 %v3208_v6, %v3216_v16 }
0x15e7   :  { %v3217_v12 = vrot.slane %v3210_v40, 1 }
0x15e9   :  { %v3218_v9 = vsel %vm1654_vm15, %v3215_v7, %v3217_v12  ;;  %v3224_v10 = vmax.f32 %v3210_v40, %v3217_v12  ;;  %vm3369_vm15 = vcmask 125952  }
0x15ea   :  { %v3223_v20 = vmax.f32 %v3209_v15, %v3218_v9 }
0x15eb   :  { %3232 = vrot.lane.b32.xlu1 %v3224_v10, %s4395_s20 }
0x15ec   :  { %v4204_v32 = vpack.i.bf16 %v3223_v20, %v3222_v14 }
0x15ee   :  { %4205 = vrot.lane.b32.xlu0 %v4204_v32, %s4395_s20 }
0x165d   :  { %v3233_v11 = vpop.permute.xlu1 %3232 }
0x165e   :  { %v3239_v21 = vmax.f32 %v3224_v10, %v3233_v11 }
0x1660   :  { %v4206_v58 = vpop.permute.xlu0 %4205  ;;  %v3243_v3 = vpack.c.bf16 %v3239_v21, %v3239_v21 }
0x1661   :  { %v4208_v25 = vunpack.i.h.bf16 %v4206_v58  ;;  %v4207_v26 = vunpack.i.l.bf16 %v4206_v58 }
0x1662   :  { %v3257_v56 = vand.u32 %v3255_v55, %v3243_v3 }
0x1663   :  { %v3238_v5 = vmax.f32 %v3223_v20, %v4208_v25  ;;  %v3237_v52 = vmax.f32 %v3222_v14, %v4207_v26 }
0x1665   :  { %v3242_v37 = vpack.c.bf16 %v3238_v5, %v3237_v52 }
0x1667   :  { %4004 = vmatpush3.bf16.msra.mxu1 %v3242_v37 }
0x1668   :  { %4005 = vmatprep.subr.bf16.mxu1 %v4410_v42 }
0x166b   :  { %4006 = vmatpush3.bf16.msra.mxu1 %v3257_v56 }
0x166e   :  { %4008 = vmatmul.mubr.msk.bf16.vlgmr.msra.gmra.mrb[104].mxu1 %vm3249_vm10, %v4326_v29 }
0x1741   :  { %v3293_v4 = vpop.f32.mrb[104].mxu1 }
0x1742   :  { %v4009_v44 = vpop.f32.mrb[105].mxu1 }
0x1743   :  { %v3296_v22 = vpop.f32.mrb[106].mxu1 }
0x1744   :  { %v3304_v42 = vpack.c.bf16 %v3296_v22, %v3293_v4  ;;  %v4010_v17 = vpop.f32.mrb[107].mxu1 }
0x1746   :  { %4016 = vmatmul.mubr.msk.bf16.vlgmr.msra.gmra.mrb[52].mxu0 %vm3316_vm3, %v3304_v42 }
0x1819   :  { %v3357_v19 = vpop.f32.mrb[52].mxu0 }
0x181a   :  { %v3366_v1 = vmul.f32 %v3364_v18, %v3357_v19  ;;  %v4017_v47 = vpop.f32.mrb[53].mxu0 }
0x181b   :  { %v3360_v23 = vpop.f32.mrb[54].mxu0 }
0x181c   :  { %v3367_v31 = vmul.f32 %v3365_v45, %v3360_v23  ;;  %v4018_v48 = vpop.f32.mrb[55].mxu0  ;;  %v3368_v49 = vsel %vm286_vm0, %v3366_v1, 0.0  ;;  %vm3389_vm0 = vcmask 1040384  }
0x181e   :  { %v3370_v43 = vsel %vm3369_vm15, %v3367_v31, 0.0 }
0x181f   :  { %v3371_v50 = vadd.f32 %v3370_v43, %v3368_v49 }
0x1821   :  { %v3372_v51 = vrot.slane %v3371_v50, 4 }
0x1823   :  { %v3373_v53 = vadd.f32 %v3372_v51, %v3371_v50 }
0x1825   :  { %v3374_v54 = vrot.slane %v3373_v53, 2 }
0x1827   :  { %v3375_v34 = vadd.f32 %v3374_v54, %v3373_v53 }
0x1829   :  { %v3376_v59 = vrot.slane %v3375_v34, 1 }
0x182b   :  { %v3377_v60 = vadd.f32 %v3376_v59, %v3375_v34 }
0x182d   :  { %3383 = vrot.lane.b32.xlu0 %v3377_v60, %s5682_s10  ;;  %v3379_v62 = vsel %vm3378_vm2, %v3377_v60, 0.0 }
0x182e   :  { %3380 = vadd.xlane.f32.xlu1 %v3379_v62 }
0x189f   :  { %v3384_v36 = vpop.permute.xlu0 %3383 }
0x18a0   :  { %v3386_v30 = vsel %vm3378_vm2, %v3384_v36, 0.0 }
0x18a1   :  { %3387 = vadd.xlane.f32.xlu0 %v3386_v30 }
0x18bb   :  { %v3381_v41 = vpop.xlane.xlu1 %3380 }
0x192e   :  { %v3388_v38 = vpop.xlane.xlu0 %3387 }
0x192f   :  { %v3390_v63 = vsel %vm3389_vm0, %v3381_v41, %v3388_v38 }
0x1930   :  { %v3398_v0 = vadd.f32 %v3564_v35, %v3390_v63 }
0x1932   :  { %v3399_v46 = vsub.f32 0.0, %v3398_v0 }
0x1934   :  { %v3400_v28 = vmul.f32 1.442695, %v3399_v46 }
0x1936   :  { %4389 = vpow2.f32 %v3400_v28 }
0x1940   :  { %v4390_v61 = vpop.eup %4389 }
0x1941   :  { %v3402_v24 = vadd.f32 1.0, %v4390_v61 }
0x1943   :  { %4391 = vrcp.f32 %v3402_v24 }
0x194d   :  { %v4392_v6 = vpop.eup %4391 }
0x194e   :  { %3406 = vst.msk [vmem:[%s5664_s19] sm:$0x3] %vm3405_vm4, %v4392_v6 }

</bundles_post_ra>
